<compile_context>
chip_gen: v6e
topology: v6e:2x2x1
jax: 0.10.0
libtpu: 0.0.40
codegen_flags: <defaults>
</compile_context>

<pallas_src>
import jax
import jax.numpy as jnp
from jax.experimental import pallas as pl
from jax.experimental.pallas import tpu as pltpu


# ---------------------------------------------------------------------------
# Fused kernel: whole forward for one batch tile
# ---------------------------------------------------------------------------
def _lenet_kernel(x_ref, m1e_ref, m1o_ref, sh1_ref, m2e_ref, m2o_ref, sh2_ref,
                  g_ref, b1_ref, w2_ref, b2_ref, o_ref):
    tb = o_ref.shape[0]                      # batch tile (multiple of 8)

    def conv_bn_relu_pool(src, oh, me_ref, mo_ref, sh_ref):
        # src: [H_in, tb, W_in*C_in]  ->  returns [oh//2, tb, (W_out//2)*C_out]
        wc = src.shape[2]
        kh = me_ref.shape[0]
        acc_e = None
        acc_o = None
        for i in range(kh):                               # unrolled (kh == 5)
            slab = src[i:i + oh].reshape(oh * tb, wc)      # rows (oh, n)
            te = jnp.dot(slab, me_ref[i], preferred_element_type=jnp.float32)
            to = jnp.dot(slab, mo_ref[i], preferred_element_type=jnp.float32)
            acc_e = te if acc_e is None else acc_e + te
            acc_o = to if acc_o is None else acc_o + to
        # W-pool (even/odd already selected by me/mo) + BN shift + ReLU
        c = jnp.maximum(jnp.maximum(acc_e, acc_o) + sh_ref[...], 0.0)
        # H-pool: max over adjacent output rows
        c = c.reshape(oh // 2, 2, tb, c.shape[1])
        return jnp.maximum(c[:, 0], c[:, 1])

    x = x_ref[...]                                         # [28, tb, 28]
    p1 = conv_bn_relu_pool(x, 24, m1e_ref, m1o_ref, sh1_ref)   # [12, tb, 60]
    p2 = conv_bn_relu_pool(p1, 8, m2e_ref, m2o_ref, sh2_ref)   # [4,  tb, 40]

    # fc1 (+ReLU): sum over the 4 H positions; fw1 rows pre-permuted & padded.
    h = None
    for hh in range(4):
        t = jnp.dot(p2[hh], g_ref[hh], preferred_element_type=jnp.float32)
        h = t if h is None else h + t
    h = jnp.maximum(h + b1_ref[...], 0.0)                  # [tb, 128]

    logits = jnp.dot(h, w2_ref[...], preferred_element_type=jnp.float32) + b2_ref[...]
    m = jnp.max(logits, axis=1, keepdims=True)
    lse = m + jnp.log(jnp.sum(jnp.exp(logits - m), axis=1, keepdims=True))
    o_ref[...] = logits - lse                              # [tb, 10]


# ---------------------------------------------------------------------------
# Parameter preparation (trace-time only): fold BN, build im2col/pool matrices
# ---------------------------------------------------------------------------
def _conv_pool_mats(w_oihw, bias, gamma, beta, mean, var, ow, eps=1e-5):
    """Returns (Me, Mo, shift) for conv+BN with output width `ow`.

    Me/Mo: [KH, W_in*IC, (ow//2)*OC] -- row (w, ic), column (pooled_w, oc),
    already scaled by the BN scale and restricted to even/odd output columns.
    shift: [1, (ow//2)*OC] -- folded conv bias + BN shift, tiled over lanes.
    """
    oc, ic, kh, kw = w_oihw.shape
    w_in = ow + kw - 1
    scale = gamma / jnp.sqrt(var + eps)
    shift = beta + (bias - mean) * scale                     # [oc]
    w_eff = w_oihw * scale[:, None, None, None]              # [oc, ic, kh, kw]

    eye = jnp.eye(ow, dtype=jnp.float32)
    mats = []
    for i in range(kh):
        m_i = jnp.zeros((w_in, ic, ow, oc), jnp.float32)
        for j in range(kw):
            d_j = jnp.pad(eye, ((j, kw - 1 - j), (0, 0)))    # d_j[v + j, v] = 1
            m_i = m_i + jnp.einsum('wv,od->wdvo', d_j, w_eff[:, :, i, j])
        mats.append(m_i.reshape(w_in * ic, ow * oc))
    m_full = jnp.stack(mats, axis=0)                         # [kh, w_in*ic, ow*oc]

    m4 = m_full.reshape(kh, w_in * ic, ow, oc)
    me = m4[:, :, 0::2, :].reshape(kh, w_in * ic, (ow // 2) * oc)
    mo = m4[:, :, 1::2, :].reshape(kh, w_in * ic, (ow // 2) * oc)
    sh = jnp.tile(shift, ow // 2).reshape(1, (ow // 2) * oc)
    return me, mo, sh


def _fc_mats(fw1, fb1, fw2, fb2):
    # fw1: [160, 100] (in, out); torch flatten order of "in" is c*16 + h*4 + w.
    g = fw1.reshape(10, 4, 4, 100)                           # [c, h, w, k]
    g = jnp.transpose(g, (1, 2, 0, 3)).reshape(4, 40, 100)   # [h, (w,c), k]
    g = jnp.pad(g, ((0, 0), (0, 0), (0, 28)))                # pad hidden -> 128
    b1 = jnp.pad(fb1, (0, 28)).reshape(1, 128)
    w2 = jnp.pad(fw2, ((0, 28), (0, 0)))                     # [128, 10]
    b2 = fb2.reshape(1, 10)
    return g, b1, w2, b2


# ---------------------------------------------------------------------------
# Forward
# ---------------------------------------------------------------------------
def torch_model_forward(x_nchw, params):
    n = x_nchw.shape[0]
    tb = 128 if n >= 128 else ((n + 7) // 8) * 8             # batch tile (mult of 8)
    n_pad = ((n + tb - 1) // tb) * tb

    # H-major layout: [H=28, N, W=28] (C_in == 1)
    x = jnp.transpose(x_nchw[:, 0, :, :], (1, 0, 2)).astype(jnp.float32)
    if n_pad != n:
        x = jnp.pad(x, ((0, 0), (0, n_pad - n), (0, 0)))

    m1e, m1o, sh1 = _conv_pool_mats(params["w1"], params["c1b"], params["g1"],
                                    params["be1"], params["m1"], params["v1"], ow=24)
    m2e, m2o, sh2 = _conv_pool_mats(params["w2"], params["c2b"], params["g2"],
                                    params["be2"], params["m2"], params["v2"], ow=8)
    g, b1, w2, b2 = _fc_mats(params["fw1"], params["fb1"], params["fw2"], params["fb2"])

    def const_spec(arr):
        zeros = (0,) * arr.ndim
        return pl.BlockSpec(arr.shape, lambda b, z=zeros: z)

    out = pl.pallas_call(
        _lenet_kernel,
        out_shape=jax.ShapeDtypeStruct((n_pad, 10), jnp.float32),
        grid=(n_pad // tb,),
        in_specs=[
            pl.BlockSpec((28, tb, 28), lambda b: (0, b, 0)),
            const_spec(m1e), const_spec(m1o), const_spec(sh1),
            const_spec(m2e), const_spec(m2o), const_spec(sh2),
            const_spec(g), const_spec(b1), const_spec(w2), const_spec(b2),
        ],
        out_specs=pl.BlockSpec((tb, 10), lambda b: (b, 0)),
        compiler_params=pltpu.CompilerParams(
            dimension_semantics=("parallel",)),
    )(x, m1e, m1o, sh1, m2e, m2o, sh2, g, b1, w2, b2)
    return out[:n]


# ---------------------------------------------------------------------------
# Pure-JAX reference (same math) for a correctness sanity check
# ---------------------------------------------------------------------------
def _im2col(x_nhwc, kh, kw):
    n, h, w, c = x_nhwc.shape
    oh, ow = h - kh + 1, w - kw + 1
    cols = []
    for i in range(kh):
        for j in range(kw):
            cols.append(x_nhwc[:, i:i + oh, j:j + ow, :])
    patches = jnp.concatenate(cols, axis=-1)
    return patches.reshape(n * oh * ow, kh * kw * c), (n, oh, ow)


def _reference(x_nchw, p):
    def conv(x, w, b):
        oc, ic, kh, kw = w.shape
        patches, (n, oh, ow) = _im2col(x, kh, kw)
        wm = jnp.transpose(w, (2, 3, 1, 0)).reshape(kh * kw * ic, oc)
        return (patches @ wm + b).reshape(n, oh, ow, oc)

    def bn(x, g, be, m, v):
        return g * (x - m) / jnp.sqrt(v + 1e-5) + be

    def pool(x):
        n, h, w, c = x.shape
        return jnp.max(x.reshape(n, h // 2, 2, w // 2, 2, c), axis=(2, 4))

    x = jnp.transpose(x_nchw, (0, 2, 3, 1))
    x = pool(jax.nn.relu(bn(conv(x, p["w1"], p["c1b"]), p["g1"], p["be1"], p["m1"], p["v1"])))
    x = pool(jax.nn.relu(bn(conv(x, p["w2"], p["c2b"]), p["g2"], p["be2"], p["m2"], p["v2"])))
    x = jnp.transpose(x, (0, 3, 1, 2)).reshape(x.shape[0], 160)
    h = jax.nn.relu(x @ p["fw1"] + p["fb1"])
    logits = h @ p["fw2"] + p["fb2"]
    return jax.nn.log_softmax(logits, axis=1)


# ---------------------------------------------------------------------------
def _init_params(key):
    ks = jax.random.split(key, 12)
    f32 = jnp.float32
    p = {
        "w1": 0.1 * jax.random.normal(ks[0], (5, 1, 5, 5), f32),
        "c1b": 0.1 * jax.random.normal(ks[1], (5,), f32),
        "g1": 1.0 + 0.1 * jax.random.normal(ks[2], (5,), f32),
        "be1": 0.1 * jax.random.normal(ks[3], (5,), f32),
        "m1": 0.05 * jax.random.normal(ks[4], (5,), f32),
        "v1": 0.5 + jnp.abs(jax.random.normal(ks[5], (5,), f32)),
        "w2": 0.1 * jax.random.normal(ks[6], (10, 5, 5, 5), f32),
        "c2b": 0.1 * jax.random.normal(ks[7], (10,), f32),
        "g2": 1.0 + 0.1 * jax.random.normal(ks[8], (10,), f32),
        "be2": 0.1 * jax.random.normal(ks[9], (10,), f32),
        "m2": 0.05 * jax.random.normal(ks[10], (10,), f32),
        "v2": 0.5 + jnp.abs(jax.random.normal(ks[11], (10,), f32)),
    }
    k2 = jax.random.split(jax.random.fold_in(key, 1), 4)
    p["fw1"] = 0.05 * jax.random.normal(k2[0], (160, 100), f32)   # fc1 (in, out)
    p["fb1"] = 0.05 * jax.random.normal(k2[1], (100,), f32)
    p["fw2"] = 0.05 * jax.random.normal(k2[2], (100, 10), f32)    # fc2 (in, out)
    p["fb2"] = 0.05 * jax.random.normal(k2[3], (10,), f32)
    return p


if __name__ == "__main__":
    key = jax.random.PRNGKey(0)
    params = _init_params(key)
    # MNIST-like input (28x28 is required so the 4*4*10 flatten is valid).
    x = jax.random.normal(jax.random.fold_in(key, 7), (2, 1, 28, 28), jnp.float32)

    fwd = jax.jit(torch_model_forward)
    out = jax.block_until_ready(fwd(x, params))

    ref = _reference(x, params)
    assert out.shape == (2, 10), out.shape
    assert jnp.allclose(out, ref, atol=5e-3, rtol=5e-3), "mismatch vs JAX reference"

    print("KERNEL_OK")
</pallas_src>

<mosaic_0001>
module attributes {stable_mosaic.version = 11 : i64} {
  func.func @_lenet_kernel(%arg0: i32, %arg1: memref<28x8x28xf32, #tpu.memory_space<vmem>>, %arg2: memref<5x28x60xf32, #tpu.memory_space<vmem>>, %arg3: memref<5x28x60xf32, #tpu.memory_space<vmem>>, %arg4: memref<1x60xf32, #tpu.memory_space<vmem>>, %arg5: memref<5x60x40xf32, #tpu.memory_space<vmem>>, %arg6: memref<5x60x40xf32, #tpu.memory_space<vmem>>, %arg7: memref<1x40xf32, #tpu.memory_space<vmem>>, %arg8: memref<4x40x128xf32, #tpu.memory_space<vmem>>, %arg9: memref<1x128xf32, #tpu.memory_space<vmem>>, %arg10: memref<128x10xf32, #tpu.memory_space<vmem>>, %arg11: memref<1x10xf32, #tpu.memory_space<vmem>>, %arg12: memref<8x10xf32, #tpu.memory_space<vmem>>) attributes {dimension_semantics = [#tpu.dimension_semantics<parallel>], iteration_bounds = array<i64: 1>, scalar_prefetch = 0 : i64, scratch_operands = 0 : i64, tpu.core_type = #tpu.core_type<tc>, window_params = [{transform_indices = @transform_0, window_bounds = array<i64: 28, 8, 28>}, {pipeline_mode = #tpu.pipeline_mode<synchronous>, transform_indices = @transform_1, window_bounds = array<i64: 5, 28, 60>}, {pipeline_mode = #tpu.pipeline_mode<synchronous>, transform_indices = @transform_2, window_bounds = array<i64: 5, 28, 60>}, {pipeline_mode = #tpu.pipeline_mode<synchronous>, transform_indices = @transform_3, window_bounds = array<i64: 1, 60>}, {pipeline_mode = #tpu.pipeline_mode<synchronous>, transform_indices = @transform_4, window_bounds = array<i64: 5, 60, 40>}, {pipeline_mode = #tpu.pipeline_mode<synchronous>, transform_indices = @transform_5, window_bounds = array<i64: 5, 60, 40>}, {pipeline_mode = #tpu.pipeline_mode<synchronous>, transform_indices = @transform_6, window_bounds = array<i64: 1, 40>}, {pipeline_mode = #tpu.pipeline_mode<synchronous>, transform_indices = @transform_7, window_bounds = array<i64: 4, 40, 128>}, {pipeline_mode = #tpu.pipeline_mode<synchronous>, transform_indices = @transform_8, window_bounds = array<i64: 1, 128>}, {pipeline_mode = #tpu.pipeline_mode<synchronous>, transform_indices = @transform_9, window_bounds = array<i64: 128, 10>}, {pipeline_mode = #tpu.pipeline_mode<synchronous>, transform_indices = @transform_10, window_bounds = array<i64: 1, 10>}, {transform_indices = @transform_11, window_bounds = array<i64: 8, 10>}]} {
    %c0 = arith.constant 0 : index
    %c0_0 = arith.constant 0 : index
    %c0_1 = arith.constant 0 : index
    %0 = vector.load %arg1[%c0, %c0_0, %c0_1] : memref<28x8x28xf32, #tpu.memory_space<vmem>>, vector<28x8x28xf32>
    %1 = vector.extract_strided_slice %0 {offsets = [0, 0, 0], sizes = [24, 8, 28], strides = [1, 1, 1]} : vector<28x8x28xf32> to vector<24x8x28xf32>
    %2 = vector.shape_cast %1 : vector<24x8x28xf32> to vector<192x28xf32>
    %c0_2 = arith.constant 0 : index
    %c0_3 = arith.constant 0 : index
    %c0_4 = arith.constant 0 : index
    %3 = vector.load %arg2[%c0_2, %c0_3, %c0_4] : memref<5x28x60xf32, #tpu.memory_space<vmem>>, vector<1x28x60xf32>
    %4 = vector.shape_cast %3 : vector<1x28x60xf32> to vector<28x60xf32>
    %cst = arith.constant dense<0.000000e+00> : vector<192x60xf32>
    %5 = tpu.matmul %2, %4, %cst {dimension_numbers = #tpu.dot_dimension_numbers<[1], [0], [0], [1], [0, 0, 1, 1], [], []>} : vector<192x28xf32>, vector<28x60xf32>, vector<192x60xf32> -> vector<192x60xf32>
    %c0_5 = arith.constant 0 : index
    %c0_6 = arith.constant 0 : index
    %c0_7 = arith.constant 0 : index
    %6 = vector.load %arg3[%c0_5, %c0_6, %c0_7] : memref<5x28x60xf32, #tpu.memory_space<vmem>>, vector<1x28x60xf32>
    %7 = vector.shape_cast %6 : vector<1x28x60xf32> to vector<28x60xf32>
    %cst_8 = arith.constant dense<0.000000e+00> : vector<192x60xf32>
    %8 = tpu.matmul %2, %7, %cst_8 {dimension_numbers = #tpu.dot_dimension_numbers<[1], [0], [0], [1], [0, 0, 1, 1], [], []>} : vector<192x28xf32>, vector<28x60xf32>, vector<192x60xf32> -> vector<192x60xf32>
    %9 = vector.extract_strided_slice %0 {offsets = [1, 0, 0], sizes = [24, 8, 28], strides = [1, 1, 1]} : vector<28x8x28xf32> to vector<24x8x28xf32>
    %10 = vector.shape_cast %9 : vector<24x8x28xf32> to vector<192x28xf32>
    %c1 = arith.constant 1 : index
    %c0_9 = arith.constant 0 : index
    %c0_10 = arith.constant 0 : index
    %11 = vector.load %arg2[%c1, %c0_9, %c0_10] : memref<5x28x60xf32, #tpu.memory_space<vmem>>, vector<1x28x60xf32>
    %12 = vector.shape_cast %11 : vector<1x28x60xf32> to vector<28x60xf32>
    %cst_11 = arith.constant dense<0.000000e+00> : vector<192x60xf32>
    %13 = tpu.matmul %10, %12, %cst_11 {dimension_numbers = #tpu.dot_dimension_numbers<[1], [0], [0], [1], [0, 0, 1, 1], [], []>} : vector<192x28xf32>, vector<28x60xf32>, vector<192x60xf32> -> vector<192x60xf32>
    %c1_12 = arith.constant 1 : index
    %c0_13 = arith.constant 0 : index
    %c0_14 = arith.constant 0 : index
    %14 = vector.load %arg3[%c1_12, %c0_13, %c0_14] : memref<5x28x60xf32, #tpu.memory_space<vmem>>, vector<1x28x60xf32>
    %15 = vector.shape_cast %14 : vector<1x28x60xf32> to vector<28x60xf32>
    %cst_15 = arith.constant dense<0.000000e+00> : vector<192x60xf32>
    %16 = tpu.matmul %10, %15, %cst_15 {dimension_numbers = #tpu.dot_dimension_numbers<[1], [0], [0], [1], [0, 0, 1, 1], [], []>} : vector<192x28xf32>, vector<28x60xf32>, vector<192x60xf32> -> vector<192x60xf32>
    %17 = arith.addf %5, %13 : vector<192x60xf32>
    %18 = arith.addf %8, %16 : vector<192x60xf32>
    %19 = vector.extract_strided_slice %0 {offsets = [2, 0, 0], sizes = [24, 8, 28], strides = [1, 1, 1]} : vector<28x8x28xf32> to vector<24x8x28xf32>
    %20 = vector.shape_cast %19 : vector<24x8x28xf32> to vector<192x28xf32>
    %c2 = arith.constant 2 : index
    %c0_16 = arith.constant 0 : index
    %c0_17 = arith.constant 0 : index
    %21 = vector.load %arg2[%c2, %c0_16, %c0_17] : memref<5x28x60xf32, #tpu.memory_space<vmem>>, vector<1x28x60xf32>
    %22 = vector.shape_cast %21 : vector<1x28x60xf32> to vector<28x60xf32>
    %cst_18 = arith.constant dense<0.000000e+00> : vector<192x60xf32>
    %23 = tpu.matmul %20, %22, %cst_18 {dimension_numbers = #tpu.dot_dimension_numbers<[1], [0], [0], [1], [0, 0, 1, 1], [], []>} : vector<192x28xf32>, vector<28x60xf32>, vector<192x60xf32> -> vector<192x60xf32>
    %c2_19 = arith.constant 2 : index
    %c0_20 = arith.constant 0 : index
    %c0_21 = arith.constant 0 : index
    %24 = vector.load %arg3[%c2_19, %c0_20, %c0_21] : memref<5x28x60xf32, #tpu.memory_space<vmem>>, vector<1x28x60xf32>
    %25 = vector.shape_cast %24 : vector<1x28x60xf32> to vector<28x60xf32>
    %cst_22 = arith.constant dense<0.000000e+00> : vector<192x60xf32>
    %26 = tpu.matmul %20, %25, %cst_22 {dimension_numbers = #tpu.dot_dimension_numbers<[1], [0], [0], [1], [0, 0, 1, 1], [], []>} : vector<192x28xf32>, vector<28x60xf32>, vector<192x60xf32> -> vector<192x60xf32>
    %27 = arith.addf %17, %23 : vector<192x60xf32>
    %28 = arith.addf %18, %26 : vector<192x60xf32>
    %29 = vector.extract_strided_slice %0 {offsets = [3, 0, 0], sizes = [24, 8, 28], strides = [1, 1, 1]} : vector<28x8x28xf32> to vector<24x8x28xf32>
    %30 = vector.shape_cast %29 : vector<24x8x28xf32> to vector<192x28xf32>
    %c3 = arith.constant 3 : index
    %c0_23 = arith.constant 0 : index
    %c0_24 = arith.constant 0 : index
    %31 = vector.load %arg2[%c3, %c0_23, %c0_24] : memref<5x28x60xf32, #tpu.memory_space<vmem>>, vector<1x28x60xf32>
    %32 = vector.shape_cast %31 : vector<1x28x60xf32> to vector<28x60xf32>
    %cst_25 = arith.constant dense<0.000000e+00> : vector<192x60xf32>
    %33 = tpu.matmul %30, %32, %cst_25 {dimension_numbers = #tpu.dot_dimension_numbers<[1], [0], [0], [1], [0, 0, 1, 1], [], []>} : vector<192x28xf32>, vector<28x60xf32>, vector<192x60xf32> -> vector<192x60xf32>
    %c3_26 = arith.constant 3 : index
    %c0_27 = arith.constant 0 : index
    %c0_28 = arith.constant 0 : index
    %34 = vector.load %arg3[%c3_26, %c0_27, %c0_28] : memref<5x28x60xf32, #tpu.memory_space<vmem>>, vector<1x28x60xf32>
    %35 = vector.shape_cast %34 : vector<1x28x60xf32> to vector<28x60xf32>
    %cst_29 = arith.constant dense<0.000000e+00> : vector<192x60xf32>
    %36 = tpu.matmul %30, %35, %cst_29 {dimension_numbers = #tpu.dot_dimension_numbers<[1], [0], [0], [1], [0, 0, 1, 1], [], []>} : vector<192x28xf32>, vector<28x60xf32>, vector<192x60xf32> -> vector<192x60xf32>
    %37 = arith.addf %27, %33 : vector<192x60xf32>
    %38 = arith.addf %28, %36 : vector<192x60xf32>
    %39 = vector.extract_strided_slice %0 {offsets = [4, 0, 0], sizes = [24, 8, 28], strides = [1, 1, 1]} : vector<28x8x28xf32> to vector<24x8x28xf32>
    %40 = vector.shape_cast %39 : vector<24x8x28xf32> to vector<192x28xf32>
    %c4 = arith.constant 4 : index
    %c0_30 = arith.constant 0 : index
    %c0_31 = arith.constant 0 : index
    %41 = vector.load %arg2[%c4, %c0_30, %c0_31] : memref<5x28x60xf32, #tpu.memory_space<vmem>>, vector<1x28x60xf32>
    %42 = vector.shape_cast %41 : vector<1x28x60xf32> to vector<28x60xf32>
    %cst_32 = arith.constant dense<0.000000e+00> : vector<192x60xf32>
    %43 = tpu.matmul %40, %42, %cst_32 {dimension_numbers = #tpu.dot_dimension_numbers<[1], [0], [0], [1], [0, 0, 1, 1], [], []>} : vector<192x28xf32>, vector<28x60xf32>, vector<192x60xf32> -> vector<192x60xf32>
    %c4_33 = arith.constant 4 : index
    %c0_34 = arith.constant 0 : index
    %c0_35 = arith.constant 0 : index
    %44 = vector.load %arg3[%c4_33, %c0_34, %c0_35] : memref<5x28x60xf32, #tpu.memory_space<vmem>>, vector<1x28x60xf32>
    %45 = vector.shape_cast %44 : vector<1x28x60xf32> to vector<28x60xf32>
    %cst_36 = arith.constant dense<0.000000e+00> : vector<192x60xf32>
    %46 = tpu.matmul %40, %45, %cst_36 {dimension_numbers = #tpu.dot_dimension_numbers<[1], [0], [0], [1], [0, 0, 1, 1], [], []>} : vector<192x28xf32>, vector<28x60xf32>, vector<192x60xf32> -> vector<192x60xf32>
    %47 = arith.addf %37, %43 : vector<192x60xf32>
    %48 = arith.addf %38, %46 : vector<192x60xf32>
    %49 = arith.maximumf %47, %48 : vector<192x60xf32>
    %c0_37 = arith.constant 0 : index
    %c0_38 = arith.constant 0 : index
    %50 = vector.load %arg4[%c0_37, %c0_38] : memref<1x60xf32, #tpu.memory_space<vmem>>, vector<1x60xf32>
    %51 = vector.broadcast %50 : vector<1x60xf32> to vector<192x60xf32>
    %52 = arith.addf %49, %51 : vector<192x60xf32>
    %cst_39 = arith.constant 0.000000e+00 : f32
    %53 = vector.broadcast %cst_39 : f32 to vector<192x60xf32>
    %54 = arith.maximumf %52, %53 : vector<192x60xf32>
    %55 = vector.shape_cast %54 : vector<192x60xf32> to vector<12x2x8x60xf32>
    %56 = vector.extract_strided_slice %55 {offsets = [0, 0, 0, 0], sizes = [12, 1, 8, 60], strides = [1, 1, 1, 1]} : vector<12x2x8x60xf32> to vector<12x1x8x60xf32>
    %57 = vector.shape_cast %56 : vector<12x1x8x60xf32> to vector<12x8x60xf32>
    %58 = vector.extract_strided_slice %55 {offsets = [0, 1, 0, 0], sizes = [12, 1, 8, 60], strides = [1, 1, 1, 1]} : vector<12x2x8x60xf32> to vector<12x1x8x60xf32>
    %59 = vector.shape_cast %58 : vector<12x1x8x60xf32> to vector<12x8x60xf32>
    %60 = arith.maximumf %57, %59 : vector<12x8x60xf32>
    %61 = vector.extract_strided_slice %60 {offsets = [0, 0, 0], sizes = [8, 8, 60], strides = [1, 1, 1]} : vector<12x8x60xf32> to vector<8x8x60xf32>
    %62 = vector.shape_cast %61 : vector<8x8x60xf32> to vector<64x60xf32>
    %c0_40 = arith.constant 0 : index
    %c0_41 = arith.constant 0 : index
    %c0_42 = arith.constant 0 : index
    %63 = vector.load %arg5[%c0_40, %c0_41, %c0_42] : memref<5x60x40xf32, #tpu.memory_space<vmem>>, vector<1x60x40xf32>
    %64 = vector.shape_cast %63 : vector<1x60x40xf32> to vector<60x40xf32>
    %cst_43 = arith.constant dense<0.000000e+00> : vector<64x40xf32>
    %65 = tpu.matmul %62, %64, %cst_43 {dimension_numbers = #tpu.dot_dimension_numbers<[1], [0], [0], [1], [0, 0, 1, 1], [], []>} : vector<64x60xf32>, vector<60x40xf32>, vector<64x40xf32> -> vector<64x40xf32>
    %c0_44 = arith.constant 0 : index
    %c0_45 = arith.constant 0 : index
    %c0_46 = arith.constant 0 : index
    %66 = vector.load %arg6[%c0_44, %c0_45, %c0_46] : memref<5x60x40xf32, #tpu.memory_space<vmem>>, vector<1x60x40xf32>
    %67 = vector.shape_cast %66 : vector<1x60x40xf32> to vector<60x40xf32>
    %cst_47 = arith.constant dense<0.000000e+00> : vector<64x40xf32>
    %68 = tpu.matmul %62, %67, %cst_47 {dimension_numbers = #tpu.dot_dimension_numbers<[1], [0], [0], [1], [0, 0, 1, 1], [], []>} : vector<64x60xf32>, vector<60x40xf32>, vector<64x40xf32> -> vector<64x40xf32>
    %69 = vector.extract_strided_slice %60 {offsets = [1, 0, 0], sizes = [8, 8, 60], strides = [1, 1, 1]} : vector<12x8x60xf32> to vector<8x8x60xf32>
    %70 = vector.shape_cast %69 : vector<8x8x60xf32> to vector<64x60xf32>
    %c1_48 = arith.constant 1 : index
    %c0_49 = arith.constant 0 : index
    %c0_50 = arith.constant 0 : index
    %71 = vector.load %arg5[%c1_48, %c0_49, %c0_50] : memref<5x60x40xf32, #tpu.memory_space<vmem>>, vector<1x60x40xf32>
    %72 = vector.shape_cast %71 : vector<1x60x40xf32> to vector<60x40xf32>
    %cst_51 = arith.constant dense<0.000000e+00> : vector<64x40xf32>
    %73 = tpu.matmul %70, %72, %cst_51 {dimension_numbers = #tpu.dot_dimension_numbers<[1], [0], [0], [1], [0, 0, 1, 1], [], []>} : vector<64x60xf32>, vector<60x40xf32>, vector<64x40xf32> -> vector<64x40xf32>
    %c1_52 = arith.constant 1 : index
    %c0_53 = arith.constant 0 : index
    %c0_54 = arith.constant 0 : index
    %74 = vector.load %arg6[%c1_52, %c0_53, %c0_54] : memref<5x60x40xf32, #tpu.memory_space<vmem>>, vector<1x60x40xf32>
    %75 = vector.shape_cast %74 : vector<1x60x40xf32> to vector<60x40xf32>
    %cst_55 = arith.constant dense<0.000000e+00> : vector<64x40xf32>
    %76 = tpu.matmul %70, %75, %cst_55 {dimension_numbers = #tpu.dot_dimension_numbers<[1], [0], [0], [1], [0, 0, 1, 1], [], []>} : vector<64x60xf32>, vector<60x40xf32>, vector<64x40xf32> -> vector<64x40xf32>
    %77 = arith.addf %65, %73 : vector<64x40xf32>
    %78 = arith.addf %68, %76 : vector<64x40xf32>
    %79 = vector.extract_strided_slice %60 {offsets = [2, 0, 0], sizes = [8, 8, 60], strides = [1, 1, 1]} : vector<12x8x60xf32> to vector<8x8x60xf32>
    %80 = vector.shape_cast %79 : vector<8x8x60xf32> to vector<64x60xf32>
    %c2_56 = arith.constant 2 : index
    %c0_57 = arith.constant 0 : index
    %c0_58 = arith.constant 0 : index
    %81 = vector.load %arg5[%c2_56, %c0_57, %c0_58] : memref<5x60x40xf32, #tpu.memory_space<vmem>>, vector<1x60x40xf32>
    %82 = vector.shape_cast %81 : vector<1x60x40xf32> to vector<60x40xf32>
    %cst_59 = arith.constant dense<0.000000e+00> : vector<64x40xf32>
    %83 = tpu.matmul %80, %82, %cst_59 {dimension_numbers = #tpu.dot_dimension_numbers<[1], [0], [0], [1], [0, 0, 1, 1], [], []>} : vector<64x60xf32>, vector<60x40xf32>, vector<64x40xf32> -> vector<64x40xf32>
    %c2_60 = arith.constant 2 : index
    %c0_61 = arith.constant 0 : index
    %c0_62 = arith.constant 0 : index
    %84 = vector.load %arg6[%c2_60, %c0_61, %c0_62] : memref<5x60x40xf32, #tpu.memory_space<vmem>>, vector<1x60x40xf32>
    %85 = vector.shape_cast %84 : vector<1x60x40xf32> to vector<60x40xf32>
    %cst_63 = arith.constant dense<0.000000e+00> : vector<64x40xf32>
    %86 = tpu.matmul %80, %85, %cst_63 {dimension_numbers = #tpu.dot_dimension_numbers<[1], [0], [0], [1], [0, 0, 1, 1], [], []>} : vector<64x60xf32>, vector<60x40xf32>, vector<64x40xf32> -> vector<64x40xf32>
    %87 = arith.addf %77, %83 : vector<64x40xf32>
    %88 = arith.addf %78, %86 : vector<64x40xf32>
    %89 = vector.extract_strided_slice %60 {offsets = [3, 0, 0], sizes = [8, 8, 60], strides = [1, 1, 1]} : vector<12x8x60xf32> to vector<8x8x60xf32>
    %90 = vector.shape_cast %89 : vector<8x8x60xf32> to vector<64x60xf32>
    %c3_64 = arith.constant 3 : index
    %c0_65 = arith.constant 0 : index
    %c0_66 = arith.constant 0 : index
    %91 = vector.load %arg5[%c3_64, %c0_65, %c0_66] : memref<5x60x40xf32, #tpu.memory_space<vmem>>, vector<1x60x40xf32>
    %92 = vector.shape_cast %91 : vector<1x60x40xf32> to vector<60x40xf32>
    %cst_67 = arith.constant dense<0.000000e+00> : vector<64x40xf32>
    %93 = tpu.matmul %90, %92, %cst_67 {dimension_numbers = #tpu.dot_dimension_numbers<[1], [0], [0], [1], [0, 0, 1, 1], [], []>} : vector<64x60xf32>, vector<60x40xf32>, vector<64x40xf32> -> vector<64x40xf32>
    %c3_68 = arith.constant 3 : index
    %c0_69 = arith.constant 0 : index
    %c0_70 = arith.constant 0 : index
    %94 = vector.load %arg6[%c3_68, %c0_69, %c0_70] : memref<5x60x40xf32, #tpu.memory_space<vmem>>, vector<1x60x40xf32>
    %95 = vector.shape_cast %94 : vector<1x60x40xf32> to vector<60x40xf32>
    %cst_71 = arith.constant dense<0.000000e+00> : vector<64x40xf32>
    %96 = tpu.matmul %90, %95, %cst_71 {dimension_numbers = #tpu.dot_dimension_numbers<[1], [0], [0], [1], [0, 0, 1, 1], [], []>} : vector<64x60xf32>, vector<60x40xf32>, vector<64x40xf32> -> vector<64x40xf32>
    %97 = arith.addf %87, %93 : vector<64x40xf32>
    %98 = arith.addf %88, %96 : vector<64x40xf32>
    %99 = vector.extract_strided_slice %60 {offsets = [4, 0, 0], sizes = [8, 8, 60], strides = [1, 1, 1]} : vector<12x8x60xf32> to vector<8x8x60xf32>
    %100 = vector.shape_cast %99 : vector<8x8x60xf32> to vector<64x60xf32>
    %c4_72 = arith.constant 4 : index
    %c0_73 = arith.constant 0 : index
    %c0_74 = arith.constant 0 : index
    %101 = vector.load %arg5[%c4_72, %c0_73, %c0_74] : memref<5x60x40xf32, #tpu.memory_space<vmem>>, vector<1x60x40xf32>
    %102 = vector.shape_cast %101 : vector<1x60x40xf32> to vector<60x40xf32>
    %cst_75 = arith.constant dense<0.000000e+00> : vector<64x40xf32>
    %103 = tpu.matmul %100, %102, %cst_75 {dimension_numbers = #tpu.dot_dimension_numbers<[1], [0], [0], [1], [0, 0, 1, 1], [], []>} : vector<64x60xf32>, vector<60x40xf32>, vector<64x40xf32> -> vector<64x40xf32>
    %c4_76 = arith.constant 4 : index
    %c0_77 = arith.constant 0 : index
    %c0_78 = arith.constant 0 : index
    %104 = vector.load %arg6[%c4_76, %c0_77, %c0_78] : memref<5x60x40xf32, #tpu.memory_space<vmem>>, vector<1x60x40xf32>
    %105 = vector.shape_cast %104 : vector<1x60x40xf32> to vector<60x40xf32>
    %cst_79 = arith.constant dense<0.000000e+00> : vector<64x40xf32>
    %106 = tpu.matmul %100, %105, %cst_79 {dimension_numbers = #tpu.dot_dimension_numbers<[1], [0], [0], [1], [0, 0, 1, 1], [], []>} : vector<64x60xf32>, vector<60x40xf32>, vector<64x40xf32> -> vector<64x40xf32>
    %107 = arith.addf %97, %103 : vector<64x40xf32>
    %108 = arith.addf %98, %106 : vector<64x40xf32>
    %109 = arith.maximumf %107, %108 : vector<64x40xf32>
    %c0_80 = arith.constant 0 : index
    %c0_81 = arith.constant 0 : index
    %110 = vector.load %arg7[%c0_80, %c0_81] : memref<1x40xf32, #tpu.memory_space<vmem>>, vector<1x40xf32>
    %111 = vector.broadcast %110 : vector<1x40xf32> to vector<64x40xf32>
    %112 = arith.addf %109, %111 : vector<64x40xf32>
    %cst_82 = arith.constant 0.000000e+00 : f32
    %113 = vector.broadcast %cst_82 : f32 to vector<64x40xf32>
    %114 = arith.maximumf %112, %113 : vector<64x40xf32>
    %115 = vector.shape_cast %114 : vector<64x40xf32> to vector<4x2x8x40xf32>
    %116 = vector.extract_strided_slice %115 {offsets = [0, 0, 0, 0], sizes = [4, 1, 8, 40], strides = [1, 1, 1, 1]} : vector<4x2x8x40xf32> to vector<4x1x8x40xf32>
    %117 = vector.shape_cast %116 : vector<4x1x8x40xf32> to vector<4x8x40xf32>
    %118 = vector.extract_strided_slice %115 {offsets = [0, 1, 0, 0], sizes = [4, 1, 8, 40], strides = [1, 1, 1, 1]} : vector<4x2x8x40xf32> to vector<4x1x8x40xf32>
    %119 = vector.shape_cast %118 : vector<4x1x8x40xf32> to vector<4x8x40xf32>
    %120 = arith.maximumf %117, %119 : vector<4x8x40xf32>
    %121 = vector.extract_strided_slice %120 {offsets = [0, 0, 0], sizes = [1, 8, 40], strides = [1, 1, 1]} : vector<4x8x40xf32> to vector<1x8x40xf32>
    %122 = vector.shape_cast %121 : vector<1x8x40xf32> to vector<8x40xf32>
    %c0_83 = arith.constant 0 : index
    %c0_84 = arith.constant 0 : index
    %c0_85 = arith.constant 0 : index
    %123 = vector.load %arg8[%c0_83, %c0_84, %c0_85] : memref<4x40x128xf32, #tpu.memory_space<vmem>>, vector<1x40x128xf32>
    %124 = vector.shape_cast %123 : vector<1x40x128xf32> to vector<40x128xf32>
    %cst_86 = arith.constant dense<0.000000e+00> : vector<8x128xf32>
    %125 = tpu.matmul %122, %124, %cst_86 {dimension_numbers = #tpu.dot_dimension_numbers<[1], [0], [0], [1], [0, 0, 1, 1], [], []>} : vector<8x40xf32>, vector<40x128xf32>, vector<8x128xf32> -> vector<8x128xf32>
    %126 = vector.extract_strided_slice %120 {offsets = [1, 0, 0], sizes = [1, 8, 40], strides = [1, 1, 1]} : vector<4x8x40xf32> to vector<1x8x40xf32>
    %127 = vector.shape_cast %126 : vector<1x8x40xf32> to vector<8x40xf32>
    %c1_87 = arith.constant 1 : index
    %c0_88 = arith.constant 0 : index
    %c0_89 = arith.constant 0 : index
    %128 = vector.load %arg8[%c1_87, %c0_88, %c0_89] : memref<4x40x128xf32, #tpu.memory_space<vmem>>, vector<1x40x128xf32>
    %129 = vector.shape_cast %128 : vector<1x40x128xf32> to vector<40x128xf32>
    %cst_90 = arith.constant dense<0.000000e+00> : vector<8x128xf32>
    %130 = tpu.matmul %127, %129, %cst_90 {dimension_numbers = #tpu.dot_dimension_numbers<[1], [0], [0], [1], [0, 0, 1, 1], [], []>} : vector<8x40xf32>, vector<40x128xf32>, vector<8x128xf32> -> vector<8x128xf32>
    %131 = arith.addf %125, %130 : vector<8x128xf32>
    %132 = vector.extract_strided_slice %120 {offsets = [2, 0, 0], sizes = [1, 8, 40], strides = [1, 1, 1]} : vector<4x8x40xf32> to vector<1x8x40xf32>
    %133 = vector.shape_cast %132 : vector<1x8x40xf32> to vector<8x40xf32>
    %c2_91 = arith.constant 2 : index
    %c0_92 = arith.constant 0 : index
    %c0_93 = arith.constant 0 : index
    %134 = vector.load %arg8[%c2_91, %c0_92, %c0_93] : memref<4x40x128xf32, #tpu.memory_space<vmem>>, vector<1x40x128xf32>
    %135 = vector.shape_cast %134 : vector<1x40x128xf32> to vector<40x128xf32>
    %cst_94 = arith.constant dense<0.000000e+00> : vector<8x128xf32>
    %136 = tpu.matmul %133, %135, %cst_94 {dimension_numbers = #tpu.dot_dimension_numbers<[1], [0], [0], [1], [0, 0, 1, 1], [], []>} : vector<8x40xf32>, vector<40x128xf32>, vector<8x128xf32> -> vector<8x128xf32>
    %137 = arith.addf %131, %136 : vector<8x128xf32>
    %138 = vector.extract_strided_slice %120 {offsets = [3, 0, 0], sizes = [1, 8, 40], strides = [1, 1, 1]} : vector<4x8x40xf32> to vector<1x8x40xf32>
    %139 = vector.shape_cast %138 : vector<1x8x40xf32> to vector<8x40xf32>
    %c3_95 = arith.constant 3 : index
    %c0_96 = arith.constant 0 : index
    %c0_97 = arith.constant 0 : index
    %140 = vector.load %arg8[%c3_95, %c0_96, %c0_97] : memref<4x40x128xf32, #tpu.memory_space<vmem>>, vector<1x40x128xf32>
    %141 = vector.shape_cast %140 : vector<1x40x128xf32> to vector<40x128xf32>
    %cst_98 = arith.constant dense<0.000000e+00> : vector<8x128xf32>
    %142 = tpu.matmul %139, %141, %cst_98 {dimension_numbers = #tpu.dot_dimension_numbers<[1], [0], [0], [1], [0, 0, 1, 1], [], []>} : vector<8x40xf32>, vector<40x128xf32>, vector<8x128xf32> -> vector<8x128xf32>
    %143 = arith.addf %137, %142 : vector<8x128xf32>
    %c0_99 = arith.constant 0 : index
    %c0_100 = arith.constant 0 : index
    %144 = vector.load %arg9[%c0_99, %c0_100] : memref<1x128xf32, #tpu.memory_space<vmem>>, vector<1x128xf32>
    %145 = vector.broadcast %144 : vector<1x128xf32> to vector<8x128xf32>
    %146 = arith.addf %143, %145 : vector<8x128xf32>
    %cst_101 = arith.constant 0.000000e+00 : f32
    %147 = vector.broadcast %cst_101 : f32 to vector<8x128xf32>
    %148 = arith.maximumf %146, %147 : vector<8x128xf32>
    %c0_102 = arith.constant 0 : index
    %c0_103 = arith.constant 0 : index
    %149 = vector.load %arg10[%c0_102, %c0_103] : memref<128x10xf32, #tpu.memory_space<vmem>>, vector<128x10xf32>
    %cst_104 = arith.constant dense<0.000000e+00> : vector<8x10xf32>
    %150 = tpu.matmul %148, %149, %cst_104 {dimension_numbers = #tpu.dot_dimension_numbers<[1], [0], [0], [1], [0, 0, 1, 1], [], []>} : vector<8x128xf32>, vector<128x10xf32>, vector<8x10xf32> -> vector<8x10xf32>
    %c0_105 = arith.constant 0 : index
    %c0_106 = arith.constant 0 : index
    %151 = vector.load %arg11[%c0_105, %c0_106] : memref<1x10xf32, #tpu.memory_space<vmem>>, vector<1x10xf32>
    %152 = vector.broadcast %151 : vector<1x10xf32> to vector<8x10xf32>
    %153 = arith.addf %150, %152 : vector<8x10xf32>
    %cst_107 = arith.constant dense<0xFF800000> : vector<8xf32>
    %154 = vector.multi_reduction <maximumf>, %153, %cst_107 [1] : vector<8x10xf32> to vector<8xf32>
    %155 = vector.shape_cast %154 : vector<8xf32> to vector<8x1xf32>
    %156 = vector.broadcast %155 : vector<8x1xf32> to vector<8x10xf32>
    %157 = arith.subf %153, %156 : vector<8x10xf32>
    %158 = math.exp %157 : vector<8x10xf32>
    %cst_108 = arith.constant dense<0.000000e+00> : vector<8xf32>
    %159 = vector.multi_reduction <add>, %158, %cst_108 [1] : vector<8x10xf32> to vector<8xf32>
    %160 = vector.shape_cast %159 : vector<8xf32> to vector<8x1xf32>
    %161 = math.log %160 : vector<8x1xf32>
    %162 = arith.addf %155, %161 : vector<8x1xf32>
    %163 = vector.broadcast %162 : vector<8x1xf32> to vector<8x10xf32>
    %164 = arith.subf %153, %163 : vector<8x10xf32>
    %c0_109 = arith.constant 0 : index
    %c0_110 = arith.constant 0 : index
    %165 = vector.load %arg12[%c0_109, %c0_110] : memref<8x10xf32, #tpu.memory_space<vmem>>, vector<8x10xf32>
    tpu.vector_store %arg12[%c0_109, %c0_110], %164 {strides = array<i32>} : memref<8x10xf32, #tpu.memory_space<vmem>>, vector<8x10xf32>,
    return
  }
  func.func @transform_0(%arg0: i32) -> (i32, i32, i32) {
    %c0_i32 = arith.constant 0 : i32
    %c0_i32_0 = arith.constant 0 : i32
    %c0_i32_1 = arith.constant 0 : i32
    return %c0_i32, %arg0, %c0_i32_0 : i32, i32, i32
  }
  func.func @transform_1(%arg0: i32) -> (i32, i32, i32) {
    %c0_i32 = arith.constant 0 : i32
    %c0_i32_0 = arith.constant 0 : i32
    %c0_i32_1 = arith.constant 0 : i32
    %c0_i32_2 = arith.constant 0 : i32
    return %c0_i32, %c0_i32_0, %c0_i32_1 : i32, i32, i32
  }
  func.func @transform_2(%arg0: i32) -> (i32, i32, i32) {
    %c0_i32 = arith.constant 0 : i32
    %c0_i32_0 = arith.constant 0 : i32
    %c0_i32_1 = arith.constant 0 : i32
    %c0_i32_2 = arith.constant 0 : i32
    return %c0_i32, %c0_i32_0, %c0_i32_1 : i32, i32, i32
  }
  func.func @transform_3(%arg0: i32) -> (i32, i32) {
    %c0_i32 = arith.constant 0 : i32
    %c0_i32_0 = arith.constant 0 : i32
    %c0_i32_1 = arith.constant 0 : i32
    return %c0_i32, %c0_i32_0 : i32, i32
  }
  func.func @transform_4(%arg0: i32) -> (i32, i32, i32) {
    %c0_i32 = arith.constant 0 : i32
    %c0_i32_0 = arith.constant 0 : i32
    %c0_i32_1 = arith.constant 0 : i32
    %c0_i32_2 = arith.constant 0 : i32
    return %c0_i32, %c0_i32_0, %c0_i32_1 : i32, i32, i32
  }
  func.func @transform_5(%arg0: i32) -> (i32, i32, i32) {
    %c0_i32 = arith.constant 0 : i32
    %c0_i32_0 = arith.constant 0 : i32
    %c0_i32_1 = arith.constant 0 : i32
    %c0_i32_2 = arith.constant 0 : i32
    return %c0_i32, %c0_i32_0, %c0_i32_1 : i32, i32, i32
  }
  func.func @transform_6(%arg0: i32) -> (i32, i32) {
    %c0_i32 = arith.constant 0 : i32
    %c0_i32_0 = arith.constant 0 : i32
    %c0_i32_1 = arith.constant 0 : i32
    return %c0_i32, %c0_i32_0 : i32, i32
  }
  func.func @transform_7(%arg0: i32) -> (i32, i32, i32) {
    %c0_i32 = arith.constant 0 : i32
    %c0_i32_0 = arith.constant 0 : i32
    %c0_i32_1 = arith.constant 0 : i32
    %c0_i32_2 = arith.constant 0 : i32
    return %c0_i32, %c0_i32_0, %c0_i32_1 : i32, i32, i32
  }
  func.func @transform_8(%arg0: i32) -> (i32, i32) {
    %c0_i32 = arith.constant 0 : i32
    %c0_i32_0 = arith.constant 0 : i32
    %c0_i32_1 = arith.constant 0 : i32
    return %c0_i32, %c0_i32_0 : i32, i32
  }
  func.func @transform_9(%arg0: i32) -> (i32, i32) {
    %c0_i32 = arith.constant 0 : i32
    %c0_i32_0 = arith.constant 0 : i32
    %c0_i32_1 = arith.constant 0 : i32
    return %c0_i32, %c0_i32_0 : i32, i32
  }
  func.func @transform_10(%arg0: i32) -> (i32, i32) {
    %c0_i32 = arith.constant 0 : i32
    %c0_i32_0 = arith.constant 0 : i32
    %c0_i32_1 = arith.constant 0 : i32
    return %c0_i32, %c0_i32_0 : i32, i32
  }
  func.func @transform_11(%arg0: i32) -> (i32, i32) {
    %c0_i32 = arith.constant 0 : i32
    %c0_i32_0 = arith.constant 0 : i32
    return %arg0, %c0_i32 : i32, i32
  }
}

</mosaic_0001>

<bundles_post_ra>
// kernel: tile.13
= control target key start
LH: loop header
LB: loop body
LE: loop exit
PB: predicated region body
PF: predicated region fallthrough
CT: control target
= control target key end

     0   :  { %s28_s0 = inlined_call_operand.vmem [shape: f32[5], index: 0, kind: input, shape index: {}]   ;;  %s29_s1 = inlined_call_operand.vmem [shape: f32[12,5], index: 1, kind: output, shape index: {}]  }
   0x1   :  { %v4_v0 = vld [vmem:[%s28_s0] ss:$0 sm:$0xff] }
   0x2   :  { %5 = vst [vmem:[%s29_s1] sm:$0xff] %v4_v0  ;;  %8 = vst [vmem:[%s29_s1 + $0x8] sm:$0xff] %v4_v0 }

// kernel: tile.14
= control target key start
LH: loop header
LB: loop body
LE: loop exit
PB: predicated region body
PF: predicated region fallthrough
CT: control target
= control target key end

     0   :  { %s101_s10 = smov 55   ;;  %s102_s11 = smov 45   ;;  %vm3_vm0 = vcmask 39936   ;;  %vm9_vm1 = vcmask 490936   ;;  %vm15_vm2 = vcmask 449936   ;;  %vm21_vm3 = vcmask 408936   ;;  %s161_s0 = inlined_call_operand.vmem [shape: f32[12,5], index: 0, kind: input, shape index: {}]   ;;  %s162_s1 = inlined_call_operand.vmem [shape: f32[1,60], index: 1, kind: output, shape index: {}]  }
   0x1   :  { %v79_v0 = vld [vmem:[%s161_s0 + $0xb] sm:$0x1]   ;;  %v81_v1 = vld [vmem:[%s161_s0 + $0x9] sm:$0x1]   ;;  %v80_v2 = vld [vmem:[%s161_s0 + $0xa] sm:$0x1]  }
   0x2   :  { %7 = vrot.lane.b32.xlu0 %v79_v0, %s101_s10  ;;  %19 = vrot.lane.b32.xlu1 %v81_v1, %s102_s11  ;;  %v82_v3 = vld [vmem:[%s161_s0 + $0x8] sm:$0x1]   ;;  %s103_s16 = smov 50   ;;  %s104_s17 = smov 40   ;;  %v83_v4 = vld [vmem:[%s161_s0 + $0x7] sm:$0x1]  }
   0x3   :  { %v2_v5 = vld [vmem:[%s161_s0] sm:$0x1]   ;;  %v84_v6 = vld [vmem:[%s161_s0 + $0x6] sm:$0x1]   ;;  %s105_s24 = smov 35   ;;  %s106_s25 = smov 30  }
   0x4   :  { %4 = vst.msk [vmem:[#allocation0] sm:$0x1] %vm3_vm0, %v2_v5   ;;  %v85_v7 = vld [vmem:[%s161_s0 + $0x5] sm:$0x1]   ;;  %v86_v8 = vld [vmem:[%s161_s0 + $0x4] sm:$0x1]  }
   0x5   :  { %s107_s30 = smov 25   ;;  %s108_s2 = smov 20   ;;  %v87_v9 = vld [vmem:[%s161_s0 + $0x3] sm:$0x1]   ;;  %v88_v10 = vld [vmem:[%s161_s0 + $0x2] sm:$0x1]  }
   0x6   :  { %13 = vrot.lane.b32.xlu0 %v80_v2, %s103_s16  ;;  %25 = vrot.lane.b32.xlu1 %v82_v3, %s104_s17  ;;  %s109_s7 = smov 15   ;;  %s110_s8 = smov 10   ;;  %v89_v11 = vld [vmem:[%s161_s0 + $0x1] sm:$0x1]   ;;  %vm27_vm4 = vcmask 367936   ;;  %vm33_vm5 = vcmask 326936  }
   0x7   :  { %s111_s0 = smov 5   ;;  %vm39_vm6 = vcmask 285936   ;;  %vm45_vm7 = vcmask 244936   ;;  %vm51_vm8 = vcmask 203936   ;;  %vm57_vm9 = vcmask 162936  }
   0x8   :  { %vm63_vm10 = vcmask 121936   ;;  %vm69_vm11 = vcmask 80936  }
   0xa   :  { %31 = vrot.lane.b32.xlu0 %v83_v4, %s105_s24  ;;  %37 = vrot.lane.b32.xlu1 %v84_v6, %s106_s25 }
   0xe   :  { %43 = vrot.lane.b32.xlu0 %v85_v7, %s107_s30  ;;  %49 = vrot.lane.b32.xlu1 %v86_v8, %s108_s2 }
  0x12   :  { %55 = vrot.lane.b32.xlu0 %v87_v9, %s109_s7  ;;  %61 = vrot.lane.b32.xlu1 %v88_v10, %s110_s8 }
  0x16   :  { %67 = vrot.lane.b32.xlu0 %v89_v11, %s111_s0 }
  0x74   :  { %v8_v12 = vpop.permute.xlu0 %7   ;;  %v20_v13 = vpop.permute.xlu1 %19  }
  0x75   :  { %10 = vst.msk [vmem:[#allocation0] sm:$0x1] %vm9_vm1, %v8_v12  }
  0x78   :  { %v14_v14 = vpop.permute.xlu0 %13   ;;  %v26_v15 = vpop.permute.xlu1 %25  }
  0x79   :  { %16 = vst.msk [vmem:[#allocation0] sm:$0x1] %vm15_vm2, %v14_v14  }
  0x7a   :  { %22 = vst.msk [vmem:[#allocation0] sm:$0x1] %vm21_vm3, %v20_v13  }
  0x7b   :  { %28 = vst.msk [vmem:[#allocation0] sm:$0x1] %vm27_vm4, %v26_v15  }
  0x7c   :  { %v32_v16 = vpop.permute.xlu0 %31   ;;  %v38_v17 = vpop.permute.xlu1 %37  }
  0x7d   :  { %34 = vst.msk [vmem:[#allocation0] sm:$0x1] %vm33_vm5, %v32_v16  }
  0x7e   :  { %40 = vst.msk [vmem:[#allocation0] sm:$0x1] %vm39_vm6, %v38_v17  }
  0x80   :  { %v44_v18 = vpop.permute.xlu0 %43   ;;  %v50_v19 = vpop.permute.xlu1 %49  }
  0x81   :  { %46 = vst.msk [vmem:[#allocation0] sm:$0x1] %vm45_vm7, %v44_v18  }
  0x82   :  { %52 = vst.msk [vmem:[#allocation0] sm:$0x1] %vm51_vm8, %v50_v19  }
  0x84   :  { %v56_v20 = vpop.permute.xlu0 %55   ;;  %v62_v21 = vpop.permute.xlu1 %61  }
  0x85   :  { %58 = vst.msk [vmem:[#allocation0] sm:$0x1] %vm57_vm9, %v56_v20  }
  0x86   :  { %64 = vst.msk [vmem:[#allocation0] sm:$0x1] %vm63_vm10, %v62_v21  }
  0x88   :  { %v68_v22 = vpop.permute.xlu0 %67  }
  0x89   :  { %70 = vst.msk [vmem:[#allocation0] sm:$0x1] %vm69_vm11, %v68_v22  }
  0x90   :  { %v75_v23 = vld [vmem:[#allocation0] sm:$0x1] }
  0x91   :  { %78 = vst [vmem:[%s162_s1] sm:$0x1] %v75_v23 }

// kernel: tile.18
= control target key start
LH: loop header
LB: loop body
LE: loop exit
PB: predicated region body
PF: predicated region fallthrough
CT: control target
= control target key end

     0   :  { %s22_s0 = inlined_call_operand.vmem [shape: f32[10], index: 0, kind: input, shape index: {}]   ;;  %s23_s1 = inlined_call_operand.vmem [shape: f32[4,10], index: 1, kind: output, shape index: {}]  }
   0x1   :  { %v4_v0 = vld [vmem:[%s22_s0] ss:$0 sm:$0xff] }
   0x2   :  { %5 = vst [vmem:[%s23_s1] sm:$0xf] %v4_v0 }

// kernel: tile.19
= control target key start
LH: loop header
LB: loop body
LE: loop exit
PB: predicated region body
PF: predicated region fallthrough
CT: control target
= control target key end

     0   :  { %vm8_vm0 = vcmask 80896   ;;  %s40_s8 = smov 10   ;;  %s41_s9 = smov 20   ;;  %vm14_vm1 = vcmask 326896   ;;  %vm20_vm2 = vcmask 244896   ;;  %vm26_vm3 = vcmask 162896   ;;  %s58_s0 = inlined_call_operand.vmem [shape: f32[4,10], index: 0, kind: input, shape index: {}]   ;;  %s59_s1 = inlined_call_operand.vmem [shape: f32[1,40], index: 1, kind: output, shape index: {}]  }
   0x1   :  { %v5_v0 = vld [vmem:[%s58_s0] sm:$0xf]  ;;  %s39_s0 = smov 30  }
   0x2   :  { %6 = vst [vmem:[#allocation1] sm:$0xf] %v5_v0 }
   0x9   :  { %v11_v1 = vld [vmem:[#allocation1 + $0x3] sm:$0x1]   ;;  %v23_v2 = vld [vmem:[#allocation1 + $0x1] sm:$0x1]   ;;  %v7_v3 = vld [vmem:[#allocation1] sm:$0x1]  }
   0xa   :  { %12 = vrot.lane.b32.xlu0 %v11_v1, %s39_s0  ;;  %24 = vrot.lane.b32.xlu1 %v23_v2, %s40_s8  ;;  %v17_v4 = vld [vmem:[#allocation1 + $0x2] sm:$0x1]   ;;  %9 = vst.msk [vmem:[#allocation0] sm:$0x1] %vm8_vm0, %v7_v3  }
   0xe   :  { %18 = vrot.lane.b32.xlu0 %v17_v4, %s41_s9 }
  0x7c   :  { %v13_v5 = vpop.permute.xlu0 %12   ;;  %v25_v6 = vpop.permute.xlu1 %24  }
  0x7d   :  { %15 = vst.msk [vmem:[#allocation0] sm:$0x1] %vm14_vm1, %v13_v5  }
  0x80   :  { %v19_v7 = vpop.permute.xlu0 %18  }
  0x81   :  { %21 = vst.msk [vmem:[#allocation0] sm:$0x1] %vm20_vm2, %v19_v7  }
  0x82   :  { %27 = vst.msk [vmem:[#allocation0] sm:$0x1] %vm26_vm3, %v25_v6  }
  0x89   :  { %v32_v8 = vld [vmem:[#allocation0] sm:$0x1] }
  0x8a   :  { %35 = vst [vmem:[%s59_s1] sm:$0x1] %v32_v8 }

// kernel: torch_model_forward.1
= control target key start
LH: loop header
LB: loop body
LE: loop exit
PB: predicated region body
PF: predicated region fallthrough
CT: control target
= control target key end

     0   :  { %vm152_vm0 = vcmask 1043456   ;;  %vm79_vm1 = vcmask 228352   ;;  %vm2340_vm2 = vcmask 490496   ;;  %vm5804_vm3 = vmmov 0   ;;  %s8006_s1 = inlined_call_operand.vmem [shape: f32[5,28,60], index: 1, kind: input, shape index: {}]   ;;  %s8007_s0 = inlined_call_operand.vmem [shape: f32[28,8,28], index: 0, kind: input, shape index: {}]   ;;  %s8008_s2 = inlined_call_operand.vmem [shape: f32[5,28,60], index: 2, kind: input, shape index: {}]   ;;  %s8009_s4 = inlined_call_operand.vmem [shape: f32[5,60,40], index: 4, kind: input, shape index: {}]   ;;  %s8010_s5 = inlined_call_operand.vmem [shape: f32[5,60,40], index: 5, kind: input, shape index: {}]   ;;  %s8011_s3 = inlined_call_operand.vmem [shape: f32[1,60], index: 3, kind: input, shape index: {}]   ;;  %s8012_s7 = inlined_call_operand.vmem [shape: f32[4,40,128], index: 7, kind: input, shape index: {}]   ;;  %s8013_s6 = inlined_call_operand.vmem [shape: f32[1,40], index: 6, kind: input, shape index: {}]   ;;  %s8014_s9 = inlined_call_operand.vmem [shape: f32[128,10], index: 9, kind: input, shape index: {}]   ;;  %s8015_s8 = inlined_call_operand.vmem [shape: f32[1,128], index: 8, kind: input, shape index: {}]   ;;  %s8016_s10 = inlined_call_operand.vmem [shape: f32[1,10], index: 10, kind: input, shape index: {}]   ;;  %s8017_s11 = inlined_call_operand.vmem [shape: f32[8,10], index: 11, kind: output, shape index: {}]  }
   0x1   :  { %v4045_v0 = vld [vmem:[%s8006_s1 + $0x38] sm:$0xf]  ;;  %v4044_v1 = vld [vmem:[%s8006_s1 + $0x30] sm:$0xff]  ;;  %v4043_v2 = vld [vmem:[%s8006_s1 + $0x28] sm:$0xff]  ;;  %vm3614_vm4 = vcmask 326656   ;;  %vm4023_vm5 = vcmask 80896  }
   0x2   :  { %4982 = vmatprep.subr.msk.mxu0 %vm152_vm0, %v4045_v0  ;;  %5789 = vmatprep.subr.msk.mxu1 %vm152_vm0, %v4045_v0  ;;  %v4042_v3 = vld [vmem:[%s8006_s1 + $0x20] sm:$0xff]  ;;  %v5884_v4 = vld [vmem:[%s8007_s0 + $0x8] sm:$0xff]  ;;  %v5894_v6 = vld [vmem:[%s8007_s0 + $0x10] sm:$0xff] }
   0x3   :  { %4983 = vmatpush3.msk.msra.mxu0 %vm152_vm0, %v4045_v0  ;;  %5793 = vmatpush3.msk.msra.mxu1 %vm152_vm0, %v4045_v0  ;;  %v5889_v5 = vld [vmem:[%s8007_s0 + $0x88] sm:$0xff]  ;;  %v5899_v7 = vld [vmem:[%s8007_s0 + $0x90] sm:$0xff]  ;;  %v4074_v8 = vld [vmem:[%s8008_s2 + $0x38] sm:$0xf] }
   0x4   :  { %4984 = vmatprep.subr.mxu0 %v4044_v1  ;;  %5790 = vmatprep.subr.mxu1 %v4044_v1  ;;  %v5907_v9 = vld [vmem:[%s8007_s0 + $0x18] sm:$0xff]  ;;  %v4073_v11 = vld [vmem:[%s8008_s2 + $0x30] sm:$0xff]  ;;  %v5934_v13 = vld [vmem:[%s8007_s0 + $0x20] sm:$0xff] }
   0x5   :  { %4985 = vmatpush3.msra.mxu0 %v4044_v1  ;;  %5794 = vmatpush3.msra.mxu1 %v4044_v1  ;;  %v5916_v10 = vld [vmem:[%s8007_s0 + $0x98] sm:$0xff]  ;;  %v5939_v14 = vld [vmem:[%s8007_s0 + $0xa0] sm:$0xff]  ;;  %v5947_v15 = vld [vmem:[%s8007_s0 + $0x28] sm:$0xff] }
   0x6   :  { %4986 = vmatprep.subr.mxu0 %v4043_v2  ;;  %5791 = vmatprep.subr.mxu1 %v4043_v2  ;;  %v69_v12 = vld [vmem:[%s8006_s1 + $0x18] sm:$0xf]  ;;  %v5952_v16 = vld [vmem:[%s8007_s0 + $0xa8] sm:$0xff]  ;;  %v5967_v18 = vld [vmem:[%s8007_s0 + $0x30] sm:$0xff] }
   0x7   :  { %4987 = vmatpush3.msra.mxu0 %v4043_v2  ;;  %5795 = vmatpush3.msra.mxu1 %v4043_v2  ;;  %v4072_v17 = vld [vmem:[%s8008_s2 + $0x28] sm:$0xff]  ;;  %v5972_v19 = vld [vmem:[%s8007_s0 + $0xb0] sm:$0xff]  ;;  %v5979_v20 = vld [vmem:[%s8007_s0 + $0x38] sm:$0xff] }
   0x8   :  { %4988 = vmatprep.subr.mxu0 %v4042_v3  ;;  %5792 = vmatprep.subr.mxu1 %v4042_v3  ;;  %v5984_v21 = vld [vmem:[%s8007_s0 + $0xb8] sm:$0xff]  ;;  %v4071_v22 = vld [vmem:[%s8008_s2 + $0x20] sm:$0xff]  ;;  %v68_v23 = vld [vmem:[%s8006_s1 + $0x10] sm:$0xff] }
   0x9   :  { %4989 = vmatpush3.msra.mxu0 %v4042_v3  ;;  %5796 = vmatpush3.msra.mxu1 %v4042_v3  ;;  %v6004_v24 = vld [vmem:[%s8007_s0 + $0x40] sm:$0xff]  ;;  %v6014_v26 = vld [vmem:[%s8007_s0 + $0x48] sm:$0xff]  ;;  %v73_v27 = vld [vmem:[%s8008_s2 + $0x18] sm:$0xf] }
   0xa   :  { %4990 = vmatprep.mubr.msk.f32.mxu0 %vm79_vm1, %v5884_v4  ;;  %5014 = vmatprep.mubr.msk.f32.mxu1 %vm79_vm1, %v5889_v5  ;;  %v6009_v25 = vld [vmem:[%s8007_s0 + $0xc0] sm:$0xff]  ;;  %v67_v28 = vld [vmem:[%s8006_s1 + $0x8] sm:$0xff]  ;;  %v6033_v29 = vld [vmem:[%s8007_s0 + $0x50] sm:$0xff] }
   0xb   :  { %4991 = vmatmul.mubr.msk.f32.vlgmr.msra.gmra.mxu0 %vm79_vm1, %v5894_v6  ;;  %5015 = vmatmul.mubr.msk.f32.vlgmr.msra.gmra.mxu1 %vm79_vm1, %v5899_v7  ;;  %v6039_v30 = vld [vmem:[%s8007_s0 + $0x58] sm:$0xff]  ;;  %v72_v31 = vld [vmem:[%s8008_s2 + $0x10] sm:$0xff]  ;;  %v66_v32 = vld [vmem:[%s8006_s1] sm:$0xff] }
   0xc   :  { %5026 = vmatprep.subr.msk.mxu1 %vm152_vm0, %v4074_v8  ;;  %4993 = vmatprep.mubr.msk.f32.mxu0 %vm79_vm1, %v5907_v9  ;;  %v6057_v33 = vld [vmem:[%s8007_s0 + $0x60] sm:$0xff]  ;;  %v6064_v34 = vld [vmem:[%s8007_s0 + $0x68] sm:$0xff]  ;;  %v4153_v36 = vld [vmem:[%s8006_s1 + $0x58] sm:$0xf] }
   0xd   :  { %5027 = vmatpush3.msk.msra.mxu1 %vm152_vm0, %v4074_v8  ;;  %5017 = vmatprep.mubr.msk.f32.mxu1 %vm79_vm1, %v5916_v10  ;;  %v71_v35 = vld [vmem:[%s8008_s2 + $0x8] sm:$0xff]  ;;  %v6083_v37 = vld [vmem:[%s8007_s0 + $0x70] sm:$0xff]  ;;  %v6088_v38 = vld [vmem:[%s8007_s0 + $0x78] sm:$0xff] }
   0xe   :  { %5028 = vmatprep.subr.mxu1 %v4073_v11  ;;  %5070 = vmatprep.subr.msk.mxu0 %vm152_vm0, %v69_v12  ;;  %v70_v39 = vld [vmem:[%s8008_s2] sm:$0xff]  ;;  %v4182_v42 = vld [vmem:[%s8008_s2 + $0x58] sm:$0xf]  ;;  %v4152_v43 = vld [vmem:[%s8006_s1 + $0x50] sm:$0xff] }
   0xf   :  { %4994 = vmatmul.mubr.msk.f32.gmra.mxu0 %vm79_vm1, %v5934_v13  ;;  %5018 = vmatmul.mubr.msk.f32.gmra.mxu1 %vm79_vm1, %v5939_v14  ;;  %v6105_v40 = vld [vmem:[%s8007_s0 + $0x80] sm:$0xff]  ;;  %v4151_v44 = vld [vmem:[%s8006_s1 + $0x48] sm:$0xff]  ;;  %v4211_v46 = vld [vmem:[%s8006_s1 + $0x78] sm:$0xf] }
  0x10   :  { %5029 = vmatpush3.msra.mxu1 %v4073_v11  ;;  %4996 = vmatprep.mubr.msk.f32.mxu0 %vm79_vm1, %v5947_v15  ;;  %v38_v41 = vld [vmem:[%s8007_s0] sm:$0xff]  ;;  %v4181_v47 = vld [vmem:[%s8008_s2 + $0x50] sm:$0xff]  ;;  %v4180_v48 = vld [vmem:[%s8008_s2 + $0x48] sm:$0xff] }
  0x11   :  { %5020 = vmatprep.mubr.msk.f32.mxu1 %vm79_vm1, %v5952_v16  ;;  %5030 = vmatprep.subr.mxu1 %v4072_v17  ;;  %v4150_v45 = vld [vmem:[%s8006_s1 + $0x40] sm:$0xff]  ;;  %v4240_v50 = vld [vmem:[%s8008_s2 + $0x78] sm:$0xf]  ;;  %v4210_v51 = vld [vmem:[%s8006_s1 + $0x70] sm:$0xff] }
  0x12   :  { %5031 = vmatpush3.msra.mxu1 %v4072_v17  ;;  %5071 = vmatpush3.msk.msra.mxu0 %vm152_vm0, %v69_v12  ;;  %v4179_v49 = vld [vmem:[%s8008_s2 + $0x40] sm:$0xff]  ;;  %v4209_v52 = vld [vmem:[%s8006_s1 + $0x68] sm:$0xff]  ;;  %v4269_v54 = vld [vmem:[%s8006_s1 + $0x98] sm:$0xf] }
  0x13   :  { %4997 = vmatmul.mubr.msk.f32.gmra.mxu0 %vm79_vm1, %v5967_v18  ;;  %5021 = vmatmul.mubr.msk.f32.gmra.mxu1 %vm79_vm1, %v5972_v19  ;;  %v4208_v53 = vld [vmem:[%s8006_s1 + $0x60] sm:$0xff]  ;;  %v4239_v55 = vld [vmem:[%s8008_s2 + $0x70] sm:$0xff]  ;;  %v4238_v56 = vld [vmem:[%s8008_s2 + $0x68] sm:$0xff] }
  0x14   :  { %4999 = vmatprep.mubr.msk.f32.mxu0 %vm79_vm1, %v5979_v20  ;;  %5023 = vmatprep.mubr.msk.f32.mxu1 %vm79_vm1, %v5984_v21  ;;  %v4237_v57 = vld [vmem:[%s8008_s2 + $0x60] sm:$0xff]  ;;  %v6359_v58 = vld [vmem:[%s8007_s0 + $0xc8] sm:$0xff]  ;;  %v4298_v59 = vld [vmem:[%s8008_s2 + $0x98] sm:$0xf] }
  0x15   :  { %5032 = vmatprep.subr.mxu1 %v4071_v22  ;;  %5072 = vmatprep.subr.mxu0 %v68_v23  ;;  %v4268_v60 = vld [vmem:[%s8006_s1 + $0x90] sm:$0xff]  ;;  %v4267_v61 = vld [vmem:[%s8006_s1 + $0x88] sm:$0xff]  ;;  %v4266_v62 = vld [vmem:[%s8006_s1 + $0x80] sm:$0xff] }
  0x16   :  { %5033 = vmatpush3.msra.mxu1 %v4071_v22  ;;  %5073 = vmatpush3.msra.mxu0 %v68_v23  ;;  %v4297_v63 = vld [vmem:[%s8008_s2 + $0x90] sm:$0xff]  ;;  %v4296_v0 = vld [vmem:[%s8008_s2 + $0x88] sm:$0xff]  ;;  %v4295_v1 = vld [vmem:[%s8008_s2 + $0x80] sm:$0xff] }
  0x17   :  { %5000 = vmatmul.mubr.msk.f32.gmra.mxu0 %vm79_vm1, %v6004_v24  ;;  %5024 = vmatmul.mubr.msk.f32.gmra.mxu1 %vm79_vm1, %v6009_v25  ;;  %v6484_v2 = vld [vmem:[%s8007_s0 + $0xd0] sm:$0xff] }
  0x18   :  { %5002 = vmatprep.mubr.msk.f32.mxu0 %vm79_vm1, %v6014_v26  ;;  %5034 = vmatprep.mubr.msk.f32.mxu1 %vm79_vm1, %v5884_v4 }
  0x19   :  { %5114 = vmatprep.subr.msk.mxu1 %vm152_vm0, %v73_v27  ;;  %5074 = vmatprep.subr.mxu0 %v67_v28 }
  0x1a   :  { %5075 = vmatpush3.msra.mxu0 %v67_v28 }
  0x1b   :  { %5003 = vmatmul.mubr.msk.f32.gmra.mxu0 %vm79_vm1, %v6033_v29  ;;  %5035 = vmatmul.mubr.msk.f32.vlgmr.msra.gmra.mxu1 %vm79_vm1, %v5894_v6 }
  0x1c   :  { %5115 = vmatpush3.msk.msra.mxu1 %vm152_vm0, %v73_v27  ;;  %5005 = vmatprep.mubr.msk.f32.mxu0 %vm79_vm1, %v6039_v30 }
  0x1d   :  { %5037 = vmatprep.mubr.msk.f32.mxu1 %vm79_vm1, %v5907_v9  ;;  %5116 = vmatprep.subr.mxu1 %v72_v31 }
  0x1e   :  { %5117 = vmatpush3.msra.mxu1 %v72_v31  ;;  %5076 = vmatprep.subr.mxu0 %v66_v32 }
  0x1f   :  { %5006 = vmatmul.mubr.msk.f32.gmra.mxu0 %vm79_vm1, %v6057_v33  ;;  %5038 = vmatmul.mubr.msk.f32.gmra.mxu1 %vm79_vm1, %v5934_v13 }
  0x20   :  { %5008 = vmatprep.mubr.msk.f32.mxu0 %vm79_vm1, %v6064_v34  ;;  %5040 = vmatprep.mubr.msk.f32.mxu1 %vm79_vm1, %v5947_v15 }
  0x21   :  { %5077 = vmatpush3.msra.mxu0 %v66_v32  ;;  %5118 = vmatprep.subr.mxu1 %v71_v35 }
  0x22   :  { %5119 = vmatpush3.msra.mxu1 %v71_v35  ;;  %5158 = vmatprep.subr.msk.mxu0 %vm152_vm0, %v4153_v36 }
  0x23   :  { %5009 = vmatmul.mubr.msk.f32.gmra.mxu0 %vm79_vm1, %v6083_v37  ;;  %5041 = vmatmul.mubr.msk.f32.gmra.mxu1 %vm79_vm1, %v5967_v18 }
  0x24   :  { %5011 = vmatprep.mubr.msk.f32.mxu0 %vm79_vm1, %v6088_v38  ;;  %5043 = vmatprep.mubr.msk.f32.mxu1 %vm79_vm1, %v5979_v20 }
  0x25   :  { %5120 = vmatprep.subr.mxu1 %v70_v39 }
  0x26   :  { %5121 = vmatpush3.msra.mxu1 %v70_v39 }
  0x27   :  { %5012 = vmatmul.mubr.msk.f32.gmra.mxu0 %vm79_vm1, %v6105_v40  ;;  %5044 = vmatmul.mubr.msk.f32.gmra.mxu1 %vm79_vm1, %v6004_v24 }
  0x28   :  { %5046 = vmatprep.mubr.msk.f32.mxu1 %vm79_vm1, %v6014_v26  ;;  %5078 = vmatprep.mubr.msk.f32.mxu0 %vm79_vm1, %v38_v41 }
  0x29   :  { %5202 = vmatprep.subr.msk.mxu1 %vm152_vm0, %v4182_v42 }
  0x2b   :  { %5047 = vmatmul.mubr.msk.f32.gmra.mxu1 %vm79_vm1, %v6033_v29  ;;  %5079 = vmatmul.mubr.msk.f32.vlgmr.msra.gmra.mxu0 %vm79_vm1, %v5884_v4 }
  0x2c   :  { %5049 = vmatprep.mubr.msk.f32.mxu1 %vm79_vm1, %v6039_v30  ;;  %5081 = vmatprep.mubr.msk.f32.mxu0 %vm79_vm1, %v5894_v6 }
  0x2d   :  { %5159 = vmatpush3.msk.msra.mxu0 %vm152_vm0, %v4153_v36 }
  0x2e   :  { %5160 = vmatprep.subr.mxu0 %v4152_v43 }
  0x2f   :  { %5050 = vmatmul.mubr.msk.f32.gmra.mxu1 %vm79_vm1, %v6057_v33  ;;  %5082 = vmatmul.mubr.msk.f32.gmra.mxu0 %vm79_vm1, %v5907_v9 }
  0x30   :  { %5052 = vmatprep.mubr.msk.f32.mxu1 %vm79_vm1, %v6064_v34  ;;  %5084 = vmatprep.mubr.msk.f32.mxu0 %vm79_vm1, %v5934_v13 }
  0x31   :  { %5161 = vmatpush3.msra.mxu0 %v4152_v43 }
  0x32   :  { %5162 = vmatprep.subr.mxu0 %v4151_v44 }
  0x33   :  { %5053 = vmatmul.mubr.msk.f32.gmra.mxu1 %vm79_vm1, %v6083_v37  ;;  %5085 = vmatmul.mubr.msk.f32.gmra.mxu0 %vm79_vm1, %v5947_v15 }
  0x34   :  { %5055 = vmatprep.mubr.msk.f32.mxu1 %vm79_vm1, %v6088_v38  ;;  %5087 = vmatprep.mubr.msk.f32.mxu0 %vm79_vm1, %v5967_v18 }
  0x35   :  { %5163 = vmatpush3.msra.mxu0 %v4151_v44 }
  0x36   :  { %5164 = vmatprep.subr.mxu0 %v4150_v45 }
  0x37   :  { %5056 = vmatmul.mubr.msk.f32.gmra.mxu1 %vm79_vm1, %v6105_v40  ;;  %5088 = vmatmul.mubr.msk.f32.gmra.mxu0 %vm79_vm1, %v5979_v20 }
  0x38   :  { %5058 = vmatprep.mubr.msk.f32.mxu1 %vm79_vm1, %v5889_v5  ;;  %5090 = vmatprep.mubr.msk.f32.mxu0 %vm79_vm1, %v6004_v24 }
  0x39   :  { %5165 = vmatpush3.msra.mxu0 %v4150_v45 }
  0x3a   :  { %5246 = vmatprep.subr.msk.mxu0 %vm152_vm0, %v4211_v46 }
  0x3b   :  { %5059 = vmatmul.mubr.msk.f32.gmra.mxu1 %vm79_vm1, %v5899_v7  ;;  %5091 = vmatmul.mubr.msk.f32.gmra.mxu0 %vm79_vm1, %v6014_v26 }
  0x3c   :  { %5061 = vmatprep.mubr.msk.f32.mxu1 %vm79_vm1, %v5916_v10  ;;  %5093 = vmatprep.mubr.msk.f32.mxu0 %vm79_vm1, %v6033_v29 }
  0x3f   :  { %5062 = vmatmul.mubr.msk.f32.gmra.mxu1 %vm79_vm1, %v5939_v14  ;;  %5094 = vmatmul.mubr.msk.f32.gmra.mxu0 %vm79_vm1, %v6039_v30 }
  0x40   :  { %5064 = vmatprep.mubr.msk.f32.mxu1 %vm79_vm1, %v5952_v16  ;;  %5096 = vmatprep.mubr.msk.f32.mxu0 %vm79_vm1, %v6057_v33 }
  0x43   :  { %5065 = vmatmul.mubr.msk.f32.gmra.mxu1 %vm79_vm1, %v5972_v19  ;;  %5097 = vmatmul.mubr.msk.f32.gmra.mxu0 %vm79_vm1, %v6064_v34 }
  0x44   :  { %5067 = vmatprep.mubr.msk.f32.mxu1 %vm79_vm1, %v5984_v21  ;;  %5099 = vmatprep.mubr.msk.f32.mxu0 %vm79_vm1, %v6083_v37 }
  0x47   :  { %5068 = vmatmul.mubr.msk.f32.gmra.mxu1 %vm79_vm1, %v6009_v25  ;;  %5100 = vmatmul.mubr.msk.f32.gmra.mxu0 %vm79_vm1, %v6088_v38 }
  0x48   :  { %5102 = vmatprep.mubr.msk.f32.mxu0 %vm79_vm1, %v6105_v40  ;;  %5122 = vmatprep.mubr.msk.f32.mxu1 %vm79_vm1, %v38_v41 }
  0x4b   :  { %5103 = vmatmul.mubr.msk.f32.gmra.mxu0 %vm79_vm1, %v5889_v5  ;;  %5123 = vmatmul.mubr.msk.f32.vlgmr.msra.gmra.mxu1 %vm79_vm1, %v5884_v4 }
  0x4c   :  { %5203 = vmatpush3.msk.msra.mxu1 %vm152_vm0, %v4182_v42  ;;  %5105 = vmatprep.mubr.msk.f32.mxu0 %vm79_vm1, %v5899_v7 }
  0x4d   :  { %5125 = vmatprep.mubr.msk.f32.mxu1 %vm79_vm1, %v5894_v6  ;;  %5204 = vmatprep.subr.mxu1 %v4181_v47 }
  0x4e   :  { %5205 = vmatpush3.msra.mxu1 %v4181_v47 }
  0x4f   :  { %5106 = vmatmul.mubr.msk.f32.gmra.mxu0 %vm79_vm1, %v5916_v10  ;;  %5126 = vmatmul.mubr.msk.f32.gmra.mxu1 %vm79_vm1, %v5907_v9 }
  0x50   :  { %5108 = vmatprep.mubr.msk.f32.mxu0 %vm79_vm1, %v5939_v14  ;;  %5128 = vmatprep.mubr.msk.f32.mxu1 %vm79_vm1, %v5934_v13 }
  0x51   :  { %5206 = vmatprep.subr.mxu1 %v4180_v48 }
  0x52   :  { %5207 = vmatpush3.msra.mxu1 %v4180_v48 }
  0x53   :  { %5109 = vmatmul.mubr.msk.f32.gmra.mxu0 %vm79_vm1, %v5952_v16  ;;  %5129 = vmatmul.mubr.msk.f32.gmra.mxu1 %vm79_vm1, %v5947_v15 }
  0x54   :  { %5111 = vmatprep.mubr.msk.f32.mxu0 %vm79_vm1, %v5972_v19  ;;  %5131 = vmatprep.mubr.msk.f32.mxu1 %vm79_vm1, %v5967_v18 }
  0x55   :  { %5208 = vmatprep.subr.mxu1 %v4179_v49 }
  0x56   :  { %5209 = vmatpush3.msra.mxu1 %v4179_v49 }
  0x57   :  { %5112 = vmatmul.mubr.msk.f32.gmra.mxu0 %vm79_vm1, %v5984_v21  ;;  %5132 = vmatmul.mubr.msk.f32.gmra.mxu1 %vm79_vm1, %v5979_v20 }
  0x58   :  { %5134 = vmatprep.mubr.msk.f32.mxu1 %vm79_vm1, %v6004_v24  ;;  %5166 = vmatprep.mubr.msk.f32.mxu0 %vm79_vm1, %v5894_v6 }
  0x59   :  { %5290 = vmatprep.subr.msk.mxu1 %vm152_vm0, %v4240_v50 }
  0x5b   :  { %5135 = vmatmul.mubr.msk.f32.gmra.mxu1 %vm79_vm1, %v6014_v26  ;;  %5167 = vmatmul.mubr.msk.f32.vlgmr.msra.gmra.mxu0 %vm79_vm1, %v5907_v9 }
  0x5c   :  { %5137 = vmatprep.mubr.msk.f32.mxu1 %vm79_vm1, %v6033_v29  ;;  %5169 = vmatprep.mubr.msk.f32.mxu0 %vm79_vm1, %v5934_v13 }
  0x5d   :  { %5247 = vmatpush3.msk.msra.mxu0 %vm152_vm0, %v4211_v46 }
  0x5e   :  { %5248 = vmatprep.subr.mxu0 %v4210_v51 }
  0x5f   :  { %5138 = vmatmul.mubr.msk.f32.gmra.mxu1 %vm79_vm1, %v6039_v30  ;;  %5170 = vmatmul.mubr.msk.f32.gmra.mxu0 %vm79_vm1, %v5947_v15 }
  0x60   :  { %5140 = vmatprep.mubr.msk.f32.mxu1 %vm79_vm1, %v6057_v33  ;;  %5172 = vmatprep.mubr.msk.f32.mxu0 %vm79_vm1, %v5967_v18 }
  0x61   :  { %5249 = vmatpush3.msra.mxu0 %v4210_v51 }
  0x62   :  { %5250 = vmatprep.subr.mxu0 %v4209_v52 }
  0x63   :  { %5141 = vmatmul.mubr.msk.f32.gmra.mxu1 %vm79_vm1, %v6064_v34  ;;  %5173 = vmatmul.mubr.msk.f32.gmra.mxu0 %vm79_vm1, %v5979_v20 }
  0x64   :  { %5143 = vmatprep.mubr.msk.f32.mxu1 %vm79_vm1, %v6083_v37  ;;  %5175 = vmatprep.mubr.msk.f32.mxu0 %vm79_vm1, %v6004_v24 }
  0x65   :  { %5251 = vmatpush3.msra.mxu0 %v4209_v52 }
  0x66   :  { %5252 = vmatprep.subr.mxu0 %v4208_v53 }
  0x67   :  { %5144 = vmatmul.mubr.msk.f32.gmra.mxu1 %vm79_vm1, %v6088_v38  ;;  %5176 = vmatmul.mubr.msk.f32.gmra.mxu0 %vm79_vm1, %v6014_v26 }
  0x68   :  { %5146 = vmatprep.mubr.msk.f32.mxu1 %vm79_vm1, %v6105_v40  ;;  %5178 = vmatprep.mubr.msk.f32.mxu0 %vm79_vm1, %v6033_v29 }
  0x69   :  { %5253 = vmatpush3.msra.mxu0 %v4208_v53 }
  0x6a   :  { %5334 = vmatprep.subr.msk.mxu0 %vm152_vm0, %v4269_v54 }
  0x6b   :  { %5147 = vmatmul.mubr.msk.f32.gmra.mxu1 %vm79_vm1, %v5889_v5  ;;  %5179 = vmatmul.mubr.msk.f32.gmra.mxu0 %vm79_vm1, %v6039_v30 }
  0x6c   :  { %5149 = vmatprep.mubr.msk.f32.mxu1 %vm79_vm1, %v5899_v7  ;;  %5181 = vmatprep.mubr.msk.f32.mxu0 %vm79_vm1, %v6057_v33 }
  0x6f   :  { %5150 = vmatmul.mubr.msk.f32.gmra.mxu1 %vm79_vm1, %v5916_v10  ;;  %5182 = vmatmul.mubr.msk.f32.gmra.mxu0 %vm79_vm1, %v6064_v34 }
  0x70   :  { %5152 = vmatprep.mubr.msk.f32.mxu1 %vm79_vm1, %v5939_v14  ;;  %5184 = vmatprep.mubr.msk.f32.mxu0 %vm79_vm1, %v6083_v37 }
  0x73   :  { %5153 = vmatmul.mubr.msk.f32.gmra.mxu1 %vm79_vm1, %v5952_v16  ;;  %5185 = vmatmul.mubr.msk.f32.gmra.mxu0 %vm79_vm1, %v6088_v38 }
  0x74   :  { %5155 = vmatprep.mubr.msk.f32.mxu1 %vm79_vm1, %v5972_v19  ;;  %5187 = vmatprep.mubr.msk.f32.mxu0 %vm79_vm1, %v6105_v40 }
  0x77   :  { %5156 = vmatmul.mubr.msk.f32.gmra.mxu1 %vm79_vm1, %v5984_v21  ;;  %5188 = vmatmul.mubr.msk.f32.gmra.mxu0 %vm79_vm1, %v5889_v5 }
  0x78   :  { %5190 = vmatprep.mubr.msk.f32.mxu0 %vm79_vm1, %v5899_v7  ;;  %5210 = vmatprep.mubr.msk.f32.mxu1 %vm79_vm1, %v5894_v6 }
  0x7b   :  { %5191 = vmatmul.mubr.msk.f32.gmra.mxu0 %vm79_vm1, %v5916_v10  ;;  %5211 = vmatmul.mubr.msk.f32.vlgmr.msra.gmra.mxu1 %vm79_vm1, %v5907_v9 }
  0x7c   :  { %5291 = vmatpush3.msk.msra.mxu1 %vm152_vm0, %v4240_v50  ;;  %5193 = vmatprep.mubr.msk.f32.mxu0 %vm79_vm1, %v5939_v14 }
  0x7d   :  { %5213 = vmatprep.mubr.msk.f32.mxu1 %vm79_vm1, %v5934_v13  ;;  %5292 = vmatprep.subr.mxu1 %v4239_v55 }
  0x7e   :  { %5293 = vmatpush3.msra.mxu1 %v4239_v55 }
  0x7f   :  { %5194 = vmatmul.mubr.msk.f32.gmra.mxu0 %vm79_vm1, %v5952_v16  ;;  %5214 = vmatmul.mubr.msk.f32.gmra.mxu1 %vm79_vm1, %v5947_v15 }
  0x80   :  { %5196 = vmatprep.mubr.msk.f32.mxu0 %vm79_vm1, %v5972_v19  ;;  %5216 = vmatprep.mubr.msk.f32.mxu1 %vm79_vm1, %v5967_v18 }
  0x81   :  { %5294 = vmatprep.subr.mxu1 %v4238_v56 }
  0x82   :  { %5295 = vmatpush3.msra.mxu1 %v4238_v56 }
  0x83   :  { %5197 = vmatmul.mubr.msk.f32.gmra.mxu0 %vm79_vm1, %v5984_v21  ;;  %5217 = vmatmul.mubr.msk.f32.gmra.mxu1 %vm79_vm1, %v5979_v20 }
  0x84   :  { %5199 = vmatprep.mubr.msk.f32.mxu0 %vm79_vm1, %v6009_v25  ;;  %5219 = vmatprep.mubr.msk.f32.mxu1 %vm79_vm1, %v6004_v24 }
  0x85   :  { %5296 = vmatprep.subr.mxu1 %v4237_v57 }
  0x86   :  { %5297 = vmatpush3.msra.mxu1 %v4237_v57 }
  0x87   :  { %5200 = vmatmul.mubr.msk.f32.gmra.mxu0 %vm79_vm1, %v6359_v58  ;;  %5220 = vmatmul.mubr.msk.f32.gmra.mxu1 %vm79_vm1, %v6014_v26 }
  0x88   :  { %5222 = vmatprep.mubr.msk.f32.mxu1 %vm79_vm1, %v6033_v29  ;;  %5254 = vmatprep.mubr.msk.f32.mxu0 %vm79_vm1, %v5907_v9 }
  0x89   :  { %5378 = vmatprep.subr.msk.mxu1 %vm152_vm0, %v4298_v59 }
  0x8b   :  { %5223 = vmatmul.mubr.msk.f32.gmra.mxu1 %vm79_vm1, %v6039_v30  ;;  %5255 = vmatmul.mubr.msk.f32.vlgmr.msra.gmra.mxu0 %vm79_vm1, %v5934_v13 }
  0x8c   :  { %5225 = vmatprep.mubr.msk.f32.mxu1 %vm79_vm1, %v6057_v33  ;;  %5257 = vmatprep.mubr.msk.f32.mxu0 %vm79_vm1, %v5947_v15 }
  0x8d   :  { %5335 = vmatpush3.msk.msra.mxu0 %vm152_vm0, %v4269_v54 }
  0x8e   :  { %5336 = vmatprep.subr.mxu0 %v4268_v60 }
  0x8f   :  { %5226 = vmatmul.mubr.msk.f32.gmra.mxu1 %vm79_vm1, %v6064_v34  ;;  %5258 = vmatmul.mubr.msk.f32.gmra.mxu0 %vm79_vm1, %v5967_v18 }
  0x90   :  { %5228 = vmatprep.mubr.msk.f32.mxu1 %vm79_vm1, %v6083_v37  ;;  %5260 = vmatprep.mubr.msk.f32.mxu0 %vm79_vm1, %v5979_v20 }
  0x91   :  { %5337 = vmatpush3.msra.mxu0 %v4268_v60 }
  0x92   :  { %5338 = vmatprep.subr.mxu0 %v4267_v61 }
  0x93   :  { %5229 = vmatmul.mubr.msk.f32.gmra.mxu1 %vm79_vm1, %v6088_v38  ;;  %5261 = vmatmul.mubr.msk.f32.gmra.mxu0 %vm79_vm1, %v6004_v24 }
  0x94   :  { %5231 = vmatprep.mubr.msk.f32.mxu1 %vm79_vm1, %v6105_v40  ;;  %5263 = vmatprep.mubr.msk.f32.mxu0 %vm79_vm1, %v6014_v26 }
  0x95   :  { %5339 = vmatpush3.msra.mxu0 %v4267_v61 }
  0x96   :  { %5340 = vmatprep.subr.mxu0 %v4266_v62 }
  0x97   :  { %5232 = vmatmul.mubr.msk.f32.gmra.mxu1 %vm79_vm1, %v5889_v5  ;;  %5264 = vmatmul.mubr.msk.f32.gmra.mxu0 %vm79_vm1, %v6033_v29 }
  0x98   :  { %5234 = vmatprep.mubr.msk.f32.mxu1 %vm79_vm1, %v5899_v7  ;;  %5266 = vmatprep.mubr.msk.f32.mxu0 %vm79_vm1, %v6039_v30 }
  0x99   :  { %5341 = vmatpush3.msra.mxu0 %v4266_v62 }
  0x9b   :  { %5235 = vmatmul.mubr.msk.f32.gmra.mxu1 %vm79_vm1, %v5916_v10  ;;  %5267 = vmatmul.mubr.msk.f32.gmra.mxu0 %vm79_vm1, %v6057_v33 }
  0x9c   :  { %5237 = vmatprep.mubr.msk.f32.mxu1 %vm79_vm1, %v5939_v14  ;;  %5269 = vmatprep.mubr.msk.f32.mxu0 %vm79_vm1, %v6064_v34 }
  0x9f   :  { %5238 = vmatmul.mubr.msk.f32.gmra.mxu1 %vm79_vm1, %v5952_v16  ;;  %5270 = vmatmul.mubr.msk.f32.gmra.mxu0 %vm79_vm1, %v6083_v37 }
  0xa0   :  { %5240 = vmatprep.mubr.msk.f32.mxu1 %vm79_vm1, %v5972_v19  ;;  %5272 = vmatprep.mubr.msk.f32.mxu0 %vm79_vm1, %v6088_v38 }
  0xa3   :  { %5241 = vmatmul.mubr.msk.f32.gmra.mxu1 %vm79_vm1, %v5984_v21  ;;  %5273 = vmatmul.mubr.msk.f32.gmra.mxu0 %vm79_vm1, %v6105_v40 }
  0xa4   :  { %5243 = vmatprep.mubr.msk.f32.mxu1 %vm79_vm1, %v6009_v25  ;;  %5275 = vmatprep.mubr.msk.f32.mxu0 %vm79_vm1, %v5889_v5 }
  0xa7   :  { %5244 = vmatmul.mubr.msk.f32.gmra.mxu1 %vm79_vm1, %v6359_v58  ;;  %5276 = vmatmul.mubr.msk.f32.gmra.mxu0 %vm79_vm1, %v5899_v7 }
  0xa8   :  { %5278 = vmatprep.mubr.msk.f32.mxu0 %vm79_vm1, %v5916_v10  ;;  %5298 = vmatprep.mubr.msk.f32.mxu1 %vm79_vm1, %v5907_v9 }
  0xab   :  { %5279 = vmatmul.mubr.msk.f32.gmra.mxu0 %vm79_vm1, %v5939_v14  ;;  %5299 = vmatmul.mubr.msk.f32.vlgmr.msra.gmra.mxu1 %vm79_vm1, %v5934_v13 }
  0xac   :  { %5379 = vmatpush3.msk.msra.mxu1 %vm152_vm0, %v4298_v59  ;;  %5281 = vmatprep.mubr.msk.f32.mxu0 %vm79_vm1, %v5952_v16 }
  0xad   :  { %5301 = vmatprep.mubr.msk.f32.mxu1 %vm79_vm1, %v5947_v15  ;;  %5380 = vmatprep.subr.mxu1 %v4297_v63 }
  0xae   :  { %5381 = vmatpush3.msra.mxu1 %v4297_v63 }
  0xaf   :  { %5282 = vmatmul.mubr.msk.f32.gmra.mxu0 %vm79_vm1, %v5972_v19  ;;  %5302 = vmatmul.mubr.msk.f32.gmra.mxu1 %vm79_vm1, %v5967_v18 }
  0xb0   :  { %5284 = vmatprep.mubr.msk.f32.mxu0 %vm79_vm1, %v5984_v21  ;;  %5304 = vmatprep.mubr.msk.f32.mxu1 %vm79_vm1, %v5979_v20 }
  0xb1   :  { %5382 = vmatprep.subr.mxu1 %v4296_v0 }
  0xb2   :  { %5383 = vmatpush3.msra.mxu1 %v4296_v0 }
  0xb3   :  { %5285 = vmatmul.mubr.msk.f32.gmra.mxu0 %vm79_vm1, %v6009_v25  ;;  %5305 = vmatmul.mubr.msk.f32.gmra.mxu1 %vm79_vm1, %v6004_v24 }
  0xb4   :  { %5287 = vmatprep.mubr.msk.f32.mxu0 %vm79_vm1, %v6359_v58  ;;  %5307 = vmatprep.mubr.msk.f32.mxu1 %vm79_vm1, %v6014_v26 }
  0xb5   :  { %5384 = vmatprep.subr.mxu1 %v4295_v1 }
  0xb6   :  { %5385 = vmatpush3.msra.mxu1 %v4295_v1 }
  0xb7   :  { %5288 = vmatmul.mubr.msk.f32.gmra.mxu0 %vm79_vm1, %v6484_v2  ;;  %5308 = vmatmul.mubr.msk.f32.gmra.mxu1 %vm79_vm1, %v6033_v29 }
  0xb8   :  { %5310 = vmatprep.mubr.msk.f32.mxu1 %vm79_vm1, %v6039_v30  ;;  %5342 = vmatprep.mubr.msk.f32.mxu0 %vm79_vm1, %v5934_v13 }
  0xbb   :  { %5311 = vmatmul.mubr.msk.f32.gmra.mxu1 %vm79_vm1, %v6057_v33  ;;  %5343 = vmatmul.mubr.msk.f32.vlgmr.msra.gmra.mxu0 %vm79_vm1, %v5947_v15 }
  0xbc   :  { %5313 = vmatprep.mubr.msk.f32.mxu1 %vm79_vm1, %v6064_v34  ;;  %5345 = vmatprep.mubr.msk.f32.mxu0 %vm79_vm1, %v5967_v18 }
  0xbf   :  { %5314 = vmatmul.mubr.msk.f32.gmra.mxu1 %vm79_vm1, %v6083_v37  ;;  %5346 = vmatmul.mubr.msk.f32.gmra.mxu0 %vm79_vm1, %v5979_v20 }
  0xc0   :  { %5316 = vmatprep.mubr.msk.f32.mxu1 %vm79_vm1, %v6088_v38  ;;  %5348 = vmatprep.mubr.msk.f32.mxu0 %vm79_vm1, %v6004_v24 }
  0xc3   :  { %5317 = vmatmul.mubr.msk.f32.gmra.mxu1 %vm79_vm1, %v6105_v40  ;;  %5349 = vmatmul.mubr.msk.f32.gmra.mxu0 %vm79_vm1, %v6014_v26 }
  0xc4   :  { %5319 = vmatprep.mubr.msk.f32.mxu1 %vm79_vm1, %v5889_v5  ;;  %5351 = vmatprep.mubr.msk.f32.mxu0 %vm79_vm1, %v6033_v29 }
  0xc7   :  { %5320 = vmatmul.mubr.msk.f32.gmra.mxu1 %vm79_vm1, %v5899_v7  ;;  %5352 = vmatmul.mubr.msk.f32.gmra.mxu0 %vm79_vm1, %v6039_v30 }
  0xc8   :  { %5322 = vmatprep.mubr.msk.f32.mxu1 %vm79_vm1, %v5916_v10  ;;  %5354 = vmatprep.mubr.msk.f32.mxu0 %vm79_vm1, %v6057_v33 }
  0xcb   :  { %v6526_v3 = vpop.f32.mrf.mxu0  ;;  %v6528_v4 = vpop.f32.mrf.mxu1  ;;  %5323 = vmatmul.mubr.msk.f32.gmra.mxu1 %vm79_vm1, %v5939_v14  ;;  %5355 = vmatmul.mubr.msk.f32.gmra.mxu0 %vm79_vm1, %v6064_v34 }
  0xcc   :  { %5325 = vmatprep.mubr.msk.f32.mxu1 %vm79_vm1, %v5952_v16  ;;  %5357 = vmatprep.mubr.msk.f32.mxu0 %vm79_vm1, %v6083_v37 }
  0xcd   :  { %v6538_v6 = vpop.f32.mrf.mxu0  ;;  %v6540_v8 = vpop.f32.mrf.mxu1 }
  0xcf   :  { %v6542_v9 = vpop.f32.mrf.mxu0  ;;  %v6544_v11 = vpop.f32.mrf.mxu1  ;;  %5326 = vmatmul.mubr.msk.f32.gmra.mxu1 %vm79_vm1, %v5972_v19  ;;  %5358 = vmatmul.mubr.msk.f32.gmra.mxu0 %vm79_vm1, %v6088_v38 }
  0xd0   :  { %5328 = vmatprep.mubr.msk.f32.mxu1 %vm79_vm1, %v5984_v21  ;;  %5360 = vmatprep.mubr.msk.f32.mxu0 %vm79_vm1, %v6105_v40 }
  0xd1   :  { %v6554_v12 = vpop.f32.mrf.mxu0  ;;  %v6556_v17 = vpop.f32.mrf.mxu1 }
  0xd3   :  { %v6558_v22 = vpop.f32.mrf.mxu0  ;;  %v6560_v23 = vpop.f32.mrf.mxu1  ;;  %5329 = vmatmul.mubr.msk.f32.gmra.mxu1 %vm79_vm1, %v6009_v25  ;;  %5361 = vmatmul.mubr.msk.f32.gmra.mxu0 %vm79_vm1, %v5889_v5 }
  0xd4   :  { %5331 = vmatprep.mubr.msk.f32.mxu1 %vm79_vm1, %v6359_v58  ;;  %5363 = vmatprep.mubr.msk.f32.mxu0 %vm79_vm1, %v5899_v7 }
  0xd5   :  { %v6570_v27 = vpop.f32.mrf.mxu0  ;;  %v6572_v28 = vpop.f32.mrf.mxu1 }
  0xd7   :  { %v6574_v31 = vpop.f32.mrf.mxu0  ;;  %v6576_v32 = vpop.f32.mrf.mxu1  ;;  %5332 = vmatmul.mubr.msk.f32.gmra.mxu1 %vm79_vm1, %v6484_v2  ;;  %5364 = vmatmul.mubr.msk.f32.gmra.mxu0 %vm79_vm1, %v5916_v10 }
  0xd8   :  { %5366 = vmatprep.mubr.msk.f32.mxu0 %vm79_vm1, %v5939_v14  ;;  %5386 = vmatprep.mubr.msk.f32.mxu1 %vm79_vm1, %v5934_v13 }
  0xd9   :  { %v6586_v35 = vpop.f32.mrf.mxu0  ;;  %v6588_v36 = vpop.f32.mrf.mxu1 }
  0xdb   :  { %v6590_v39 = vpop.f32.mrf.mxu0  ;;  %v6592_v41 = vpop.f32.mrf.mxu1  ;;  %5367 = vmatmul.mubr.msk.f32.gmra.mxu0 %vm79_vm1, %v5952_v16  ;;  %5387 = vmatmul.mubr.msk.f32.vlgmr.msra.gmra.mxu1 %vm79_vm1, %v5947_v15 }
  0xdc   :  { %5369 = vmatprep.mubr.msk.f32.mxu0 %vm79_vm1, %v5972_v19  ;;  %5389 = vmatprep.mubr.msk.f32.mxu1 %vm79_vm1, %v5967_v18 }
  0xdd   :  { %v6602_v13 = vpop.f32.mrf.mxu0  ;;  %v6604_v42 = vpop.f32.mrf.mxu1 }
  0xdf   :  { %v5007_v43 = vpop.f32.mrf.mxu0  ;;  %v6606_v44 = vpop.f32.mrf.mxu1  ;;  %5370 = vmatmul.mubr.msk.f32.gmra.mxu0 %vm79_vm1, %v5984_v21  ;;  %5390 = vmatmul.mubr.msk.f32.gmra.mxu1 %vm79_vm1, %v5979_v20  ;;  %v65_v20 = vld [vmem:[%s8007_s0 + $0xd8] sm:$0xff] }
  0xe0   :  { %5372 = vmatprep.mubr.msk.f32.mxu0 %vm79_vm1, %v6009_v25  ;;  %5392 = vmatprep.mubr.msk.f32.mxu1 %vm79_vm1, %v6004_v24 }
  0xe1   :  { %v6616_v15 = vpop.f32.mrf.mxu0  ;;  %v6618_v18 = vpop.f32.mrf.mxu1 }
  0xe2   :  { %8022 = vst [vmem:[#allocation2_spill] sm:$0xff] %v6618_v18 }
  0xe3   :  { %v5010_v45 = vpop.f32.mrf.mxu0  ;;  %v6620_v46 = vpop.f32.mrf.mxu1  ;;  %5373 = vmatmul.mubr.msk.f32.gmra.mxu0 %vm79_vm1, %v6359_v58  ;;  %5393 = vmatmul.mubr.msk.f32.gmra.mxu1 %vm79_vm1, %v6014_v26 }
  0xe4   :  { %5375 = vmatprep.mubr.msk.f32.mxu0 %vm79_vm1, %v6484_v2  ;;  %5395 = vmatprep.mubr.msk.f32.mxu1 %vm79_vm1, %v6033_v29 }
  0xe5   :  { %v6633_v24 = vpop.f32.mrf.mxu0  ;;  %v6635_v47 = vpop.f32.mrf.mxu1 }
  0xe6   :  { %8023 = vst [vmem:[#allocation3_spill] sm:$0xff] %v6633_v24 }
  0xe7   :  { %v5013_v48 = vpop.f32.mrf.mxu0  ;;  %v6637_v49 = vpop.f32.mrf.mxu1  ;;  %5376 = vmatmul.mubr.msk.f32.gmra.mxu0 %vm79_vm1, %v65_v20  ;;  %5396 = vmatmul.mubr.msk.f32.gmra.mxu1 %vm79_vm1, %v6039_v30 }
  0xe8   :  { %5398 = vmatprep.mubr.msk.f32.mxu1 %vm79_vm1, %v6057_v33 }
  0xe9   :  { %v6644_v26 = vpop.f32.mrf.mxu0  ;;  %v6646_v29 = vpop.f32.mrf.mxu1 }
  0xea   :  { %8024 = vst [vmem:[#allocation4_spill] sm:$0xff] %v6644_v26 }
  0xeb   :  { %v6648_v50 = vpop.f32.mrf.mxu1  ;;  %v5080_v51 = vpop.f32.mrf.mxu0  ;;  %5399 = vmatmul.mubr.msk.f32.gmra.mxu1 %vm79_vm1, %v6064_v34 }
  0xec   :  { %v6653_v52 = vadd.f32 %v5080_v51, %v6526_v3  ;;  %5401 = vmatprep.mubr.msk.f32.mxu1 %vm79_vm1, %v6083_v37 }
  0xed   :  { %v6657_v30 = vpop.f32.mrf.mxu1  ;;  %v6659_v53 = vpop.f32.mrf.mxu0 }
  0xee   :  { %8025 = vst [vmem:[#allocation5_spill] sm:$0xff] %v6657_v30 }
  0xef   :  { %v6661_v33 = vpop.f32.mrf.mxu1  ;;  %v5083_v54 = vpop.f32.mrf.mxu0  ;;  %5402 = vmatmul.mubr.msk.f32.gmra.mxu1 %vm79_vm1, %v6088_v38 }
  0xf0   :  { %v6666_v55 = vadd.f32 %v5083_v54, %v6542_v9  ;;  %5404 = vmatprep.mubr.msk.f32.mxu1 %vm79_vm1, %v6105_v40 }
  0xf1   :  { %v6670_v34 = vpop.f32.mrf.mxu1  ;;  %v6672_v56 = vpop.f32.mrf.mxu0 }
  0xf2   :  { %8026 = vst [vmem:[#allocation6_spill] sm:$0xff] %v6670_v34 }
  0xf3   :  { %v6674_v37 = vpop.f32.mrf.mxu1  ;;  %v5086_v57 = vpop.f32.mrf.mxu0  ;;  %5405 = vmatmul.mubr.msk.f32.gmra.mxu1 %vm79_vm1, %v5889_v5 }
  0xf4   :  { %v6679_v59 = vadd.f32 %v5086_v57, %v6558_v22  ;;  %5407 = vmatprep.mubr.msk.f32.mxu1 %vm79_vm1, %v5899_v7 }
  0xf5   :  { %v6683_v38 = vpop.f32.mrf.mxu1  ;;  %v6685_v60 = vpop.f32.mrf.mxu0 }
  0xf6   :  { %8027 = vst [vmem:[#allocation7_spill] sm:$0xff] %v6683_v38  ;;  %v4331_v38 = vld [vmem:[%s8009_s4 + $0x70] sm:$0xff] }
  0xf7   :  { %v6687_v40 = vpop.f32.mrf.mxu1  ;;  %v5089_v61 = vpop.f32.mrf.mxu0  ;;  %5408 = vmatmul.mubr.msk.f32.gmra.mxu1 %vm79_vm1, %v5916_v10 }
  0xf8   :  { %v6692_v62 = vadd.f32 %v5089_v61, %v6574_v31  ;;  %5410 = vmatprep.mubr.msk.f32.mxu1 %vm79_vm1, %v5939_v14 }
  0xf9   :  { %v6696_v5 = vpop.f32.mrf.mxu1  ;;  %v6698_v63 = vpop.f32.mrf.mxu0 }
  0xfa   :  { %8028 = vst [vmem:[#allocation8_spill] sm:$0xff] %v6696_v5 }
  0xfb   :  { %v6700_v7 = vpop.f32.mrf.mxu1  ;;  %v5092_v0 = vpop.f32.mrf.mxu0  ;;  %5411 = vmatmul.mubr.msk.f32.gmra.mxu1 %vm79_vm1, %v5952_v16 }
  0xfc   :  { %v6705_v1 = vadd.f32 %v5092_v0, %v6590_v39  ;;  %5413 = vmatprep.mubr.msk.f32.mxu1 %vm79_vm1, %v5972_v19 }
  0xfd   :  { %v6709_v10 = vpop.f32.mrf.mxu1  ;;  %v6711_v3 = vpop.f32.mrf.mxu0 }
  0xfe   :  { %8029 = vst [vmem:[#allocation9_spill] sm:$0xff] %v6709_v10 }
  0xff   :  { %v6713_v14 = vpop.f32.mrf.mxu1  ;;  %v5095_v9 = vpop.f32.mrf.mxu0  ;;  %5414 = vmatmul.mubr.msk.f32.gmra.mxu1 %vm79_vm1, %v5984_v21 }
 0x100   :  { %v6717_v22 = vadd.f32 %v5095_v9, %v5007_v43  ;;  %5416 = vmatprep.mubr.msk.f32.mxu1 %vm79_vm1, %v6009_v25 }
 0x101   :  { %v6721_v16 = vpop.f32.mrf.mxu1  ;;  %v6723_v31 = vpop.f32.mrf.mxu0 }
 0x102   :  { %8030 = vst [vmem:[#allocation10_spill] sm:$0xff] %v6723_v31 }
 0x103   :  { %v6725_v19 = vpop.f32.mrf.mxu1  ;;  %v5098_v39 = vpop.f32.mrf.mxu0  ;;  %5417 = vmatmul.mubr.msk.f32.gmra.mxu1 %vm79_vm1, %v6359_v58 }
 0x104   :  { %v6729_v51 = vadd.f32 %v5098_v39, %v5010_v45  ;;  %5419 = vmatprep.mubr.msk.f32.mxu1 %vm79_vm1, %v6484_v2 }
 0x105   :  { %v6733_v21 = vpop.f32.mrf.mxu1  ;;  %v6735_v43 = vpop.f32.mrf.mxu0 }
 0x106   :  { %8031 = vst [vmem:[#allocation11_spill] sm:$0xff] %v6735_v43 }
 0x107   :  { %v6737_v25 = vpop.f32.mrf.mxu1  ;;  %v5101_v54 = vpop.f32.mrf.mxu0  ;;  %5420 = vmatmul.mubr.msk.f32.gmra.mxu1 %vm79_vm1, %v65_v20  ;;  %v4332_v20 = vld [vmem:[%s8009_s4 + $0x78] sm:$0xf] }
 0x108   :  { %v6740_v57 = vadd.f32 %v5101_v54, %v5013_v48  ;;  %v4349_v48 = vld [vmem:[%s8010_s5 + $0x78] sm:$0xf]  ;;  %5422 = vmatprep.subr.msk.mxu0 %vm152_vm0, %v4332_v20 }
 0x109   :  { %v6742_v61 = vpop.f32.mrf.mxu1  ;;  %v6744_v0 = vpop.f32.mrf.mxu0  ;;  %5450 = vmatprep.subr.msk.mxu1 %vm152_vm0, %v4349_v48  ;;  %5423 = vmatpush3.msk.msra.mxu0 %vm152_vm0, %v4332_v20  ;;  %v4348_v20 = vld [vmem:[%s8010_s5 + $0x70] sm:$0xff] }
 0x10a   :  { %8032 = vst [vmem:[#allocation12_spill] sm:$0xff] %v6744_v0  ;;  %5451 = vmatpush3.msk.msra.mxu1 %vm152_vm0, %v4349_v48  ;;  %5424 = vmatprep.subr.mxu0 %v4331_v38 }
 0x10b   :  { %v5104_v58 = vpop.f32.mrf.mxu0  ;;  %v5124_v45 = vpop.f32.mrf.mxu1  ;;  %5452 = vmatprep.subr.mxu1 %v4348_v20  ;;  %5425 = vmatpush3.msra.mxu0 %v4331_v38 }
 0x10c   :  { %v6747_v9 = vadd.f32 %v5104_v58, %v6528_v4  ;;  %v6750_v2 = vadd.f32 %v5124_v45, %v6592_v41  ;;  %5453 = vmatpush3.msra.mxu1 %v4348_v20 }
 0x10d   :  { %v6752_v39 = vpop.f32.mrf.mxu0  ;;  %v6754_v10 = vpop.f32.mrf.mxu1 }
 0x10f   :  { %v5107_v4 = vpop.f32.mrf.mxu0  ;;  %v5127_v54 = vpop.f32.mrf.mxu1 }
 0x110   :  { %v6767_v41 = vadd.f32 %v5107_v4, %v6544_v11  ;;  %v6770_v58 = vadd.f32 %v5127_v54, %v6606_v44 }
 0x111   :  { %v6772_v45 = vpop.f32.mrf.mxu0  ;;  %v6774_v5 = vpop.f32.mrf.mxu1 }
 0x112   :  { %8033 = vst [vmem:[#allocation13_spill] sm:$0xff] %v6774_v5 }
 0x113   :  { %v5110_v34 = vpop.f32.mrf.mxu0  ;;  %v5130_v48 = vpop.f32.mrf.mxu1 }
 0x114   :  { %v6783_v11 = vadd.f32 %v5110_v34, %v6560_v23  ;;  %v6786_v44 = vadd.f32 %v5130_v48, %v6620_v46  ;;  %v4330_v23 = vld [vmem:[%s8009_s4 + $0x68] sm:$0xff] }
 0x115   :  { %v6788_v4 = vpop.f32.mrf.mxu0  ;;  %v6790_v54 = vpop.f32.mrf.mxu1  ;;  %v4347_v46 = vld [vmem:[%s8010_s5 + $0x68] sm:$0xff]  ;;  %5426 = vmatprep.subr.mxu0 %v4330_v23 }
 0x116   :  { %5454 = vmatprep.subr.mxu1 %v4347_v46  ;;  %5427 = vmatpush3.msra.mxu0 %v4330_v23 }
 0x117   :  { %v5113_v30 = vpop.f32.mrf.mxu0  ;;  %v5133_v5 = vpop.f32.mrf.mxu1  ;;  %5455 = vmatpush3.msra.mxu1 %v4347_v46 }
 0x118   :  { %v6793_v18 = vadd.f32 %v5113_v30, %v6576_v32  ;;  %v6796_v0 = vadd.f32 %v5133_v5, %v6637_v49 }
 0x119   :  { %v6804_v34 = vpop.f32.mrf.mxu0  ;;  %v6806_v38 = vpop.f32.mrf.mxu1 }
 0x11b   :  { %v5136_v32 = vpop.f32.mrf.mxu1  ;;  %v5168_v30 = vpop.f32.mrf.mxu0 }
 0x11c   :  { %v6809_v49 = vadd.f32 %v5136_v32, %v6648_v50  ;;  %v6812_v5 = vadd.f32 %v5168_v30, %v6653_v52 }
 0x11d   :  { %v6814_v20 = vpop.f32.mrf.mxu1  ;;  %v6816_v48 = vpop.f32.mrf.mxu0 }
 0x11e   :  { %8034 = vst [vmem:[#allocation14_spill] sm:$0xff] %v6814_v20  ;;  %8035 = vst [vmem:[#allocation15_spill] sm:$0xff] %v6816_v48 }
 0x11f   :  { %v5139_v26 = vpop.f32.mrf.mxu1  ;;  %v5171_v43 = vpop.f32.mrf.mxu0 }
 0x120   :  { %v6819_v24 = vadd.f32 %v5139_v26, %v6661_v33  ;;  %v6822_v23 = vadd.f32 %v5171_v43, %v6666_v55  ;;  %v4329_v26 = vld [vmem:[%s8009_s4 + $0x60] sm:$0xff] }
 0x121   :  { %v6824_v46 = vpop.f32.mrf.mxu1  ;;  %v6826_v31 = vpop.f32.mrf.mxu0  ;;  %v4346_v33 = vld [vmem:[%s8010_s5 + $0x60] sm:$0xff]  ;;  %5428 = vmatprep.subr.mxu0 %v4329_v26 }
 0x122   :  { %8036 = vst [vmem:[#allocation16_spill] sm:$0xff] %v6822_v23  ;;  %5456 = vmatprep.subr.mxu1 %v4346_v33  ;;  %5429 = vmatpush3.msra.mxu0 %v4329_v26 }
 0x123   :  { %v5142_v50 = vpop.f32.mrf.mxu1  ;;  %v5174_v32 = vpop.f32.mrf.mxu0  ;;  %5457 = vmatpush3.msra.mxu1 %v4346_v33 }
 0x124   :  { %v6829_v52 = vadd.f32 %v5142_v50, %v6674_v37  ;;  %v6832_v30 = vadd.f32 %v5174_v32, %v6679_v59  ;;  %v4328_v50 = vld [vmem:[%s8009_s4 + $0x58] sm:$0xff] }
 0x125   :  { %v6834_v48 = vpop.f32.mrf.mxu1  ;;  %v6836_v20 = vpop.f32.mrf.mxu0  ;;  %v4345_v32 = vld [vmem:[%s8010_s5 + $0x58] sm:$0xff]  ;;  %5430 = vmatprep.subr.mxu0 %v4328_v50 }
 0x126   :  { %8037 = vst [vmem:[#allocation17_spill] sm:$0xff] %v6832_v30  ;;  %8038 = vst [vmem:[#allocation18_spill] sm:$0xff] %v6836_v20  ;;  %5458 = vmatprep.subr.mxu1 %v4345_v32  ;;  %5431 = vmatpush3.msra.mxu0 %v4328_v50  ;;  %v4326_v50 = vld [vmem:[%s8009_s4 + $0x48] sm:$0xff] }
 0x127   :  { %v5145_v55 = vpop.f32.mrf.mxu1  ;;  %v5177_v37 = vpop.f32.mrf.mxu0  ;;  %5459 = vmatpush3.msra.mxu1 %v4345_v32  ;;  %v4343_v32 = vld [vmem:[%s8010_s5 + $0x48] sm:$0xff] }
 0x128   :  { %v6845_v59 = vadd.f32 %v5145_v55, %v6687_v40  ;;  %v6848_v43 = vadd.f32 %v5177_v37, %v6692_v62  ;;  %v4327_v40 = vld [vmem:[%s8009_s4 + $0x50] sm:$0xff] }
 0x129   :  { %v6856_v30 = vpop.f32.mrf.mxu1  ;;  %v6858_v23 = vpop.f32.mrf.mxu0  ;;  %v4344_v62 = vld [vmem:[%s8010_s5 + $0x50] sm:$0xff]  ;;  %5432 = vmatprep.subr.mxu0 %v4327_v40 }
 0x12a   :  { %8039 = vst [vmem:[#allocation19_spill] sm:$0xff] %v6848_v43  ;;  %8040 = vst [vmem:[#allocation20_spill] sm:$0xff] %v6856_v30  ;;  %5460 = vmatprep.subr.mxu1 %v4344_v62  ;;  %5433 = vmatpush3.msra.mxu0 %v4327_v40 }
 0x12b   :  { %8041 = vst [vmem:[#allocation21_spill] sm:$0xff] %v6858_v23  ;;  %v5148_v26 = vpop.f32.mrf.mxu1  ;;  %v5180_v33 = vpop.f32.mrf.mxu0  ;;  %5461 = vmatpush3.msra.mxu1 %v4344_v62  ;;  %5434 = vmatprep.subr.mxu0 %v4326_v50 }
 0x12c   :  { %v6867_v55 = vadd.f32 %v5148_v26, %v6700_v7  ;;  %v6870_v37 = vadd.f32 %v5180_v33, %v6705_v1  ;;  %5462 = vmatprep.subr.mxu1 %v4343_v32  ;;  %5435 = vmatpush3.msra.mxu0 %v4326_v50  ;;  %v4325_v7 = vld [vmem:[%s8009_s4 + $0x40] sm:$0xff] }
 0x12d   :  { %v6878_v43 = vpop.f32.mrf.mxu1  ;;  %v6880_v23 = vpop.f32.mrf.mxu0  ;;  %5463 = vmatpush3.msra.mxu1 %v4343_v32  ;;  %v4342_v1 = vld [vmem:[%s8010_s5 + $0x40] sm:$0xff]  ;;  %5436 = vmatprep.subr.mxu0 %v4325_v7 }
 0x12e   :  { %8042 = vst [vmem:[#allocation22_spill] sm:$0xff] %v6870_v37  ;;  %8043 = vst [vmem:[#allocation23_spill] sm:$0xff] %v6878_v43  ;;  %5464 = vmatprep.subr.mxu1 %v4342_v1  ;;  %5437 = vmatpush3.msra.mxu0 %v4325_v7 }
 0x12f   :  { %8044 = vst [vmem:[#allocation24_spill] sm:$0xff] %v6880_v23  ;;  %v5151_v40 = vpop.f32.mrf.mxu1  ;;  %v5183_v62 = vpop.f32.mrf.mxu0  ;;  %5465 = vmatpush3.msra.mxu1 %v4342_v1 }
 0x130   :  { %v6889_v26 = vadd.f32 %v5151_v40, %v6713_v14  ;;  %v6892_v33 = vadd.f32 %v5183_v62, %v6717_v22 }
 0x131   :  { %v6894_v50 = vpop.f32.mrf.mxu1  ;;  %v6896_v32 = vpop.f32.mrf.mxu0 }
 0x132   :  { %8045 = vst [vmem:[#allocation25_spill] sm:$0xff] %v6892_v33 }
 0x133   :  { %v5154_v37 = vpop.f32.mrf.mxu1  ;;  %v5186_v23 = vpop.f32.mrf.mxu0 }
 0x134   :  { %v6899_v43 = vadd.f32 %v5154_v37, %v6725_v19  ;;  %v6902_v30 = vadd.f32 %v5186_v23, %v6729_v51  ;;  %v687_v51 = vadd.f32 %v6752_v39, %v6540_v8  ;;  %v697_v39 = vadd.f32 %v6772_v45, %v6556_v17 }
 0x135   :  { %v6904_v20 = vpop.f32.mrf.mxu1  ;;  %v6906_v14 = vpop.f32.mrf.mxu0 }
 0x136   :  { %8046 = vst [vmem:[#allocation26_spill] sm:$0xff] %v6902_v30 }
 0x137   :  { %v5157_v22 = vpop.f32.mrf.mxu1  ;;  %v5189_v40 = vpop.f32.mrf.mxu0 }
 0x138   :  { %v6909_v7 = vadd.f32 %v5157_v22, %v6737_v25  ;;  %v6912_v1 = vadd.f32 %v5189_v40, %v6740_v57  ;;  %v6929_v25 = vld [vmem:[%s8009_s4 + $0x38] sm:$0xf] }
 0x139   :  { %v6914_v62 = vpop.f32.mrf.mxu1  ;;  %v6916_v33 = vpop.f32.mrf.mxu0  ;;  %8050 = vst [vmem:[#allocation30_spill] sm:$0xff] %v6929_v25  ;;  %v6934_v57 = vld [vmem:[%s8010_s5 + $0x38] sm:$0xf]  ;;  %5478 = vmatprep.subr.msk.mxu0 %vm152_vm0, %v6929_v25 }
 0x13a   :  { %8047 = vst [vmem:[#allocation27_spill] sm:$0xff] %v6912_v1  ;;  %8048 = vst [vmem:[#allocation28_spill] sm:$0xff] %v6916_v33  ;;  %5506 = vmatprep.subr.msk.mxu1 %vm152_vm0, %v6934_v57 }
 0x13b   :  { %v5192_v19 = vpop.f32.mrf.mxu0  ;;  %v5212_v37 = vpop.f32.mrf.mxu1  ;;  %8051 = vst [vmem:[#allocation31_spill] sm:$0xff] %v6934_v57 }
 0x13c   :  { %v6921_v23 = vadd.f32 %v5192_v19, %v6747_v9  ;;  %v6924_v30 = vadd.f32 %v5212_v37, %v6750_v2 }
 0x13d   :  { %v1070_v22 = vpop.f32.mrf.mxu0  ;;  %v6936_v40 = vpop.f32.mrf.mxu1 }
 0x13e   :  { %8049 = vst [vmem:[#allocation29_spill] sm:$0xff] %v6921_v23  ;;  %v6942_v8 = vadd.f32 %v1070_v22, %v687_v51  ;;  %v707_v51 = vadd.f32 %v6788_v4, %v6572_v28  ;;  %v815_v22 = vadd.f32 %v6790_v54, %v6635_v47  ;;  %v717_v28 = vadd.f32 %v6804_v34, %v6588_v36 }
 0x13f   :  { %v5195_v9 = vpop.f32.mrf.mxu0  ;;  %v5215_v2 = vpop.f32.mrf.mxu1  ;;  %v825_v47 = vadd.f32 %v6806_v38, %v6646_v29 }
 0x140   :  { %8052 = vst [vmem:[#allocation32_spill] sm:$0xff] %v6942_v8  ;;  %v6947_v19 = vadd.f32 %v5195_v9, %v6767_v41  ;;  %v6950_v37 = vadd.f32 %v5215_v2, %v6770_v58 }
 0x141   :  { %v1080_v23 = vpop.f32.mrf.mxu0  ;;  %v6952_v1 = vpop.f32.mrf.mxu1 }
 0x142   :  { %v6954_v25 = vadd.f32 %v1080_v23, %v697_v39 }
 0x143   :  { %v5198_v33 = vpop.f32.mrf.mxu0  ;;  %v5218_v57 = vpop.f32.mrf.mxu1 }
 0x144   :  { %v6961_v17 = vadd.f32 %v5198_v33, %v6783_v11  ;;  %v6964_v41 = vadd.f32 %v5218_v57, %v6786_v44 }
 0x145   :  { %v1090_v58 = vpop.f32.mrf.mxu0  ;;  %v1203_v45 = vpop.f32.mrf.mxu1 }
 0x146   :  { %v6966_v9 = vadd.f32 %v1090_v58, %v707_v51  ;;  %v6968_v23 = vadd.f32 %v1203_v45, %v815_v22 }
 0x147   :  { %v5201_v2 = vpop.f32.mrf.mxu0  ;;  %v5221_v39 = vpop.f32.mrf.mxu1 }
 0x148   :  { %8053 = vst [vmem:[#allocation33_spill] sm:$0xff] %v6968_v23  ;;  %v6975_v11 = vadd.f32 %v5201_v2, %v6793_v18  ;;  %v6978_v44 = vadd.f32 %v5221_v39, %v6796_v0 }
 0x149   :  { %v1100_v4 = vpop.f32.mrf.mxu0  ;;  %v1213_v54 = vpop.f32.mrf.mxu1 }
 0x14a   :  { %8054 = vst [vmem:[#allocation34_spill] sm:$0xff] %v6978_v44  ;;  %v6980_v33 = vadd.f32 %v1100_v4, %v717_v28  ;;  %v6982_v57 = vadd.f32 %v1213_v54, %v825_v47 }
 0x14b   :  { %v5224_v51 = vpop.f32.mrf.mxu1  ;;  %v5256_v22 = vpop.f32.mrf.mxu0 }
 0x14c   :  { %8055 = vst [vmem:[#allocation35_spill] sm:$0xff] %v6982_v57  ;;  %v6985_v58 = vadd.f32 %v5224_v51, %v6809_v49  ;;  %v6988_v36 = vadd.f32 %v5256_v22, %v6812_v5 }
 0x14d   :  { %v6990_v29 = vpop.f32.mrf.mxu1  ;;  %v6992_v18 = vpop.f32.mrf.mxu0 }
 0x14e   :  { %8056 = vst [vmem:[#allocation36_spill] sm:$0xff] %v6985_v58 }
 0x14f   :  { %v5227_v0 = vpop.f32.mrf.mxu1  ;;  %v6994_v34 = vpop.f32.mrf.mxu0 }
 0x150   :  { %v6997_v38 = vadd.f32 %v5227_v0, %v6819_v24 }
 0x151   :  { %v6999_v45 = vpop.f32.mrf.mxu1  ;;  %v7001_v2 = vpop.f32.mrf.mxu0 }
 0x152   :  { %8057 = vst [vmem:[#allocation37_spill] sm:$0xff] %v6997_v38 }
 0x153   :  { %v5230_v39 = vpop.f32.mrf.mxu1  ;;  %v7003_v49 = vpop.f32.mrf.mxu0 }
 0x154   :  { %v7006_v5 = vadd.f32 %v5230_v39, %v6829_v52 }
 0x155   :  { %v7008_v28 = vpop.f32.mrf.mxu1  ;;  %v7010_v47 = vpop.f32.mrf.mxu0 }
 0x156   :  { %8058 = vst [vmem:[#allocation38_spill] sm:$0xff] %v7006_v5 }
 0x157   :  { %v5233_v4 = vpop.f32.mrf.mxu1  ;;  %v7012_v54 = vpop.f32.mrf.mxu0 }
 0x158   :  { %v7015_v24 = vadd.f32 %v5233_v4, %v6845_v59 }
 0x159   :  { %v7017_v51 = vpop.f32.mrf.mxu1  ;;  %v7019_v22 = vpop.f32.mrf.mxu0 }
 0x15a   :  { %8059 = vst [vmem:[#allocation39_spill] sm:$0xff] %v7015_v24 }
 0x15b   :  { %v5236_v0 = vpop.f32.mrf.mxu1  ;;  %v7021_v8 = vpop.f32.mrf.mxu0 }
 0x15c   :  { %8060 = vst [vmem:[#allocation40_spill] sm:$0xff] %v7021_v8  ;;  %v7024_v52 = vadd.f32 %v5236_v0, %v6867_v55 }
 0x15d   :  { %v7026_v39 = vpop.f32.mrf.mxu1  ;;  %v7028_v5 = vpop.f32.mrf.mxu0 }
 0x15e   :  { %8061 = vst [vmem:[#allocation41_spill] sm:$0xff] %v7024_v52  ;;  %8062 = vst [vmem:[#allocation42_spill] sm:$0xff] %v7026_v39 }
 0x15f   :  { %8063 = vst [vmem:[#allocation43_spill] sm:$0xff] %v7028_v5  ;;  %v5239_v38 = vpop.f32.mrf.mxu1  ;;  %v7030_v58 = vpop.f32.mrf.mxu0 }
 0x160   :  { %8064 = vst [vmem:[#allocation44_spill] sm:$0xff] %v7030_v58  ;;  %v1345_v59 = vadd.f32 %v5239_v38, %v6889_v26  ;;  %v795_v38 = vadd.f32 %v6754_v10, %v6604_v42 }
 0x161   :  { %v1273_v4 = vpop.f32.mrf.mxu1  ;;  %v7033_v24 = vpop.f32.mrf.mxu0 }
 0x162   :  { %8065 = vst [vmem:[#allocation45_spill] sm:$0xff] %v7033_v24 }
 0x163   :  { %v5242_v57 = vpop.f32.mrf.mxu1  ;;  %v7035_v44 = vpop.f32.mrf.mxu0 }
 0x164   :  { %8066 = vst [vmem:[#allocation46_spill] sm:$0xff] %v7035_v44  ;;  %v7038_v23 = vadd.f32 %v5242_v57, %v6899_v43  ;;  %v1326_v57 = vadd.f32 %v6936_v40, %v795_v38 }
 0x165   :  { %v1283_v55 = vpop.f32.mrf.mxu1  ;;  %v7040_v0 = vpop.f32.mrf.mxu0 }
 0x166   :  { %8067 = vst [vmem:[#allocation47_spill] sm:$0xff] %v7040_v0 }
 0x167   :  { %v5245_v39 = vpop.f32.mrf.mxu1  ;;  %v7042_v52 = vpop.f32.mrf.mxu0 }
 0x168   :  { %8068 = vst [vmem:[#allocation48_spill] sm:$0xff] %v7042_v52  ;;  %v7045_v5 = vadd.f32 %v5245_v39, %v6909_v7 }
 0x169   :  { %v7047_v58 = vpop.f32.mrf.mxu1  ;;  %v7049_v26 = vpop.f32.mrf.mxu0 }
 0x16a   :  { %8069 = vst [vmem:[#allocation49_spill] sm:$0xff] %v7049_v26 }
 0x16b   :  { %v7053_v44 = vpop.f32.mrf.mxu0  ;;  %v5300_v43 = vpop.f32.mrf.mxu1 }
 0x16c   :  { %8070 = vst [vmem:[#allocation50_spill] sm:$0xff] %v7053_v44  ;;  %v7057_v0 = vadd.f32 %v5300_v43, %v6924_v30 }
 0x16d   :  { %v7059_v24 = vpop.f32.mrf.mxu0  ;;  %v1620_v52 = vpop.f32.mrf.mxu1 }
 0x16e   :  { %8071 = vst [vmem:[#allocation51_spill] sm:$0xff] %v7059_v24  ;;  %v7061_v7 = vadd.f32 %v1620_v52, %v1326_v57 }
 0x16f   :  { %v5283_v39 = vpop.f32.mrf.mxu0  ;;  %v7063_v8 = vpop.f32.mrf.mxu1 }
 0x170   :  { %v7066_v26 = vadd.f32 %v5283_v39, %v6947_v19 }
 0x171   :  { %v1517_v42 = vpop.f32.mrf.mxu0  ;;  %v7068_v10 = vpop.f32.mrf.mxu1 }
 0x172   :  { %8072 = vst [vmem:[#allocation52_spill] sm:$0xff] %v7066_v26  ;;  %v7071_v44 = vadd.f32 %v1517_v42, %v6954_v25 }
 0x173   :  { %v5286_v40 = vpop.f32.mrf.mxu0  ;;  %v7073_v30 = vpop.f32.mrf.mxu1 }
 0x174   :  { %8073 = vst [vmem:[#allocation53_spill] sm:$0xff] %v7071_v44  ;;  %v7076_v38 = vadd.f32 %v5286_v40, %v6961_v17 }
 0x175   :  { %v1527_v52 = vpop.f32.mrf.mxu0  ;;  %v7078_v43 = vpop.f32.mrf.mxu1 }
 0x176   :  { %8074 = vst [vmem:[#allocation54_spill] sm:$0xff] %v7076_v38  ;;  %8075 = vst [vmem:[#allocation55_spill] sm:$0xff] %v7078_v43  ;;  %v7081_v57 = vadd.f32 %v1527_v52, %v6966_v9 }
 0x177   :  { %v5289_v19 = vpop.f32.mrf.mxu0  ;;  %v7083_v39 = vpop.f32.mrf.mxu1 }
 0x178   :  { %8076 = vst [vmem:[#allocation56_spill] sm:$0xff] %v7081_v57  ;;  %8077 = vst [vmem:[#allocation57_spill] sm:$0xff] %v7083_v39  ;;  %v7086_v26 = vadd.f32 %v5289_v19, %v6975_v11 }
 0x179   :  { %v1537_v25 = vpop.f32.mrf.mxu0  ;;  %v7088_v42 = vpop.f32.mrf.mxu1 }
 0x17a   :  { %8078 = vst [vmem:[#allocation58_spill] sm:$0xff] %v7086_v26  ;;  %8079 = vst [vmem:[#allocation59_spill] sm:$0xff] %v7088_v42  ;;  %v7091_v44 = vadd.f32 %v1537_v25, %v6980_v33 }
 0x17b   :  { %v7093_v17 = vpop.f32.mrf.mxu1  ;;  %v7095_v40 = vpop.f32.mrf.mxu0 }
 0x17c   :  { %8080 = vst [vmem:[#allocation60_spill] sm:$0xff] %v7091_v44  ;;  %8081 = vst [vmem:[#allocation61_spill] sm:$0xff] %v7093_v17 }
 0x17d   :  { %v7097_v38 = vpop.f32.mrf.mxu1  ;;  %v7099_v9 = vpop.f32.mrf.mxu0 }
 0x17e   :  { %8082 = vst [vmem:[#allocation62_spill] sm:$0xff] %v7097_v38 }
 0x17f   :  { %v7101_v52 = vpop.f32.mrf.mxu1  ;;  %v7103_v57 = vpop.f32.mrf.mxu0 }
 0x180   :  { %8083 = vst [vmem:[#allocation63_spill] sm:$0xff] %v7101_v52 }
 0x181   :  { %v7105_v11 = vpop.f32.mrf.mxu1  ;;  %v7107_v19 = vpop.f32.mrf.mxu0 }
 0x182   :  { %8084 = vst [vmem:[#allocation64_spill] sm:$0xff] %v7105_v11 }
 0x183   :  { %v7109_v26 = vpop.f32.mrf.mxu1  ;;  %v7111_v33 = vpop.f32.mrf.mxu0 }
 0x184   :  { %8085 = vst [vmem:[#allocation65_spill] sm:$0xff] %v7109_v26  ;;  %8086 = vst [vmem:[#allocation66_spill] sm:$0xff] %v7111_v33  ;;  %v885_v26 = vadd.f32 %v6894_v50, %v6721_v16  ;;  %v607_v16 = vadd.f32 %v6659_v53, %v6538_v6  ;;  %v8096_v6 = vld [vmem:[#allocation10_spill] sm:$0xff] }
 0x185   :  { %v7113_v25 = vpop.f32.mrf.mxu1  ;;  %v7115_v44 = vpop.f32.mrf.mxu0  ;;  %v657_v53 = vadd.f32 %v8096_v6, %v6616_v15 }
 0x186   :  { %8087 = vst [vmem:[#allocation67_spill] sm:$0xff] %v7113_v25  ;;  %8088 = vst [vmem:[#allocation68_spill] sm:$0xff] %v7115_v44  ;;  %v1344_v43 = vadd.f32 %v1273_v4, %v885_v26  ;;  %v627_v4 = vadd.f32 %v6685_v60, %v6570_v27  ;;  %v8097_v26 = vld [vmem:[#allocation3_spill] sm:$0xff]  ;;  %v8100_v27 = vld [vmem:[#allocation12_spill] sm:$0xff] }
 0x187   :  { %v7117_v24 = vpop.f32.mrf.mxu1  ;;  %v7119_v38 = vpop.f32.mrf.mxu0 }
 0x188   :  { %8089 = vst [vmem:[#allocation69_spill] sm:$0xff] %v7117_v24  ;;  %8090 = vst [vmem:[#allocation70_spill] sm:$0xff] %v7119_v38 }
 0x189   :  { %v7121_v17 = vpop.f32.mrf.mxu1  ;;  %v7123_v52 = vpop.f32.mrf.mxu0 }
 0x18a   :  { %8091 = vst [vmem:[#allocation71_spill] sm:$0xff] %v7121_v17  ;;  %8092 = vst [vmem:[#allocation72_spill] sm:$0xff] %v7123_v52  ;;  %v895_v17 = vadd.f32 %v6904_v20, %v6733_v21  ;;  %v905_v21 = vadd.f32 %v6914_v62, %v6742_v61  ;;  %v8102_v61 = vld [vmem:[#allocation13_spill] sm:$0xff] }
 0x18b   :  { %v7125_v42 = vpop.f32.mrf.mxu1  ;;  %v7127_v11 = vpop.f32.mrf.mxu0 }
 0x18c   :  { %8093 = vst [vmem:[#allocation73_spill] sm:$0xff] %v7125_v42  ;;  %8094 = vst [vmem:[#allocation74_spill] sm:$0xff] %v7127_v11  ;;  %v1346_v33 = vadd.f32 %v1283_v55, %v895_v17  ;;  %v637_v55 = vadd.f32 %v6698_v63, %v6586_v35  ;;  %v1348_v17 = vadd.f32 %v7047_v58, %v905_v21  ;;  %v8105_v63 = vld [vmem:[#allocation14_spill] sm:$0xff] }
 0x18d   :  { %v7129_v39 = vpop.f32.mrf.mxu1  ;;  %v7133_v44 = vpop.f32.mrf.mxu0  ;;  %v8109_v58 = vld [vmem:[#allocation18_spill] sm:$0xff] }
 0x18e   :  { %8095 = vst [vmem:[#allocation75_spill] sm:$0xff] %v7129_v39  ;;  %v1306_v21 = vadd.f32 %v8109_v58, %v627_v4 }
 0x18f   :  { %v5327_v25 = vpop.f32.mrf.mxu1  ;;  %v7141_v11 = vpop.f32.mrf.mxu0 }
 0x190   :  { %v7135_v24 = vadd.f32 %v5327_v25, %v1345_v59  ;;  %v617_v59 = vadd.f32 %v6672_v56, %v6554_v12 }
 0x191   :  { %v1710_v38 = vpop.f32.mrf.mxu1 }
 0x192   :  { %v7139_v52 = vadd.f32 %v1710_v38, %v1344_v43  ;;  %v8098_v38 = vld [vmem:[#allocation11_spill] sm:$0xff]  ;;  %v8099_v43 = vld [vmem:[#allocation4_spill] sm:$0xff] }
 0x193   :  { %v5330_v42 = vpop.f32.mrf.mxu1  ;;  %v667_v12 = vadd.f32 %v8098_v38, %v8097_v26  ;;  %v677_v60 = vadd.f32 %v8100_v27, %v8099_v43  ;;  %v1304_v26 = vadd.f32 %v6826_v31, %v617_v59  ;;  %v8108_v43 = vld [vmem:[#allocation7_spill] sm:$0xff]  ;;  %v1312_v31 = vadd.f32 %v6896_v32, %v657_v53  ;;  %v8117_v32 = vld [vmem:[#allocation16_spill] sm:$0xff] }
 0x194   :  { %v7144_v39 = vadd.f32 %v5330_v42, %v7038_v23  ;;  %v647_v23 = vadd.f32 %v6711_v3, %v6602_v13  ;;  %v8101_v42 = vld [vmem:[#allocation2_spill] sm:$0xff]  ;;  %v8104_v13 = vld [vmem:[#allocation5_spill] sm:$0xff]  ;;  %v8106_v3 = vld [vmem:[#allocation15_spill] sm:$0xff]  ;;  %v855_v27 = vadd.f32 %v6834_v48, %v8108_v43  ;;  %v2177_v43 = vadd.f32 %v7095_v40, %v6988_v36 }
 0x195   :  { %v1720_v50 = vpop.f32.mrf.mxu1  ;;  %v805_v62 = vadd.f32 %v8102_v61, %v8101_v42  ;;  %v835_v15 = vadd.f32 %v8105_v63, %v8104_v13  ;;  %v1302_v25 = vadd.f32 %v8106_v3, %v607_v16  ;;  %v8110_v42 = vld [vmem:[#allocation8_spill] sm:$0xff]  ;;  %v8113_v63 = vld [vmem:[#allocation9_spill] sm:$0xff]  ;;  %v8114_v16 = vld [vmem:[#allocation23_spill] sm:$0xff]  ;;  %v1314_v48 = vadd.f32 %v6906_v14, %v667_v12 }
 0x196   :  { %v7154_v20 = vadd.f32 %v1720_v50, %v1346_v33  ;;  %v7169_v33 = vpop.f32.mrf.mxu0  ;;  %v8107_v50 = vld [vmem:[#allocation6_spill] sm:$0xff]  ;;  %v8111_v61 = vld [vmem:[#allocation20_spill] sm:$0xff]  ;;  %v7190_v3 = vadd.f32 %v8114_v16, %v8113_v63  ;;  %v1742_v14 = vadd.f32 %v6994_v34, %v8117_v32  ;;  %v1741_v12 = vadd.f32 %v7001_v2, %v1304_v26  ;;  %v8118_v34 = vld [vmem:[#allocation17_spill] sm:$0xff] }
 0x197   :  { %v5333_v56 = vpop.f32.mrf.mxu1  ;;  %v845_v6 = vadd.f32 %v6824_v46, %v8107_v50  ;;  %v8115_v46 = vld [vmem:[#allocation24_spill] sm:$0xff]  ;;  %v1739_v4 = vadd.f32 %v6992_v18, %v1302_v25  ;;  %v1328_v58 = vadd.f32 %v6952_v1, %v805_v62  ;;  %v7213_v18 = vld [vmem:[%s8011_s3] ss:$0 sm:$0xff]  ;;  %v7226_v62 = vadd.f32 %v7008_v28, %v855_v27  ;;  %v8122_v16 = vld [vmem:[#allocation43_spill] sm:$0xff] }
 0x198   :  { %v7172_v35 = vadd.f32 %v5333_v56, %v7045_v5  ;;  %v865_v5 = vadd.f32 %v8111_v61, %v8110_v42  ;;  %v1310_v50 = vadd.f32 %v8115_v46, %v647_v23  ;;  %v7206_v23 = vadd.f32 %v6990_v29, %v835_v15  ;;  %v8120_v63 = vld [vmem:[#allocation22_spill] sm:$0xff] }
 0x199   :  { %v1730_v38 = vpop.f32.mrf.mxu1  ;;  %v2176_v40 = vadd.f32 %v7099_v9, %v1739_v4  ;;  %v7220_v29 = vadd.f32 %v6999_v45, %v845_v6  ;;  %v2179_v25 = vadd.f32 %v7103_v57, %v1742_v14  ;;  %v1743_v45 = vadd.f32 %v7010_v47, %v1306_v21  ;;  %v8119_v6 = vld [vmem:[#allocation19_spill] sm:$0xff]  ;;  %v8121_v47 = vld [vmem:[#allocation40_spill] sm:$0xff] }
 0x19a   :  { %8103 = vst [vmem:[#allocation10_spill] sm:$0xff] %v7172_v35  ;;  %v7185_v56 = vadd.f32 %v1730_v38, %v1348_v17  ;;  %v8112_v35 = vld [vmem:[#allocation21_spill] sm:$0xff]  ;;  %v7198_v17 = vpop.f32.mrf.mxu0  ;;  %v1746_v2 = vadd.f32 %v7012_v54, %v8119_v6  ;;  %v7236_v26 = vadd.f32 %v7017_v51, %v865_v5  ;;  %v1768_v57 = vadd.f32 %v7073_v30, %v6964_v41 }
 0x19b   :  { %v1308_v13 = vadd.f32 %v8112_v35, %v637_v55  ;;  %v5388_v59 = vpop.f32.mrf.mxu1  ;;  %v8116_v35 = vld [vmem:[#allocation28_spill] sm:$0xff]  ;;  %v1748_v21 = vadd.f32 %v8121_v47, %v8120_v63  ;;  %v1747_v54 = vadd.f32 %v8122_v16, %v1310_v50  ;;  %v2178_v51 = vadd.f32 %v7107_v19, %v1741_v12  ;;  %v8124_v30 = vld [vmem:[#allocation25_spill] sm:$0xff]  ;;  %v8137_v63 = vld [vmem:[#allocation70_spill] sm:$0xff] }
 0x19c   :  { %v2201_v55 = vadd.f32 %v5388_v59, %v7057_v0  ;;  %v7202_v38 = vadd.f32 %v8116_v35, %v677_v60  ;;  %v1766_v0 = vadd.f32 %v7063_v8, %v6950_v37  ;;  %v1744_v60 = vadd.f32 %v7003_v49, %v8118_v34  ;;  %v7229_v8 = vpop.f32.mrf.mxu0  ;;  %v8126_v35 = vld [vmem:[#allocation33_spill] sm:$0xff] }
 0x19d   :  { %v2057_v36 = vpop.f32.mrf.mxu1  ;;  %v1765_v49 = vadd.f32 %v7068_v10, %v1328_v58  ;;  %v1745_v27 = vadd.f32 %v7019_v22, %v1308_v13  ;;  %v8123_v10 = vld [vmem:[#allocation66_spill] sm:$0xff]  ;;  %v8127_v58 = vld [vmem:[#allocation55_spill] sm:$0xff]  ;;  %v8128_v19 = vld [vmem:[#allocation45_spill] sm:$0xff]  ;;  %v2183_v47 = vadd.f32 %v8137_v63, %v1746_v2 }
 0x19e   :  { %v2225_v53 = vmax.f32 %v2177_v43, %v2201_v55  ;;  %v2200_v1 = vadd.f32 %v2057_v36, %v7061_v7  ;;  %v2181_v59 = vadd.f32 %v8123_v10, %v1744_v60  ;;  %v7248_v4 = vpop.f32.mrf.mxu0  ;;  %v8125_v43 = vld [vmem:[#allocation44_spill] sm:$0xff]  ;;  %v1767_v32 = vadd.f32 %v8127_v58, %v8126_v35  ;;  %v8131_v60 = vld [vmem:[#allocation26_spill] sm:$0xff]  ;;  %v8141_v58 = vld [vmem:[#allocation27_spill] sm:$0xff] }
 0x19f   :  { %v5391_v15 = vpop.f32.mrf.mxu1  ;;  %v1750_v55 = vadd.f32 %v8125_v43, %v8124_v30  ;;  %v8140_v30 = vld [vmem:[#allocation72_spill] sm:$0xff]  ;;  %v8143_v2 = vld [vmem:[#allocation62_spill] sm:$0xff] }
 0x1a0   :  { %v2256_v37 = vadd.f32 %v7213_v18, %v2225_v53  ;;  %v2224_v9 = vmax.f32 %v2176_v40, %v2200_v1  ;;  %v2203_v7 = vadd.f32 %v5391_v15, %v1766_v0  ;;  %v7256_v0 = vadd.f32 %v8128_v19, %v1312_v31  ;;  %v8129_v40 = vld [vmem:[#allocation34_spill] sm:$0xff]  ;;  %v8130_v53 = vld [vmem:[#allocation57_spill] sm:$0xff]  ;;  %v8135_v31 = vld [vmem:[#allocation35_spill] sm:$0xff]  ;;  %v7274_v16 = vpop.f32.mrf.mxu0 }
 0x1a1   :  { %v2067_v28 = vpop.f32.mrf.mxu1  ;;  %v1770_v1 = vadd.f32 %v8130_v53, %v8129_v40  ;;  %v8132_v15 = vld [vmem:[#allocation46_spill] sm:$0xff] }
 0x1a2   :  { %v2255_v42 = vadd.f32 %v7213_v18, %v2224_v9  ;;  %v2227_v61 = vmax.f32 %v2179_v25, %v2203_v7  ;;  %v2202_v5 = vadd.f32 %v2067_v28, %v1765_v49  ;;  %v2280_v22 = vmax.f32 %v2256_v37, 0.0  ;;  %v8133_v37 = vld [vmem:[#allocation68_spill] sm:$0xff]  ;;  %v8134_v28 = vld [vmem:[#allocation47_spill] sm:$0xff]  ;;  %v8144_v53 = vld [vmem:[#allocation74_spill] sm:$0xff] }
 0x1a3   :  { %v5394_v46 = vpop.f32.mrf.mxu1  ;;  %v7264_v25 = vadd.f32 %v8132_v15, %v8131_v60  ;;  %v2180_v9 = vadd.f32 %v8133_v37, %v1743_v45  ;;  %v8145_v37 = vld [vmem:[#allocation49_spill] sm:$0xff] }
 0x1a4   :  { %v2279_v13 = vmax.f32 %v2255_v42, 0.0  ;;  %v2205_v41 = vadd.f32 %v5394_v46, %v1768_v57  ;;  %v2258_v14 = vadd.f32 %v7213_v18, %v2227_v61  ;;  %v2226_v50 = vmax.f32 %v2178_v51, %v2202_v5  ;;  %v8136_v42 = vld [vmem:[#allocation59_spill] sm:$0xff] }
 0x1a5   :  { %v2077_v36 = vpop.f32.mrf.mxu1  ;;  %v7269_v57 = vadd.f32 %v8134_v28, %v1314_v48  ;;  %v1769_v61 = vadd.f32 %v8136_v42, %v8135_v31  ;;  %v2182_v48 = vadd.f32 %v8140_v30, %v1745_v27  ;;  %v2184_v31 = vadd.f32 %v7133_v44, %v1747_v54  ;;  %v2329_v30 = vld [vmem:[%s8010_s5 + $0x30] sm:$0xff] }
 0x1a6   :  { %v7260_v12 = vmax.f32 %v2279_v13, %v2280_v22  ;;  %v2229_v34 = vmax.f32 %v2181_v59, %v2205_v41  ;;  %v2257_v7 = vadd.f32 %v7213_v18, %v2226_v50  ;;  %v2204_v6 = vadd.f32 %v2077_v36, %v1767_v32  ;;  %v8138_v22 = vld [vmem:[#allocation36_spill] sm:$0xff]  ;;  %v8139_v13 = vld [vmem:[#allocation61_spill] sm:$0xff] }
 0x1a7   :  { %v5397_v49 = vpop.f32.mrf.mxu1  ;;  %v2282_v5 = vmax.f32 %v2258_v14, 0.0  ;;  %v1772_v41 = vadd.f32 %v8139_v13, %v8138_v22  ;;  %v8142_v32 = vld [vmem:[#allocation48_spill] sm:$0xff]  ;;  %v1771_v36 = vadd.f32 %v8143_v2, %v7206_v23 }
 0x1a8   :  { %v2207_v51 = vadd.f32 %v5397_v49, %v1770_v1  ;;  %v2281_v46 = vmax.f32 %v2257_v7, 0.0  ;;  %v2260_v10 = vadd.f32 %v7213_v18, %v2229_v34  ;;  %v2228_v45 = vmax.f32 %v2180_v9, %v2204_v6  ;;  %v7290_v34 = vpop.f32.mrf.mxu0  ;;  %v8146_v7 = vld [vmem:[#allocation37_spill] sm:$0xff]  ;;  %v8147_v6 = vld [vmem:[#allocation63_spill] sm:$0xff] }
 0x1a9   :  { %v2087_v59 = vpop.f32.mrf.mxu1  ;;  %v7282_v50 = vadd.f32 %v8142_v32, %v8141_v58  ;;  %v2185_v1 = vadd.f32 %v8144_v53, %v1748_v21  ;;  %v7295_v9 = vadd.f32 %v8145_v37, %v7202_v38  ;;  %v1774_v23 = vadd.f32 %v8147_v6, %v8146_v7  ;;  %v8148_v38 = vld [vmem:[#allocation29_spill] sm:$0xff]  ;;  %v8153_v58 = vld [vmem:[#allocation67_spill] sm:$0xff]  ;;  %v8154_v53 = vld [vmem:[#allocation30_spill] sm:$0xff] }
 0x1aa   :  { %v2231_v43 = vmax.f32 %v2183_v47, %v2207_v51  ;;  %v2206_v35 = vadd.f32 %v2087_v59, %v1769_v61  ;;  %v7286_v14 = vmax.f32 %v2281_v46, %v2282_v5  ;;  %v2259_v19 = vadd.f32 %v7213_v18, %v2228_v45  ;;  %v8149_v47 = vld [vmem:[#allocation50_spill] sm:$0xff]  ;;  %v7312_v59 = vpop.f32.mrf.mxu0  ;;  %v2320_v7 = vld [vmem:[%s8009_s4 + $0x28] sm:$0xff] }
 0x1ab   :  { %v5400_v40 = vpop.f32.mrf.mxu1  ;;  %v2284_v49 = vmax.f32 %v2260_v10, 0.0  ;;  %v7307_v51 = vadd.f32 %v8149_v47, %v8148_v38  ;;  %v2187_v5 = vadd.f32 %v7141_v11, %v1750_v55  ;;  %v8150_v11 = vld [vmem:[#allocation64_spill] sm:$0xff]  ;;  %v1775_v32 = vadd.f32 %v8153_v58, %v7226_v62  ;;  %v8157_v62 = vld [vmem:[#allocation69_spill] sm:$0xff]  ;;  %v2328_v6 = vld [vmem:[%s8010_s5 + $0x28] sm:$0xff] }
 0x1ac   :  { %v2262_v27 = vadd.f32 %v7213_v18, %v2231_v43  ;;  %v2230_v60 = vmax.f32 %v2182_v48, %v2206_v35  ;;  %v2209_v15 = vadd.f32 %v5400_v40, %v1772_v41  ;;  %v2283_v28 = vmax.f32 %v2259_v19, 0.0  ;;  %5438 = vmatprep.mubr.msk.f32.mxu0 %vm2340_vm2, %v7286_v14  ;;  %5466 = vmatprep.mubr.msk.f32.mxu1 %vm2340_vm2, %v7286_v14  ;;  %v2321_v41 = vld [vmem:[%s8009_s4 + $0x30] sm:$0xff]  ;;  %v8151_v48 = vld [vmem:[#allocation38_spill] sm:$0xff]  ;;  %v8152_v43 = vld [vmem:[#allocation65_spill] sm:$0xff] }
 0x1ad   :  { %v2097_v21 = vpop.f32.mrf.mxu1  ;;  %v1773_v55 = vadd.f32 %v8150_v11, %v7220_v29  ;;  %v1776_v35 = vadd.f32 %v8152_v43, %v8151_v48  ;;  %v8155_v29 = vld [vmem:[#allocation31_spill] sm:$0xff]  ;;  %v2319_v38 = vld [vmem:[%s8009_s4 + $0x20] sm:$0xff]  ;;  %v2190_v11 = vadd.f32 %v7274_v16, %v7295_v9 }
 0x1ae   :  { %v2261_v42 = vadd.f32 %v7213_v18, %v2230_v60  ;;  %v2233_v61 = vmax.f32 %v2185_v1, %v2209_v15  ;;  %v2208_v63 = vadd.f32 %v2097_v21, %v1771_v36  ;;  %v7310_v46 = vmax.f32 %v2283_v28, %v2284_v49  ;;  %v8156_v1 = vld [vmem:[#allocation39_spill] sm:$0xff]  ;;  %v7350_v49 = vpop.f32.mrf.mxu0 }
 0x1af   :  { %v2286_v10 = vmax.f32 %v2262_v27, 0.0  ;;  %v5403_v45 = vpop.f32.mrf.mxu1  ;;  %v1778_v27 = vadd.f32 %v8157_v62, %v8156_v1  ;;  %v2186_v60 = vadd.f32 %v7169_v33, %v7256_v0  ;;  %v2188_v0 = vadd.f32 %v7229_v8, %v7269_v57  ;;  %v2327_v8 = vld [vmem:[%s8010_s5 + $0x20] sm:$0xff]  ;;  %v8158_v57 = vld [vmem:[#allocation71_spill] sm:$0xff]  ;;  %v2325_v1 = vld [vmem:[%s8010_s5 + $0x10] sm:$0xff] }
 0x1b0   :  { %v2285_v22 = vmax.f32 %v2261_v42, 0.0  ;;  %v2264_v13 = vadd.f32 %v7213_v18, %v2233_v61  ;;  %v2232_v44 = vmax.f32 %v2184_v31, %v2208_v63  ;;  %v2211_v54 = vadd.f32 %v5403_v45, %v1774_v23  ;;  %5439 = vmatmul.mubr.msk.f32.vlgmr.msra.gmra.mxu0 %vm2340_vm2, %v7310_v46  ;;  %5467 = vmatmul.mubr.msk.f32.vlgmr.msra.gmra.mxu1 %vm2340_vm2, %v7310_v46 }
 0x1b1   :  { %v2107_v2 = vpop.f32.mrf.mxu1  ;;  %5479 = vmatpush3.msk.msra.mxu0 %vm152_vm0, %v8154_v53  ;;  %5507 = vmatpush3.msk.msra.mxu1 %vm152_vm0, %v8155_v29  ;;  %v2189_v23 = vadd.f32 %v7198_v17, %v7264_v25  ;;  %v1777_v47 = vadd.f32 %v8158_v57, %v7236_v26  ;;  %v2318_v26 = vld [vmem:[%s8009_s4 + $0x18] sm:$0xff]  ;;  %v2317_v29 = vld [vmem:[%s8009_s4 + $0x10] sm:$0xff] }
 0x1b2   :  { %v7331_v36 = vmax.f32 %v2285_v22, %v2286_v10  ;;  %v2263_v19 = vadd.f32 %v7213_v18, %v2232_v44  ;;  %v2235_v40 = vmax.f32 %v2187_v5, %v2211_v54  ;;  %v2210_v15 = vadd.f32 %v2107_v2, %v1773_v55  ;;  %5480 = vmatprep.subr.mxu0 %v2321_v41  ;;  %v1954_v22 = vpop.f32.mrf.mxu0  ;;  %v8161_v2 = vld [vmem:[#allocation42_spill] sm:$0xff] }
 0x1b3   :  { %v5406_v37 = vpop.f32.mrf.mxu1  ;;  %5508 = vmatprep.subr.mxu1 %v2329_v30  ;;  %v2288_v28 = vmax.f32 %v2264_v13, 0.0  ;;  %5481 = vmatpush3.msra.mxu0 %v2321_v41  ;;  %v2191_v5 = vadd.f32 %v7248_v4, %v7282_v50  ;;  %v2326_v4 = vld [vmem:[%s8010_s5 + $0x18] sm:$0xff] }
 0x1b4   :  { %v2287_v21 = vmax.f32 %v2263_v19, 0.0  ;;  %v2213_v33 = vadd.f32 %v5406_v37, %v1776_v35  ;;  %5441 = vmatprep.mubr.msk.f32.mxu0 %vm2340_vm2, %v7331_v36  ;;  %5469 = vmatprep.mubr.msk.f32.mxu1 %vm2340_vm2, %v7331_v36  ;;  %v2266_v31 = vadd.f32 %v7213_v18, %v2235_v40  ;;  %v2234_v42 = vmax.f32 %v2186_v60, %v2210_v15  ;;  %v8159_v50 = vld [vmem:[#allocation41_spill] sm:$0xff]  ;;  %v5374_v62 = vpop.f32.mrf.mxu0  ;;  %v8163_v15 = vld [vmem:[#allocation51_spill] sm:$0xff] }
 0x1b5   :  { %v2117_v61 = vpop.f32.mrf.mxu1  ;;  %5509 = vmatpush3.msra.mxu1 %v2329_v30  ;;  %5482 = vmatprep.subr.mxu0 %v2320_v7  ;;  %v8160_v41 = vld [vmem:[#allocation73_spill] sm:$0xff]  ;;  %v1342_v19 = vadd.f32 %v8161_v2, %v7190_v3  ;;  %v2193_v40 = vadd.f32 %v7290_v34, %v7307_v51  ;;  %v8162_v51 = vld [vmem:[#allocation32_spill] sm:$0xff] }
 0x1b6   :  { %v7359_v17 = vmax.f32 %v2287_v21, %v2288_v28  ;;  %v2237_v25 = vmax.f32 %v2189_v23, %v2213_v33  ;;  %v2212_v63 = vadd.f32 %v2117_v61, %v1775_v32  ;;  %5510 = vmatprep.subr.mxu1 %v2328_v6  ;;  %v2265_v10 = vadd.f32 %v7213_v18, %v2234_v42 }
 0x1b7   :  { %v5409_v45 = vpop.f32.mrf.mxu1  ;;  %5483 = vmatpush3.msra.mxu0 %v2320_v7  ;;  %5511 = vmatpush3.msra.mxu1 %v2328_v6  ;;  %v1780_v30 = vadd.f32 %v8160_v41, %v8159_v50  ;;  %v2290_v55 = vmax.f32 %v2266_v31, 0.0  ;;  %v1755_v37 = vadd.f32 %v8163_v15, %v8162_v51  ;;  %v8164_v7 = vld [vmem:[#allocation75_spill] sm:$0xff]  ;;  %v8167_v50 = vld [vmem:[#allocation54_spill] sm:$0xff] }
 0x1b8   :  { %v2268_v13 = vadd.f32 %v7213_v18, %v2237_v25  ;;  %v2236_v44 = vmax.f32 %v2188_v0, %v2212_v63  ;;  %v2215_v54 = vadd.f32 %v5409_v45, %v1778_v27  ;;  %5442 = vmatmul.mubr.msk.f32.gmra.mxu0 %vm2340_vm2, %v7359_v17  ;;  %5470 = vmatmul.mubr.msk.f32.gmra.mxu1 %vm2340_vm2, %v7359_v17  ;;  %v2289_v48 = vmax.f32 %v2265_v10, 0.0  ;;  %v2316_v0 = vld [vmem:[%s8009_s4 + $0x8] sm:$0xff]  ;;  %v8165_v63 = vld [vmem:[#allocation52_spill] sm:$0xff]  ;;  %v2323_v10 = vld [vmem:[%s8010_s5] sm:$0xff] }
 0x1b9   :  { %v2127_v43 = vpop.f32.mrf.mxu1  ;;  %5484 = vmatprep.subr.mxu0 %v2319_v38  ;;  %5512 = vmatprep.subr.mxu1 %v2327_v8  ;;  %v1779_v6 = vadd.f32 %v8164_v7, %v1342_v19  ;;  %v2324_v31 = vld [vmem:[%s8010_s5 + $0x8] sm:$0xff]  ;;  %v2192_v42 = vadd.f32 %v7312_v59, %v1755_v37  ;;  %v2315_v59 = vld [vmem:[%s8009_s4] sm:$0xff]  ;;  %v2197_v41 = vadd.f32 %v5374_v62, %v8167_v50 }
 0x1ba   :  { %v2267_v35 = vadd.f32 %v7213_v18, %v2236_v44  ;;  %v2239_v58 = vmax.f32 %v2191_v5, %v2215_v54  ;;  %v2214_v32 = vadd.f32 %v2127_v43, %v1777_v47  ;;  %5485 = vmatpush3.msra.mxu0 %v2319_v38  ;;  %5513 = vmatpush3.msra.mxu1 %v2327_v8  ;;  %v2292_v16 = vmax.f32 %v2268_v13, 0.0  ;;  %v1964_v8 = vpop.f32.mrf.mxu0  ;;  %v8170_v37 = vld [vmem:[#allocation10_spill] sm:$0xff] }
 0x1bb   :  { %v7392_v53 = vmax.f32 %v2289_v48, %v2290_v55  ;;  %v5412_v9 = vpop.f32.mrf.mxu1  ;;  %5486 = vmatprep.subr.mxu0 %v2318_v26  ;;  %5514 = vmatprep.subr.mxu1 %v2326_v4  ;;  %v2195_v38 = vadd.f32 %v7350_v49, %v8165_v63  ;;  %v8166_v49 = vld [vmem:[#allocation53_spill] sm:$0xff]  ;;  %v4394_v50 = vld [vmem:[%s8010_s5 + $0x80] sm:$0xff] }
 0x1bc   :  { %v2291_v27 = vmax.f32 %v2267_v35, 0.0  ;;  %v2270_v3 = vadd.f32 %v7213_v18, %v2239_v58  ;;  %v2238_v60 = vmax.f32 %v2190_v11, %v2214_v32  ;;  %v2217_v34 = vadd.f32 %v5412_v9, %v1780_v30  ;;  %5487 = vmatpush3.msra.mxu0 %v2318_v26  ;;  %5515 = vmatpush3.msra.mxu1 %v2326_v4  ;;  %v4401_v55 = vld [vmem:[%s8010_s5 + $0xb8] sm:$0xf]  ;;  %v5377_v48 = vpop.f32.mrf.mxu0  ;;  %v8168_v58 = vld [vmem:[#allocation56_spill] sm:$0xff] }
 0x1bd   :  { %5444 = vmatprep.mubr.msk.f32.mxu0 %vm2340_vm2, %v7392_v53  ;;  %5472 = vmatprep.mubr.msk.f32.mxu1 %vm2340_vm2, %v7392_v53  ;;  %v2137_v23 = vpop.f32.mrf.mxu1  ;;  %v2194_v45 = vadd.f32 %v1954_v22, %v8166_v49  ;;  %v4384_v22 = vld [vmem:[%s8009_s4 + $0xb8] sm:$0xf]  ;;  %v2196_v32 = vadd.f32 %v1964_v8, %v8168_v58  ;;  %v4413_v58 = vld [vmem:[%s8009_s4 + $0xd0] sm:$0xff] }
 0x1be   :  { %v7408_v28 = vmax.f32 %v2291_v27, %v2292_v16  ;;  %v2269_v21 = vadd.f32 %v7213_v18, %v2238_v60  ;;  %v2241_v33 = vmax.f32 %v2193_v40, %v2217_v34  ;;  %5488 = vmatprep.subr.mxu0 %v2317_v29  ;;  %5516 = vmatprep.subr.mxu1 %v2325_v1  ;;  %v2294_v57 = vmax.f32 %v2270_v3, 0.0  ;;  %v1974_v60 = vpop.f32.mrf.mxu0  ;;  %v4380_v49 = vld [vmem:[%s8009_s4 + $0x98] sm:$0xff] }
 0x1bf   :  { %v2216_v61 = vadd.f32 %v2137_v23, %v1779_v6  ;;  %v5415_v25 = vpop.f32.mrf.mxu1  ;;  %5489 = vmatpush3.msra.mxu0 %v2317_v29  ;;  %5517 = vmatpush3.msra.mxu1 %v2325_v1 }
 0x1c0   :  { %v2293_v47 = vmax.f32 %v2269_v21, 0.0  ;;  %v2219_v5 = vadd.f32 %v5415_v25, %v7135_v24  ;;  %5445 = vmatmul.mubr.msk.f32.gmra.mxu0 %vm2340_vm2, %v7408_v28  ;;  %5473 = vmatmul.mubr.msk.f32.gmra.mxu1 %vm2340_vm2, %v7408_v28  ;;  %v2272_v13 = vadd.f32 %v7213_v18, %v2241_v33  ;;  %v8171_v33 = vld [vmem:[#allocation60_spill] sm:$0xff] }
 0x1c1   :  { %v2240_v44 = vmax.f32 %v2192_v42, %v2216_v61  ;;  %v2147_v24 = vpop.f32.mrf.mxu1  ;;  %5490 = vmatprep.subr.mxu0 %v2316_v0  ;;  %5518 = vmatprep.subr.mxu1 %v2324_v31 }
 0x1c2   :  { %v7433_v54 = vmax.f32 %v2293_v47, %v2294_v57  ;;  %v2243_v26 = vmax.f32 %v2195_v38, %v2219_v5  ;;  %v2218_v4 = vadd.f32 %v2147_v24, %v7139_v52  ;;  %5491 = vmatpush3.msra.mxu0 %v2316_v0  ;;  %5519 = vmatpush3.msra.mxu1 %v2324_v31  ;;  %v2296_v2 = vmax.f32 %v2272_v13, 0.0  ;;  %v4383_v38 = vld [vmem:[%s8009_s4 + $0xb0] sm:$0xff]  ;;  %v4399_v57 = vld [vmem:[%s8010_s5 + $0xa8] sm:$0xff] }
 0x1c3   :  { %v2271_v30 = vadd.f32 %v7213_v18, %v2240_v44  ;;  %v5418_v11 = vpop.f32.mrf.mxu1  ;;  %5492 = vmatprep.subr.mxu0 %v2315_v59  ;;  %5520 = vmatprep.subr.mxu1 %v2323_v10  ;;  %v2198_v0 = vadd.f32 %v1974_v60, %v8171_v33  ;;  %v4379_v13 = vld [vmem:[%s8009_s4 + $0x90] sm:$0xff]  ;;  %v4378_v24 = vld [vmem:[%s8009_s4 + $0x88] sm:$0xff]  ;;  %v4466_v60 = vld [vmem:[%s8010_s5 + $0x120] sm:$0xff] }
 0x1c4   :  { %v2274_v52 = vadd.f32 %v7213_v18, %v2243_v26  ;;  %v2242_v43 = vmax.f32 %v2194_v45, %v2218_v4  ;;  %v2221_v35 = vadd.f32 %v5418_v11, %v7144_v39  ;;  %5447 = vmatprep.mubr.msk.f32.mxu0 %vm2340_vm2, %v7433_v54  ;;  %5475 = vmatprep.mubr.msk.f32.mxu1 %vm2340_vm2, %v7433_v54  ;;  %v8169_v39 = vld [vmem:[#allocation58_spill] sm:$0xff]  ;;  %v4397_v45 = vld [vmem:[%s8010_s5 + $0x98] sm:$0xff]  ;;  %v4396_v44 = vld [vmem:[%s8010_s5 + $0x90] sm:$0xff] }
 0x1c5   :  { %v2295_v19 = vmax.f32 %v2271_v30, 0.0  ;;  %v2157_v40 = vpop.f32.mrf.mxu1  ;;  %5493 = vmatpush3.msra.mxu0 %v2315_v59  ;;  %5521 = vmatpush3.msra.mxu1 %v2323_v10  ;;  %v2199_v1 = vadd.f32 %v5377_v48, %v8169_v39  ;;  %v4381_v59 = vld [vmem:[%s8009_s4 + $0xa0] sm:$0xff]  ;;  %v4395_v26 = vld [vmem:[%s8010_s5 + $0x88] sm:$0xff]  ;;  %v4435_v30 = vld [vmem:[%s8010_s5 + $0xf8] sm:$0xf] }
 0x1c6   :  { %v2273_v16 = vadd.f32 %v7213_v18, %v2242_v43  ;;  %v2245_v9 = vmax.f32 %v2197_v41, %v2221_v35  ;;  %v2220_v29 = vadd.f32 %v2157_v40, %v7154_v20  ;;  %5534 = vmatprep.subr.msk.mxu0 %vm152_vm0, %v4384_v22  ;;  %5562 = vmatprep.subr.msk.mxu1 %vm152_vm0, %v4401_v55  ;;  %v2298_v27 = vmax.f32 %v2274_v52, 0.0  ;;  %v4398_v10 = vld [vmem:[%s8010_s5 + $0xa0] sm:$0xff]  ;;  %v4418_v41 = vld [vmem:[%s8009_s4 + $0xf8] sm:$0xf]  ;;  %v4434_v11 = vld [vmem:[%s8010_s5 + $0xf0] sm:$0xff] }
 0x1c7   :  { %v7456_v62 = vmax.f32 %v2295_v19, %v2296_v2  ;;  %v5421_v3 = vpop.f32.mrf.mxu1  ;;  %v4377_v4 = vld [vmem:[%s8009_s4 + $0x80] sm:$0xff]  ;;  %v4414_v43 = vld [vmem:[%s8009_s4 + $0xd8] sm:$0xff]  ;;  %v4412_v2 = vld [vmem:[%s8009_s4 + $0xc8] sm:$0xff] }
 0x1c8   :  { %v2297_v34 = vmax.f32 %v2273_v16, 0.0  ;;  %v2276_v51 = vadd.f32 %v7213_v18, %v2245_v9  ;;  %v2244_v15 = vmax.f32 %v2196_v32, %v2220_v29  ;;  %v2223_v7 = vadd.f32 %v5421_v3, %v8170_v37  ;;  %v4415_v48 = vld [vmem:[%s8009_s4 + $0xe0] sm:$0xff]  ;;  %v4431_v35 = vld [vmem:[%s8010_s5 + $0xd8] sm:$0xff]  ;;  %v4430_v32 = vld [vmem:[%s8010_s5 + $0xd0] sm:$0xff] }
 0x1c9   :  { %5448 = vmatmul.mubr.msk.f32.gmra.mxu0 %vm2340_vm2, %v7456_v62  ;;  %5476 = vmatmul.mubr.msk.f32.gmra.mxu1 %vm2340_vm2, %v7456_v62  ;;  %v2167_v20 = vpop.f32.mrf.mxu1  ;;  %v4432_v52 = vld [vmem:[%s8010_s5 + $0xe0] sm:$0xff]  ;;  %v4429_v19 = vld [vmem:[%s8010_s5 + $0xc8] sm:$0xff]  ;;  %v4452_v9 = vld [vmem:[%s8009_s4 + $0x138] sm:$0xf] }
 0x1ca   :  { %v7464_v6 = vmax.f32 %v2297_v34, %v2298_v27  ;;  %v2275_v23 = vadd.f32 %v7213_v18, %v2244_v15  ;;  %v2247_v21 = vmax.f32 %v2199_v1, %v2223_v7  ;;  %5494 = vmatprep.mubr.msk.f32.mxu0 %vm2340_vm2, %v7260_v12  ;;  %5522 = vmatprep.mubr.msk.f32.mxu1 %vm2340_vm2, %v7260_v12  ;;  %v2300_v42 = vmax.f32 %v2276_v51, 0.0  ;;  %v4400_v12 = vld [vmem:[%s8010_s5 + $0xb0] sm:$0xff]  ;;  %v4411_v40 = vld [vmem:[%s8009_s4 + $0xc0] sm:$0xff]  ;;  %v4469_v29 = vld [vmem:[%s8010_s5 + $0x138] sm:$0xf] }
 0x1cb   :  { %v2222_v31 = vadd.f32 %v2167_v20, %v7185_v56  ;;  %v4428_v16 = vld [vmem:[%s8010_s5 + $0xc0] sm:$0xff]  ;;  %v4468_v39 = vld [vmem:[%s8010_s5 + $0x130] sm:$0xff]  ;;  %v4450_v1 = vld [vmem:[%s8009_s4 + $0x128] sm:$0xff] }
 0x1cc   :  { %v2299_v61 = vmax.f32 %v2275_v23, 0.0  ;;  %v2278_v25 = vadd.f32 %v7213_v18, %v2247_v21  ;;  %v4467_v27 = vld [vmem:[%s8010_s5 + $0x128] sm:$0xff]  ;;  %v4449_v3 = vld [vmem:[%s8009_s4 + $0x120] sm:$0xff]  ;;  %v4448_v34 = vld [vmem:[%s8009_s4 + $0x118] sm:$0xff] }
 0x1cd   :  { %v2246_v63 = vmax.f32 %v2198_v0, %v2222_v31  ;;  %5495 = vmatmul.mubr.msk.f32.vlgmr.msra.gmra.mxu0 %vm2340_vm2, %v7286_v14  ;;  %5523 = vmatmul.mubr.msk.f32.vlgmr.msra.gmra.mxu1 %vm2340_vm2, %v7286_v14  ;;  %v4382_v14 = vld [vmem:[%s8009_s4 + $0xa8] sm:$0xff]  ;;  %v4465_v51 = vld [vmem:[%s8010_s5 + $0x118] sm:$0xff]  ;;  %v4447_v15 = vld [vmem:[%s8009_s4 + $0x110] sm:$0xff] }
 0x1ce   :  { %v7484_v56 = vmax.f32 %v2299_v61, %v2300_v42  ;;  %5497 = vmatprep.mubr.msk.f32.mxu0 %vm2340_vm2, %v7310_v46  ;;  %5525 = vmatprep.mubr.msk.f32.mxu1 %vm2340_vm2, %v7310_v46  ;;  %v2302_v47 = vmax.f32 %v2278_v25, 0.0  ;;  %v4464_v37 = vld [vmem:[%s8010_s5 + $0x110] sm:$0xff]  ;;  %v4446_v7 = vld [vmem:[%s8009_s4 + $0x108] sm:$0xff]  ;;  %v4445_v23 = vld [vmem:[%s8009_s4 + $0x100] sm:$0xff] }
 0x1cf   :  { %v2277_v8 = vadd.f32 %v7213_v18, %v2246_v63  ;;  %5535 = vmatpush3.msk.msra.mxu0 %vm152_vm0, %v4384_v22  ;;  %5563 = vmatpush3.msk.msra.mxu1 %vm152_vm0, %v4401_v55  ;;  %v4416_v22 = vld [vmem:[%s8009_s4 + $0xe8] sm:$0xff]  ;;  %v4462_v21 = vld [vmem:[%s8010_s5 + $0x100] sm:$0xff]  ;;  %v4482_v0 = vld [vmem:[%s8012_s7 + $0x38] sm:$0xff] }
 0x1d0   :  { %5536 = vmatprep.subr.mxu0 %v4383_v38  ;;  %5564 = vmatprep.subr.mxu1 %v4400_v12  ;;  %v4433_v55 = vld [vmem:[%s8010_s5 + $0xe8] sm:$0xff]  ;;  %v3603_v31 = vld [vmem:[%s8012_s7] sm:$0xff]  ;;  %v4481_v42 = vld [vmem:[%s8012_s7 + $0x30] sm:$0xff] }
 0x1d1   :  { %v2301_v5 = vmax.f32 %v2277_v8, 0.0  ;;  %5537 = vmatpush3.msra.mxu0 %v4383_v38  ;;  %5565 = vmatpush3.msra.mxu1 %v4400_v12  ;;  %v4463_v20 = vld [vmem:[%s8010_s5 + $0x108] sm:$0xff] }
 0x1d2   :  { %5498 = vmatmul.mubr.msk.f32.gmra.mxu0 %vm2340_vm2, %v7331_v36  ;;  %5526 = vmatmul.mubr.msk.f32.gmra.mxu1 %vm2340_vm2, %v7331_v36  ;;  %v3604_v33 = vld [vmem:[%s8012_s7 + $0x8] sm:$0xff] }
 0x1d3   :  { %v7503_v18 = vmax.f32 %v2301_v5, %v2302_v47  ;;  %5538 = vmatprep.subr.mxu0 %v4382_v14  ;;  %5566 = vmatprep.subr.mxu1 %v4399_v57  ;;  %v4480_v61 = vld [vmem:[%s8012_s7 + $0x28] sm:$0xff] }
 0x1d4   :  { %5500 = vmatprep.mubr.msk.f32.mxu0 %vm2340_vm2, %v7359_v17  ;;  %5528 = vmatprep.mubr.msk.f32.mxu1 %vm2340_vm2, %v7359_v17 }
 0x1d5   :  { %5539 = vmatpush3.msra.mxu0 %v4382_v14  ;;  %5567 = vmatpush3.msra.mxu1 %v4399_v57 }
 0x1d6   :  { %5540 = vmatprep.subr.mxu0 %v4381_v59  ;;  %5568 = vmatprep.subr.mxu1 %v4398_v10 }
 0x1d7   :  { %5541 = vmatpush3.msra.mxu0 %v4381_v59  ;;  %5569 = vmatpush3.msra.mxu1 %v4398_v10 }
 0x1d8   :  { %5501 = vmatmul.mubr.msk.f32.gmra.mxu0 %vm2340_vm2, %v7392_v53  ;;  %5529 = vmatmul.mubr.msk.f32.gmra.mxu1 %vm2340_vm2, %v7392_v53 }
 0x1d9   :  { %5542 = vmatprep.subr.mxu0 %v4380_v49  ;;  %5570 = vmatprep.subr.mxu1 %v4397_v45 }
 0x1da   :  { %5503 = vmatprep.mubr.msk.f32.mxu0 %vm2340_vm2, %v7408_v28  ;;  %5531 = vmatprep.mubr.msk.f32.mxu1 %vm2340_vm2, %v7408_v28 }
 0x1db   :  { %5543 = vmatpush3.msra.mxu0 %v4380_v49  ;;  %5571 = vmatpush3.msra.mxu1 %v4397_v45 }
 0x1dc   :  { %5544 = vmatprep.subr.mxu0 %v4379_v13  ;;  %5572 = vmatprep.subr.mxu1 %v4396_v44 }
 0x1dd   :  { %5545 = vmatpush3.msra.mxu0 %v4379_v13  ;;  %5573 = vmatpush3.msra.mxu1 %v4396_v44 }
 0x1de   :  { %5504 = vmatmul.mubr.msk.f32.gmra.mxu0 %vm2340_vm2, %v7433_v54  ;;  %5532 = vmatmul.mubr.msk.f32.gmra.mxu1 %vm2340_vm2, %v7433_v54 }
 0x1df   :  { %5546 = vmatprep.subr.mxu0 %v4378_v24  ;;  %5574 = vmatprep.subr.mxu1 %v4395_v26 }
 0x1e0   :  { %5547 = vmatpush3.msra.mxu0 %v4378_v24  ;;  %5550 = vmatprep.mubr.msk.f32.mxu0 %vm2340_vm2, %v7310_v46 }
 0x1e1   :  { %5575 = vmatpush3.msra.mxu1 %v4395_v26  ;;  %5578 = vmatprep.mubr.msk.f32.mxu1 %vm2340_vm2, %v7310_v46  ;;  %v4417_v46 = vld [vmem:[%s8009_s4 + $0xf0] sm:$0xff] }
 0x1e2   :  { %5548 = vmatprep.subr.mxu0 %v4377_v4  ;;  %5576 = vmatprep.subr.mxu1 %v4394_v50 }
 0x1e3   :  { %5549 = vmatpush3.msra.mxu0 %v4377_v4  ;;  %5577 = vmatpush3.msra.mxu1 %v4394_v50 }
 0x1e4   :  { %5551 = vmatmul.mubr.msk.f32.vlgmr.msra.gmra.mxu0 %vm2340_vm2, %v7331_v36  ;;  %5579 = vmatmul.mubr.msk.f32.vlgmr.msra.gmra.mxu1 %vm2340_vm2, %v7331_v36 }
 0x1e5   :  { %5590 = vmatprep.subr.msk.mxu0 %vm152_vm0, %v4418_v41  ;;  %5618 = vmatprep.subr.msk.mxu1 %vm152_vm0, %v4435_v30 }
 0x1e6   :  { %5553 = vmatprep.mubr.msk.f32.mxu0 %vm2340_vm2, %v7359_v17  ;;  %5581 = vmatprep.mubr.msk.f32.mxu1 %vm2340_vm2, %v7359_v17 }
 0x1e7   :  { %5591 = vmatpush3.msk.msra.mxu0 %vm152_vm0, %v4418_v41  ;;  %5619 = vmatpush3.msk.msra.mxu1 %vm152_vm0, %v4435_v30 }
 0x1e8   :  { %5592 = vmatprep.subr.mxu0 %v4417_v46  ;;  %5620 = vmatprep.subr.mxu1 %v4434_v11 }
 0x1e9   :  { %5593 = vmatpush3.msra.mxu0 %v4417_v46  ;;  %5621 = vmatpush3.msra.mxu1 %v4434_v11 }
 0x1ea   :  { %5554 = vmatmul.mubr.msk.f32.gmra.mxu0 %vm2340_vm2, %v7392_v53  ;;  %5582 = vmatmul.mubr.msk.f32.gmra.mxu1 %vm2340_vm2, %v7392_v53 }
 0x1eb   :  { %5594 = vmatprep.subr.mxu0 %v4416_v22  ;;  %5622 = vmatprep.subr.mxu1 %v4433_v55 }
 0x1ec   :  { %5556 = vmatprep.mubr.msk.f32.mxu0 %vm2340_vm2, %v7408_v28  ;;  %5584 = vmatprep.mubr.msk.f32.mxu1 %vm2340_vm2, %v7408_v28 }
 0x1ed   :  { %5595 = vmatpush3.msra.mxu0 %v4416_v22  ;;  %5623 = vmatpush3.msra.mxu1 %v4433_v55 }
 0x1ee   :  { %5596 = vmatprep.subr.mxu0 %v4415_v48  ;;  %5624 = vmatprep.subr.mxu1 %v4432_v52 }
 0x1ef   :  { %5597 = vmatpush3.msra.mxu0 %v4415_v48  ;;  %5625 = vmatpush3.msra.mxu1 %v4432_v52 }
 0x1f0   :  { %5557 = vmatmul.mubr.msk.f32.gmra.mxu0 %vm2340_vm2, %v7433_v54  ;;  %5585 = vmatmul.mubr.msk.f32.gmra.mxu1 %vm2340_vm2, %v7433_v54 }
 0x1f1   :  { %5598 = vmatprep.subr.mxu0 %v4414_v43  ;;  %5626 = vmatprep.subr.mxu1 %v4431_v35 }
 0x1f2   :  { %5559 = vmatprep.mubr.msk.f32.mxu0 %vm2340_vm2, %v7456_v62  ;;  %5587 = vmatprep.mubr.msk.f32.mxu1 %vm2340_vm2, %v7456_v62 }
 0x1f3   :  { %5599 = vmatpush3.msra.mxu0 %v4414_v43  ;;  %5627 = vmatpush3.msra.mxu1 %v4431_v35 }
 0x1f4   :  { %5600 = vmatprep.subr.mxu0 %v4413_v58  ;;  %5628 = vmatprep.subr.mxu1 %v4430_v32 }
 0x1f5   :  { %5601 = vmatpush3.msra.mxu0 %v4413_v58  ;;  %5629 = vmatpush3.msra.mxu1 %v4430_v32 }
 0x1f6   :  { %5560 = vmatmul.mubr.msk.f32.gmra.mxu0 %vm2340_vm2, %v7464_v6  ;;  %5588 = vmatmul.mubr.msk.f32.gmra.mxu1 %vm2340_vm2, %v7464_v6 }
 0x1f7   :  { %5602 = vmatprep.subr.mxu0 %v4412_v2  ;;  %5630 = vmatprep.subr.mxu1 %v4429_v19 }
 0x1f8   :  { %5603 = vmatpush3.msra.mxu0 %v4412_v2  ;;  %5606 = vmatprep.mubr.msk.f32.mxu0 %vm2340_vm2, %v7331_v36 }
 0x1f9   :  { %5631 = vmatpush3.msra.mxu1 %v4429_v19  ;;  %5634 = vmatprep.mubr.msk.f32.mxu1 %vm2340_vm2, %v7331_v36  ;;  %v4451_v36 = vld [vmem:[%s8009_s4 + $0x130] sm:$0xff] }
 0x1fa   :  { %5604 = vmatprep.subr.mxu0 %v4411_v40  ;;  %5632 = vmatprep.subr.mxu1 %v4428_v16 }
 0x1fb   :  { %5605 = vmatpush3.msra.mxu0 %v4411_v40  ;;  %5633 = vmatpush3.msra.mxu1 %v4428_v16 }
 0x1fc   :  { %5607 = vmatmul.mubr.msk.f32.vlgmr.msra.gmra.mxu0 %vm2340_vm2, %v7359_v17  ;;  %5635 = vmatmul.mubr.msk.f32.vlgmr.msra.gmra.mxu1 %vm2340_vm2, %v7359_v17 }
 0x1fd   :  { %5646 = vmatprep.subr.msk.mxu0 %vm152_vm0, %v4452_v9  ;;  %5674 = vmatprep.subr.msk.mxu1 %vm152_vm0, %v4469_v29 }
 0x1fe   :  { %5609 = vmatprep.mubr.msk.f32.mxu0 %vm2340_vm2, %v7392_v53  ;;  %5637 = vmatprep.mubr.msk.f32.mxu1 %vm2340_vm2, %v7392_v53 }
 0x1ff   :  { %5647 = vmatpush3.msk.msra.mxu0 %vm152_vm0, %v4452_v9  ;;  %5675 = vmatpush3.msk.msra.mxu1 %vm152_vm0, %v4469_v29 }
 0x200   :  { %5648 = vmatprep.subr.mxu0 %v4451_v36  ;;  %5676 = vmatprep.subr.mxu1 %v4468_v39 }
 0x201   :  { %5649 = vmatpush3.msra.mxu0 %v4451_v36  ;;  %5677 = vmatpush3.msra.mxu1 %v4468_v39 }
 0x202   :  { %5610 = vmatmul.mubr.msk.f32.gmra.mxu0 %vm2340_vm2, %v7408_v28  ;;  %5638 = vmatmul.mubr.msk.f32.gmra.mxu1 %vm2340_vm2, %v7408_v28 }
 0x203   :  { %5650 = vmatprep.subr.mxu0 %v4450_v1  ;;  %5678 = vmatprep.subr.mxu1 %v4467_v27 }
 0x204   :  { %5612 = vmatprep.mubr.msk.f32.mxu0 %vm2340_vm2, %v7433_v54  ;;  %5640 = vmatprep.mubr.msk.f32.mxu1 %vm2340_vm2, %v7433_v54 }
 0x205   :  { %5651 = vmatpush3.msra.mxu0 %v4450_v1  ;;  %5679 = vmatpush3.msra.mxu1 %v4467_v27 }
 0x206   :  { %5652 = vmatprep.subr.mxu0 %v4449_v3  ;;  %5680 = vmatprep.subr.mxu1 %v4466_v60 }
 0x207   :  { %5653 = vmatpush3.msra.mxu0 %v4449_v3  ;;  %5681 = vmatpush3.msra.mxu1 %v4466_v60 }
 0x208   :  { %5613 = vmatmul.mubr.msk.f32.gmra.mxu0 %vm2340_vm2, %v7456_v62  ;;  %5641 = vmatmul.mubr.msk.f32.gmra.mxu1 %vm2340_vm2, %v7456_v62 }
 0x209   :  { %5654 = vmatprep.subr.mxu0 %v4448_v34  ;;  %5682 = vmatprep.subr.mxu1 %v4465_v51 }
 0x20a   :  { %5615 = vmatprep.mubr.msk.f32.mxu0 %vm2340_vm2, %v7464_v6  ;;  %5643 = vmatprep.mubr.msk.f32.mxu1 %vm2340_vm2, %v7464_v6 }
 0x20b   :  { %5655 = vmatpush3.msra.mxu0 %v4448_v34  ;;  %5683 = vmatpush3.msra.mxu1 %v4465_v51 }
 0x20c   :  { %5656 = vmatprep.subr.mxu0 %v4447_v15  ;;  %5684 = vmatprep.subr.mxu1 %v4464_v37 }
 0x20d   :  { %5657 = vmatpush3.msra.mxu0 %v4447_v15  ;;  %5685 = vmatpush3.msra.mxu1 %v4464_v37 }
 0x20e   :  { %5616 = vmatmul.mubr.msk.f32.gmra.mxu0 %vm2340_vm2, %v7484_v56  ;;  %5644 = vmatmul.mubr.msk.f32.gmra.mxu1 %vm2340_vm2, %v7484_v56 }
 0x20f   :  { %5658 = vmatprep.subr.mxu0 %v4446_v7  ;;  %5686 = vmatprep.subr.mxu1 %v4463_v20 }
 0x210   :  { %5659 = vmatpush3.msra.mxu0 %v4446_v7  ;;  %5662 = vmatprep.mubr.msk.f32.mxu0 %vm2340_vm2, %v7359_v17 }
 0x211   :  { %5687 = vmatpush3.msra.mxu1 %v4463_v20  ;;  %5690 = vmatprep.mubr.msk.f32.mxu1 %vm2340_vm2, %v7359_v17  ;;  %v8020_v17 = vmov 0.0  }
 0x212   :  { %5660 = vmatprep.subr.mxu0 %v4445_v23  ;;  %5688 = vmatprep.subr.mxu1 %v4462_v21 }
 0x213   :  { %5661 = vmatpush3.msra.mxu0 %v4445_v23  ;;  %5689 = vmatpush3.msra.mxu1 %v4462_v21 }
 0x214   :  { %5663 = vmatmul.mubr.msk.f32.vlgmr.msra.gmra.mxu0 %vm2340_vm2, %v7392_v53  ;;  %5691 = vmatmul.mubr.msk.f32.vlgmr.msra.gmra.mxu1 %vm2340_vm2, %v7392_v53  ;;  %v3607_v53 = vld [vmem:[%s8012_s7 + $0x20] sm:$0xff] }
 0x215   :  { %5665 = vmatprep.mubr.msk.f32.mxu0 %vm2340_vm2, %v7408_v28  ;;  %5693 = vmatprep.mubr.msk.f32.mxu1 %vm2340_vm2, %v7408_v28  ;;  %v4484_v28 = vld [vmem:[%s8012_s7 + $0x48] sm:$0xff] }
 0x216   :  { %5702 = vmatprep.subr.mxu0 %v8020_v17  ;;  %5715 = vmatprep.subr.mxu1 %v8020_v17 }
 0x217   :  { %5716 = vmatpush3.msra.mxu1 %v3607_v53  ;;  %5703 = vmatpush3.msra.mxu0 %v4484_v28 }
 0x218   :  { %5666 = vmatmul.mubr.msk.f32.gmra.mxu0 %vm2340_vm2, %v7433_v54  ;;  %5694 = vmatmul.mubr.msk.f32.gmra.mxu1 %vm2340_vm2, %v7433_v54  ;;  %v3606_v54 = vld [vmem:[%s8012_s7 + $0x18] sm:$0xff] }
 0x219   :  { %5668 = vmatprep.mubr.msk.f32.mxu0 %vm2340_vm2, %v7456_v62  ;;  %5696 = vmatprep.mubr.msk.f32.mxu1 %vm2340_vm2, %v7456_v62  ;;  %v3605_v62 = vld [vmem:[%s8012_s7 + $0x10] sm:$0xff] }
 0x21a   :  { %5717 = vmatprep.subr.mxu1 %v8020_v17  ;;  %5704 = vmatprep.subr.mxu0 %v8020_v17 }
 0x21b   :  { %5718 = vmatpush3.msra.mxu1 %v3606_v54 }
 0x21c   :  { %5669 = vmatmul.mubr.msk.f32.gmra.mxu0 %vm2340_vm2, %v7464_v6  ;;  %5697 = vmatmul.mubr.msk.f32.gmra.mxu1 %vm2340_vm2, %v7464_v6  ;;  %v4483_v6 = vld [vmem:[%s8012_s7 + $0x40] sm:$0xff] }
 0x21d   :  { %5671 = vmatprep.mubr.msk.f32.mxu0 %vm2340_vm2, %v7484_v56  ;;  %5699 = vmatprep.mubr.msk.f32.mxu1 %vm2340_vm2, %v7484_v56 }
 0x21e   :  { %5719 = vmatprep.subr.mxu1 %v8020_v17  ;;  %5705 = vmatpush3.msra.mxu0 %v4483_v6 }
 0x21f   :  { %5720 = vmatpush3.msra.mxu1 %v3605_v62  ;;  %5706 = vmatprep.subr.mxu0 %v8020_v17 }
 0x220   :  { %5672 = vmatmul.mubr.msk.f32.gmra.mxu0 %vm2340_vm2, %v7503_v18  ;;  %5700 = vmatmul.mubr.msk.f32.gmra.mxu1 %vm2340_vm2, %v7503_v18 }
 0x221   :  { %5721 = vmatprep.subr.mxu1 %v8020_v17  ;;  %5707 = vmatpush3.msra.mxu0 %v4482_v0 }
 0x222   :  { %5722 = vmatpush3.msra.mxu1 %v3604_v33  ;;  %5708 = vmatprep.subr.mxu0 %v8020_v17 }
 0x223   :  { %5723 = vmatprep.subr.mxu1 %v8020_v17  ;;  %5709 = vmatpush3.msra.mxu0 %v4481_v42 }
 0x224   :  { %5724 = vmatpush3.msra.mxu1 %v3603_v31  ;;  %5725 = vmatprep.mubr.msk.f32.mxu1 %vm5804_vm3, %v8020_v17 }
 0x225   :  { %5710 = vmatprep.subr.mxu0 %v8020_v17  ;;  %5741 = vmatprep.subr.mxu1 %v8020_v17 }
 0x226   :  { %5711 = vmatpush3.msra.mxu0 %v4480_v61  ;;  %5712 = vmatprep.mubr.msk.f32.mxu0 %vm5804_vm3, %v8020_v17 }
 0x227   :  { %5728 = vmatprep.subr.mxu0 %v8020_v17 }
 0x270   :  { %v5440_v25 = vpop.f32.mrf.mxu0  ;;  %v5468_v63 = vpop.f32.mrf.mxu1 }
 0x272   :  { %v2434_v38 = vpop.f32.mrf.mxu0  ;;  %v2551_v12 = vpop.f32.mrf.mxu1 }
 0x278   :  { %v5443_v56 = vpop.f32.mrf.mxu0  ;;  %v5471_v8 = vpop.f32.mrf.mxu1 }
 0x27a   :  { %v2444_v14 = vpop.f32.mrf.mxu0  ;;  %v2561_v57 = vpop.f32.mrf.mxu1 }
 0x280   :  { %v7797_v47 = vpop.f32.mrf.mxu0  ;;  %v7799_v5 = vpop.f32.mrf.mxu1 }
 0x282   :  { %v7801_v18 = vpop.f32.mrf.mxu0  ;;  %v7803_v59 = vpop.f32.mrf.mxu1 }
 0x289   :  { %v7805_v10 = vpop.f32.mrf.mxu0  ;;  %v7807_v49 = vpop.f32.mrf.mxu1 }
 0x28b   :  { %v7809_v45 = vpop.f32.mrf.mxu0  ;;  %v7811_v13 = vpop.f32.mrf.mxu1 }
 0x28d   :  { %v5496_v44 = vpop.f32.mrf.mxu0  ;;  %v5524_v24 = vpop.f32.mrf.mxu1 }
 0x28e   :  { %v2668_v61 = vadd.f32 %v5496_v44, %v5440_v25  ;;  %v2776_v17 = vadd.f32 %v5524_v24, %v5468_v63 }
 0x28f   :  { %v2662_v26 = vpop.f32.mrf.mxu0  ;;  %v2770_v4 = vpop.f32.mrf.mxu1 }
 0x292   :  { %v5499_v50 = vpop.f32.mrf.mxu0  ;;  %v5527_v41 = vpop.f32.mrf.mxu1 }
 0x294   :  { %v2672_v30 = vpop.f32.mrf.mxu0  ;;  %v2780_v46 = vpop.f32.mrf.mxu1 }
 0x298   :  { %v5502_v11 = vpop.f32.mrf.mxu0  ;;  %v5530_v22 = vpop.f32.mrf.mxu1 }
 0x29a   :  { %v2682_v55 = vpop.f32.mrf.mxu0  ;;  %v2790_v48 = vpop.f32.mrf.mxu1 }
 0x29b   :  { %v2791_v25 = vadd.f32 %v2790_v48, %v7803_v59 }
 0x29e   :  { %v5505_v52 = vpop.f32.mrf.mxu0  ;;  %v5533_v43 = vpop.f32.mrf.mxu1 }
 0x29f   :  { %v2698_v63 = vadd.f32 %v5505_v52, %v7805_v10 }
 0x2a0   :  { %v2692_v35 = vpop.f32.mrf.mxu0  ;;  %v2800_v58 = vpop.f32.mrf.mxu1 }
 0x2a4   :  { %v5552_v32 = vpop.f32.mrf.mxu0  ;;  %v5580_v2 = vpop.f32.mrf.mxu1 }
 0x2a6   :  { %v2890_v19 = vpop.f32.mrf.mxu0  ;;  %v3007_v40 = vpop.f32.mrf.mxu1 }
 0x2aa   :  { %v5555_v16 = vpop.f32.mrf.mxu0  ;;  %v5583_v9 = vpop.f32.mrf.mxu1 }
 0x2ac   :  { %v2900_v29 = vpop.f32.mrf.mxu0  ;;  %v3017_v36 = vpop.f32.mrf.mxu1 }
 0x2b0   :  { %v5558_v39 = vpop.f32.mrf.mxu0  ;;  %v7813_v1 = vpop.f32.mrf.mxu1 }
 0x2b2   :  { %v7815_v27 = vpop.f32.mrf.mxu0  ;;  %v7817_v3 = vpop.f32.mrf.mxu1 }
 0x2b3   :  { %8172 = vst [vmem:[#allocation3_spill] sm:$0xff] %v7815_v27  ;;  %8173 = vst [vmem:[#allocation11_spill] sm:$0xff] %v7817_v3  ;;  %v2673_v3 = vadd.f32 %v2672_v30, %v2444_v14  ;;  %v7856_v30 = vld [vmem:[%s8013_s6] ss:$0 sm:$0xff] }
 0x2b6   :  { %v7819_v60 = vpop.f32.mrf.mxu0  ;;  %v7821_v34 = vpop.f32.mrf.mxu1 }
 0x2b7   :  { %8174 = vst [vmem:[#allocation4_spill] sm:$0xff] %v7819_v60  ;;  %8175 = vst [vmem:[#allocation12_spill] sm:$0xff] %v7821_v34  ;;  %v2678_v34 = vadd.f32 %v5499_v50, %v5443_v56  ;;  %v2786_v60 = vadd.f32 %v5527_v41, %v5471_v8  ;;  %v3048_v50 = vadd.f32 %v2900_v29, %v2673_v3 }
 0x2b8   :  { %v7823_v51 = vpop.f32.mrf.mxu0  ;;  %v7825_v15 = vpop.f32.mrf.mxu1 }
 0x2b9   :  { %8176 = vst [vmem:[#allocation2_spill] sm:$0xff] %v7823_v51  ;;  %8177 = vst [vmem:[#allocation13_spill] sm:$0xff] %v7825_v15  ;;  %v2663_v15 = vadd.f32 %v2662_v26, %v2434_v38  ;;  %v2771_v51 = vadd.f32 %v2770_v4, %v2551_v12  ;;  %v2806_v38 = vadd.f32 %v5533_v43, %v7807_v49 }
 0x2ba   :  { %v3049_v44 = vadd.f32 %v5555_v16, %v2678_v34  ;;  %v8185_v52 = vld [vmem:[#allocation3_spill] sm:$0xff] }
 0x2bb   :  { %v3046_v12 = vadd.f32 %v2890_v19, %v2663_v15  ;;  %v3054_v56 = vadd.f32 %v3007_v40, %v2771_v51 }
 0x2bc   :  { %v5608_v37 = vpop.f32.mrf.mxu0  ;;  %v5636_v7 = vpop.f32.mrf.mxu1 }
 0x2be   :  { %v3143_v20 = vpop.f32.mrf.mxu0  ;;  %v3260_v23 = vpop.f32.mrf.mxu1  ;;  %v8188_v3 = vld [vmem:[#allocation12_spill] sm:$0xff] }
 0x2bf   :  { %v3299_v26 = vadd.f32 %v3143_v20, %v3046_v12 }
 0x2c2   :  { %v5611_v21 = vpop.f32.mrf.mxu0  ;;  %v5639_v53 = vpop.f32.mrf.mxu1 }
 0x2c3   :  { %v3302_v49 = vadd.f32 %v5611_v21, %v3049_v44 }
 0x2c4   :  { %v3153_v28 = vpop.f32.mrf.mxu0  ;;  %v7827_v54 = vpop.f32.mrf.mxu1 }
 0x2c5   :  { %8178 = vst [vmem:[#allocation5_spill] sm:$0xff] %v7827_v54  ;;  %v2781_v54 = vadd.f32 %v2780_v46, %v2561_v57  ;;  %v2693_v57 = vadd.f32 %v2692_v35, %v7809_v45  ;;  %v8186_v35 = vld [vmem:[#allocation11_spill] sm:$0xff] }
 0x2c7   :  { %v3056_v10 = vadd.f32 %v3017_v36, %v2781_v54  ;;  %v8187_v36 = vld [vmem:[#allocation4_spill] sm:$0xff]  ;;  %v8192_v54 = vld [vmem:[#allocation2_spill] sm:$0xff] }
 0x2c8   :  { %v7829_v62 = vpop.f32.mrf.mxu0  ;;  %v7831_v6 = vpop.f32.mrf.mxu1 }
 0x2c9   :  { %8179 = vst [vmem:[#allocation14_spill] sm:$0xff] %v7829_v62  ;;  %8180 = vst [vmem:[#allocation15_spill] sm:$0xff] %v7831_v6  ;;  %v3047_v6 = vadd.f32 %v5552_v32, %v2668_v61  ;;  %v3301_v32 = vadd.f32 %v3153_v28, %v3048_v50 }
 0x2ca   :  { %v7833_v33 = vpop.f32.mrf.mxu0  ;;  %v7835_v0 = vpop.f32.mrf.mxu1 }
 0x2cb   :  { %8181 = vst [vmem:[#allocation6_spill] sm:$0xff] %v7833_v33  ;;  %8182 = vst [vmem:[#allocation7_spill] sm:$0xff] %v7835_v0  ;;  %v2688_v33 = vadd.f32 %v5502_v11, %v7797_v47  ;;  %v2796_v0 = vadd.f32 %v5530_v22, %v7799_v5  ;;  %v3300_v8 = vadd.f32 %v5608_v37, %v3047_v6 }
 0x2cc   :  { %v2801_v47 = vadd.f32 %v2800_v58, %v7811_v13  ;;  %v3057_v5 = vadd.f32 %v5583_v9, %v2786_v60  ;;  %v3058_v58 = vadd.f32 %v8186_v35, %v2791_v25  ;;  %v3061_v60 = vadd.f32 %v8188_v3, %v2806_v38  ;;  %v8189_v34 = vld [vmem:[#allocation5_spill] sm:$0xff] }
 0x2cd   :  { %v3051_v41 = vadd.f32 %v5558_v39, %v2688_v33  ;;  %v3059_v48 = vadd.f32 %v7813_v1, %v2796_v0  ;;  %v3053_v39 = vadd.f32 %v8187_v36, %v2698_v63  ;;  %v3309_v51 = vadd.f32 %v8189_v34, %v3056_v10  ;;  %v8193_v33 = vld [vmem:[#allocation13_spill] sm:$0xff]  ;;  %v4494_v34 = vld [vmem:[%s8012_s7 + $0x80] sm:$0xff] }
 0x2ce   :  { %v7837_v31 = vpop.f32.mrf.mxu0  ;;  %v7839_v42 = vpop.f32.mrf.mxu1  ;;  %v3310_v13 = vadd.f32 %v5639_v53, %v3057_v5  ;;  %v3052_v6 = vadd.f32 %v8192_v54, %v2693_v57  ;;  %v3060_v0 = vadd.f32 %v8193_v33, %v2801_v47  ;;  %v4487_v54 = vld [vmem:[%s8012_s7 + $0x50] sm:$0xff] }
 0x2cf   :  { %8183 = vst [vmem:[#allocation18_spill] sm:$0xff] %v7837_v31  ;;  %8184 = vst [vmem:[#allocation8_spill] sm:$0xff] %v7839_v42  ;;  %v3055_v31 = vadd.f32 %v5580_v2, %v2776_v17  ;;  %v2683_v42 = vadd.f32 %v2682_v55, %v7801_v18  ;;  %v3307_v18 = vadd.f32 %v3260_v23, %v3054_v56  ;;  %v3944_v33 = vld [vmem:[%s8014_s9 + $0x70] sm:$0xff] }
 0x2d0   :  { %v7841_v27 = vpop.f32.mrf.mxu0  ;;  %v7843_v62 = vpop.f32.mrf.mxu1  ;;  %v8190_v15 = vld [vmem:[#allocation14_spill] sm:$0xff]  ;;  %v8191_v20 = vld [vmem:[#allocation15_spill] sm:$0xff] }
 0x2d1   :  { %v3308_v14 = vadd.f32 %v5636_v7, %v3055_v31  ;;  %v3050_v43 = vadd.f32 %v8185_v52, %v2683_v42  ;;  %v3304_v1 = vadd.f32 %v8190_v15, %v3051_v41  ;;  %v3312_v23 = vadd.f32 %v8191_v20, %v3059_v48  ;;  %v4497_v41 = vld [vmem:[%s8012_s7 + $0x98] sm:$0xff]  ;;  %v4496_v52 = vld [vmem:[%s8012_s7 + $0x90] sm:$0xff] }
 0x2d2   :  { %v8194_v31 = vld [vmem:[#allocation6_spill] sm:$0xff] }
 0x2d3   :  { %v3303_v42 = vadd.f32 %v8194_v31, %v3050_v43  ;;  %v3942_v31 = vld [vmem:[%s8014_s9 + $0x60] sm:$0xff] }
 0x2d4   :  { %v5664_v24 = vpop.f32.mrf.mxu0  ;;  %v5692_v17 = vpop.f32.mrf.mxu1 }
 0x2d5   :  { %v3553_v4 = vadd.f32 %v5664_v24, %v3300_v8  ;;  %v3561_v59 = vadd.f32 %v5692_v17, %v3308_v14  ;;  %v8195_v14 = vld [vmem:[#allocation7_spill] sm:$0xff] }
 0x2d6   :  { %v3396_v45 = vpop.f32.mrf.mxu0  ;;  %v3513_v46 = vpop.f32.mrf.mxu1  ;;  %v3311_v44 = vadd.f32 %v8195_v14, %v3058_v58  ;;  %v8196_v5 = vld [vmem:[#allocation18_spill] sm:$0xff]  ;;  %v3933_v14 = vld [vmem:[%s8014_s9 + $0x18] sm:$0xff] }
 0x2d7   :  { %v3569_v11 = vmax.f32 %v3553_v4, %v3561_v59  ;;  %v3552_v22 = vadd.f32 %v3396_v45, %v3299_v26  ;;  %v3560_v55 = vadd.f32 %v3513_v46, %v3307_v18  ;;  %v3306_v24 = vadd.f32 %v8196_v5, %v3053_v39  ;;  %v8197_v4 = vld [vmem:[#allocation8_spill] sm:$0xff]  ;;  %v3931_v5 = vld [vmem:[%s8014_s9 + $0x8] sm:$0xff] }
 0x2d8   :  { %v5667_v2 = vpop.f32.mrf.mxu0  ;;  %v5695_v19 = vpop.f32.mrf.mxu1  ;;  %v3314_v47 = vadd.f32 %v8197_v4, %v3061_v60  ;;  %v4491_v39 = vld [vmem:[%s8012_s7 + $0x70] sm:$0xff] }
 0x2d9   :  { %v3584_v40 = vadd.f32 %v7856_v30, %v3569_v11  ;;  %v3568_v16 = vmax.f32 %v3552_v22, %v3560_v55  ;;  %v3555_v9 = vadd.f32 %v5667_v2, %v3302_v49  ;;  %v3563_v29 = vadd.f32 %v5695_v19, %v3310_v13 }
 0x2da   :  { %v3406_v37 = vpop.f32.mrf.mxu0  ;;  %v3523_v7 = vpop.f32.mrf.mxu1  ;;  %v3305_v11 = vadd.f32 %v7841_v27, %v3052_v6  ;;  %v3313_v22 = vadd.f32 %v7843_v62, %v3060_v0  ;;  %v3945_v6 = vld [vmem:[%s8014_s9 + $0x78] sm:$0xff]  ;;  %v3943_v0 = vld [vmem:[%s8014_s9 + $0x68] sm:$0xff] }
 0x2db   :  { %v3583_v21 = vadd.f32 %v7856_v30, %v3568_v16  ;;  %v3571_v53 = vmax.f32 %v3555_v9, %v3563_v29  ;;  %v3554_v28 = vadd.f32 %v3406_v37, %v3301_v32  ;;  %v3562_v61 = vadd.f32 %v3523_v7, %v3309_v51  ;;  %v4495_v9 = vld [vmem:[%s8012_s7 + $0x88] sm:$0xff]  ;;  %v4493_v7 = vld [vmem:[%s8012_s7 + $0x78] sm:$0xff] }
 0x2dc   :  { %v5670_v25 = vpop.f32.mrf.mxu0  ;;  %v5698_v63 = vpop.f32.mrf.mxu1  ;;  %v3592_v38 = vmax.f32 %v3584_v40, 0.0  ;;  %v8198_v40 = vmov 0.0  }
 0x2dd   :  { %v3591_v12 = vmax.f32 %v3583_v21, 0.0  ;;  %v3557_v56 = vadd.f32 %v5670_v25, %v3304_v1  ;;  %v3565_v8 = vadd.f32 %v5698_v63, %v3312_v23  ;;  %v3586_v17 = vadd.f32 %v7856_v30, %v3571_v53  ;;  %v4490_v1 = vld [vmem:[%s8012_s7 + $0x68] sm:$0xff]  ;;  %v4489_v23 = vld [vmem:[%s8012_s7 + $0x60] sm:$0xff] }
 0x2de   :  { %v3570_v26 = vmax.f32 %v3554_v28, %v3562_v61  ;;  %v3416_v18 = vpop.f32.mrf.mxu0  ;;  %v3533_v57 = vpop.f32.mrf.mxu1  ;;  %v3940_v61 = vld [vmem:[%s8014_s9 + $0x50] sm:$0xff]  ;;  %v3939_v25 = vld [vmem:[%s8014_s9 + $0x48] sm:$0xff]  ;;  %v3938_v63 = vld [vmem:[%s8014_s9 + $0x40] sm:$0xff] }
 0x2df   :  { %v3599_v59 = vmax.f32 %v3591_v12, %v3592_v38  ;;  %v3573_v50 = vmax.f32 %v3557_v56, %v3565_v8  ;;  %v3556_v10 = vadd.f32 %v3416_v18, %v3303_v42  ;;  %v3564_v45 = vadd.f32 %v3533_v57, %v3311_v44  ;;  %v3941_v42 = vld [vmem:[%s8014_s9 + $0x58] sm:$0xff]  ;;  %v3936_v12 = vld [vmem:[%s8014_s9 + $0x30] sm:$0xff]  ;;  %v3935_v56 = vld [vmem:[%s8014_s9 + $0x28] sm:$0xff] }
 0x2e0   :  { %v3585_v49 = vadd.f32 %v7856_v30, %v3570_v26  ;;  %v5673_v46 = vpop.f32.mrf.mxu0  ;;  %v5701_v13 = vpop.f32.mrf.mxu1  ;;  %v3594_v43 = vmax.f32 %v3586_v17, 0.0  ;;  %v3937_v38 = vld [vmem:[%s8014_s9 + $0x38] sm:$0xff]  ;;  %v3934_v8 = vld [vmem:[%s8014_s9 + $0x20] sm:$0xff]  ;;  %v3932_v44 = vld [vmem:[%s8014_s9 + $0x10] sm:$0xff] }
 0x2e1   :  { %v3559_v55 = vadd.f32 %v5673_v46, %v3306_v24  ;;  %v3567_v48 = vadd.f32 %v5701_v13, %v3314_v47  ;;  %5726 = vmatmul.mubr.msk.f32.vlgmr.msra.gmra.mxu1 %vm3614_vm4, %v3599_v59  ;;  %v3588_v58 = vadd.f32 %v7856_v30, %v3573_v50  ;;  %v3572_v32 = vmax.f32 %v3556_v10, %v3564_v45  ;;  %v3930_v24 = vld [vmem:[%s8014_s9] sm:$0xff] }
 0x2e2   :  { %v3593_v35 = vmax.f32 %v3585_v49, 0.0  ;;  %v3426_v2 = vpop.f32.mrf.mxu0  ;;  %v3543_v19 = vpop.f32.mrf.mxu1  ;;  %5742 = vmatpush3.msra.mxu1 %v4497_v41  ;;  %5751 = vmatprep.mubr.msk.f32.mxu1 %vm5804_vm3, %v8198_v40  ;;  %v4499_v41 = vld [vmem:[%s8015_s8] ss:$0 sm:$0xff] }
 0x2e3   :  { %v3575_v27 = vmax.f32 %v3559_v55, %v3567_v48  ;;  %v3558_v62 = vadd.f32 %v3426_v2, %v3305_v11  ;;  %v3566_v16 = vadd.f32 %v3543_v19, %v3313_v22  ;;  %5743 = vmatprep.subr.mxu1 %v8198_v40  ;;  %v3587_v36 = vadd.f32 %v7856_v30, %v3572_v32  ;;  %v4500_v11 = vld [vmem:[%s8016_s10] ss:$0 sm:$0xff] }
 0x2e4   :  { %v3600_v29 = vmax.f32 %v3593_v35, %v3594_v43  ;;  %5744 = vmatpush3.msra.mxu1 %v4496_v52  ;;  %v3596_v51 = vmax.f32 %v3588_v58, 0.0 }
 0x2e5   :  { %v3590_v3 = vadd.f32 %v7856_v30, %v3575_v27  ;;  %v3574_v60 = vmax.f32 %v3558_v62, %v3566_v16  ;;  %5745 = vmatprep.subr.mxu1 %v8198_v40  ;;  %v3595_v15 = vmax.f32 %v3587_v36, 0.0 }
 0x2e6   :  { %5713 = vmatmul.mubr.msk.f32.vlgmr.msra.gmra.mxu0 %vm3614_vm4, %v3600_v29  ;;  %5746 = vmatpush3.msra.mxu1 %v4495_v9 }
 0x2e7   :  { %v3589_v37 = vadd.f32 %v7856_v30, %v3574_v60  ;;  %5729 = vmatpush3.msra.mxu0 %v4491_v39  ;;  %5747 = vmatprep.subr.mxu1 %v8198_v40  ;;  %v3601_v20 = vmax.f32 %v3595_v15, %v3596_v51  ;;  %v3598_v21 = vmax.f32 %v3590_v3, 0.0  ;;  %v4488_v30 = vld [vmem:[%s8012_s7 + $0x58] sm:$0xff] }
 0x2e8   :  { %5730 = vmatprep.subr.mxu0 %v8198_v40  ;;  %5748 = vmatpush3.msra.mxu1 %v4494_v34 }
 0x2e9   :  { %v3597_v53 = vmax.f32 %v3589_v37, 0.0  ;;  %5731 = vmatpush3.msra.mxu0 %v4490_v1  ;;  %5749 = vmatprep.subr.mxu1 %v8198_v40 }
 0x2ea   :  { %5732 = vmatprep.subr.mxu0 %v8198_v40  ;;  %5750 = vmatpush3.msra.mxu1 %v4493_v7 }
 0x2eb   :  { %v3602_v28 = vmax.f32 %v3597_v53, %v3598_v21  ;;  %5733 = vmatpush3.msra.mxu0 %v4489_v23  ;;  %5738 = vmatprep.mubr.msk.f32.mxu0 %vm5804_vm3, %v8198_v40 }
 0x2ec   :  { %5734 = vmatprep.subr.mxu0 %v8198_v40 }
 0x2ed   :  { %5735 = vmatpush3.msra.mxu0 %v4488_v30  ;;  %5752 = vmatmul.mubr.msk.f32.vlgmr.msra.gmra.mxu1 %vm3614_vm4, %v3602_v28 }
 0x2ee   :  { %5736 = vmatprep.subr.mxu0 %v8198_v40 }
 0x2ef   :  { %5737 = vmatpush3.msra.mxu0 %v4487_v54 }
 0x2f0   :  { %5739 = vmatmul.mubr.msk.f32.vlgmr.msra.gmra.mxu0 %vm3614_vm4, %v3601_v20  ;;  %5754 = vmatprep.subr.mxu0 %v8198_v40 }
 0x2f1   :  { %5755 = vmatpush3.msra.mxu0 %v3945_v6  ;;  %5786 = vmatprep.mubr.msk.f32.mxu0 %vm5804_vm3, %v8198_v40 }
 0x2f2   :  { %5756 = vmatprep.subr.mxu0 %v8198_v40 }
 0x2f3   :  { %5757 = vmatpush3.msra.mxu0 %v3944_v33 }
 0x2f4   :  { %5758 = vmatprep.subr.mxu0 %v8198_v40 }
 0x2f5   :  { %5759 = vmatpush3.msra.mxu0 %v3943_v0 }
 0x2f6   :  { %5760 = vmatprep.subr.mxu0 %v8198_v40 }
 0x2f7   :  { %5761 = vmatpush3.msra.mxu0 %v3942_v31 }
 0x2f8   :  { %5762 = vmatprep.subr.mxu0 %v8198_v40 }
 0x2f9   :  { %5763 = vmatpush3.msra.mxu0 %v3941_v42 }
 0x2fa   :  { %5764 = vmatprep.subr.mxu0 %v8198_v40 }
 0x2fb   :  { %5765 = vmatpush3.msra.mxu0 %v3940_v61 }
 0x2fc   :  { %5766 = vmatprep.subr.mxu0 %v8198_v40 }
 0x2fd   :  { %5767 = vmatpush3.msra.mxu0 %v3939_v25 }
 0x2fe   :  { %5768 = vmatprep.subr.mxu0 %v8198_v40 }
 0x2ff   :  { %5769 = vmatpush3.msra.mxu0 %v3938_v63 }
 0x300   :  { %5770 = vmatprep.subr.mxu0 %v8198_v40 }
 0x301   :  { %5771 = vmatpush3.msra.mxu0 %v3937_v38 }
 0x302   :  { %5772 = vmatprep.subr.mxu0 %v8198_v40 }
 0x303   :  { %5773 = vmatpush3.msra.mxu0 %v3936_v12 }
 0x304   :  { %5774 = vmatprep.subr.mxu0 %v8198_v40 }
 0x305   :  { %5775 = vmatpush3.msra.mxu0 %v3935_v56 }
 0x306   :  { %5776 = vmatprep.subr.mxu0 %v8198_v40 }
 0x307   :  { %5777 = vmatpush3.msra.mxu0 %v3934_v8 }
 0x308   :  { %5778 = vmatprep.subr.mxu0 %v8198_v40 }
 0x309   :  { %5779 = vmatpush3.msra.mxu0 %v3933_v14 }
 0x30a   :  { %5780 = vmatprep.subr.mxu0 %v8198_v40 }
 0x30b   :  { %5781 = vmatpush3.msra.mxu0 %v3932_v44 }
 0x30c   :  { %5782 = vmatprep.subr.mxu0 %v8198_v40 }
 0x30d   :  { %5783 = vmatpush3.msra.mxu0 %v3931_v5 }
 0x30e   :  { %5784 = vmatprep.subr.mxu0 %v8198_v40 }
 0x30f   :  { %5785 = vmatpush3.msra.mxu0 %v3930_v24 }
 0x3a1   :  { %v3757_v17 = vpop.f32.mrf.mxu1 }
 0x3a3   :  { %v5727_v26 = vpop.f32.mrf.mxu1 }
 0x3a6   :  { %v3684_v18 = vpop.f32.mrf.mxu0 }
 0x3a7   :  { %v3758_v47 = vadd.f32 %v3757_v17, %v3684_v18 }
 0x3a8   :  { %v5714_v57 = vpop.f32.mrf.mxu0 }
 0x3ad   :  { %v3916_v4 = vpop.f32.mrf.mxu1 }
 0x3af   :  { %v5753_v59 = vpop.f32.mrf.mxu1 }
 0x3b0   :  { %v3836_v50 = vpop.f32.mrf.mxu0 }
 0x3b1   :  { %v3840_v10 = vadd.f32 %v3836_v50, %v3758_v47 }
 0x3b2   :  { %v5740_v49 = vpop.f32.mrf.mxu0 }
 0x3b3   :  { %v3920_v45 = vadd.f32 %v3916_v4, %v3840_v10 }
 0x3b5   :  { %v3928_v46 = vadd.f32 %v4499_v41, %v3920_v45 }
 0x3b7   :  { %v3929_v13 = vmax.f32 %v3928_v46, 0.0 }
 0x3b9   :  { %5787 = vmatmul.mubr.f32.vlgmr.msra.gmra.mxu0 %v3929_v13 }
 0x479   :  { %v4019_v22 = vpop.f32.mrf.mxu0 }
 0x47a   :  { %v4020_v55 = vadd.f32 %v4500_v11, %v4019_v22 }
 0x47b   :  { %v5788_v48 = vpop.f32.mrf.mxu0 }
 0x47c   :  { %v4024_v52 = vsel %vm4023_vm5, %v4020_v55, -inf }
 0x47d   :  { %4025 = vmax.xlane.f32.xlu0 %v4024_v52 }
 0x506   :  { %v4026_v43 = vpop.xlane.xlu0 %4025 }
 0x507   :  { %v4027_v35 = vsub.f32 %v4020_v55, %v4026_v43 }
 0x509   :  { %v4028_v58 = vmul.f32 1.442695, %v4027_v35 }
 0x50b   :  { %5799 = vpow2.f32 %v4028_v58 }
 0x518   :  { %v5800_v32 = vpop.eup %5799 }
 0x519   :  { %v4030_v2 = vsel %vm4023_vm5, %v5800_v32, 0.0 }
 0x51a   :  { %4031 = vadd.xlane.f32.xlu0 %v4030_v2 }
 0x5a3   :  { %v4032_v19 = vpop.xlane.xlu0 %4031 }
 0x5a4   :  { %5801 = vlog2.f32 %v4032_v19 }
 0x5b1   :  { %v5802_v40 = vpop.eup %5801 }
 0x5b2   :  { %v4034_v27 = vmul.f32 0.6931472, %v5802_v40 }
 0x5b4   :  { %v4035_v62 = vadd.f32 %v4034_v27, %v4026_v43 }
 0x5b6   :  { %v4036_v16 = vsub.f32 %v4020_v55, %v4035_v62 }
 0x5b8   :  { %4037 = vst.msk [vmem:[%s8017_s11] sm:$0xff] %vm4023_vm5, %v4036_v16 }

</bundles_post_ra>
